<compile_context>
chip_gen: v7x
topology: tpu7x:2x2x1
jax: 0.10.0
libtpu: 0.0.40
codegen_flags: <defaults>
</compile_context>

<pallas_src>
import jax
import jax.numpy as jnp
from jax.experimental import pallas as pl
from jax.experimental.pallas import tpu as pltpu


# ------------------------------ fused Pallas kernel ------------------------------ #

def _make_fused_kernel(n_layers, T, B, H):
    H4 = 4 * H

    def kernel(*refs):
        x_ref = refs[0]                                   # (T, B, F) time-major input
        layer_refs = refs[1:1 + 3 * n_layers]             # (wih, whh, b) per layer
        clf_w_ref = refs[1 + 3 * n_layers]                 # (H, C)
        clf_b_ref = refs[2 + 3 * n_layers]                 # (1, C)
        out_ref = refs[3 + 3 * n_layers]                   # (B, C)
        gates_scr = refs[4 + 3 * n_layers]                 # (T, B, 4H) VMEM scratch
        seq_scr = (refs[5 + 3 * n_layers],                 # (T, B, H) ping
                   refs[6 + 3 * n_layers])                 # (T, B, H) pong

        def run_layer(wih_ref, whh_ref, b_ref, x_flat, seq_out_ref):
            # Hoisted input projection for ALL timesteps: one big MXU matmul.
            gates_scr[...] = (
                jnp.dot(x_flat, wih_ref[...], preferred_element_type=jnp.float32)
                + b_ref[...]
            ).reshape(T, B, H4)

            whh = whh_ref[...]                             # (H, 4H), loaded once

            def step(t, carry):
                h, c = carry
                g = gates_scr[t] + jnp.dot(h, whh,
                                           preferred_element_type=jnp.float32)  # (B, 4H)
                sig = jax.nn.sigmoid(g)                    # full-vreg sigmoid
                th = jnp.tanh(g)                           # full-vreg tanh
                i_g = sig[:, 0 * H:1 * H]
                f_g = sig[:, 1 * H:2 * H]
                g_g = th[:, 2 * H:3 * H]
                o_g = sig[:, 3 * H:4 * H]
                c_new = f_g * c + i_g * g_g
                h_new = o_g * jnp.tanh(c_new)
                if seq_out_ref is not None:                # only non-last layers
                    seq_out_ref[t] = h_new                 # VMEM-resident, never HBM
                return h_new, c_new

            zeros = jnp.zeros((B, H), jnp.float32)
            h_last, _ = jax.lax.fori_loop(0, T, step, (zeros, zeros), unroll=True)
            return h_last

        x_flat = x_ref[...].reshape(T * B, x_ref.shape[-1])
        h_last = None
        for layer in range(n_layers):
            wih_ref, whh_ref, b_ref = layer_refs[3 * layer:3 * layer + 3]
            is_last = layer == n_layers - 1
            seq_out = None if is_last else seq_scr[layer % 2]
            h_last = run_layer(wih_ref, whh_ref, b_ref, x_flat, seq_out)
            if not is_last:
                x_flat = seq_out[...].reshape(T * B, H)

        # Fused classifier epilogue: hidden[-1] @ W_c^T + b_c
        out_ref[...] = (jnp.dot(h_last, clf_w_ref[...],
                                preferred_element_type=jnp.float32)
                        + clf_b_ref[...])

    return kernel


# ---------------------------------- host wrapper ---------------------------------- #

def sequence_model_forward(x, lstm_params, clf_w_t, clf_b):
    """x: (B, T, F) batch-first, like the PyTorch module."""
    B, T, F = x.shape
    n_layers = len(lstm_params)
    H = lstm_params[0][1].shape[0]
    C = clf_w_t.shape[1]

    # time-major so each recurrent step reads one contiguous (B, 4H) gate tile.
    x_tm = jnp.transpose(x, (1, 0, 2))

    flat_inputs = [x_tm]
    for (wih_t, whh_t, b) in lstm_params:
        flat_inputs += [wih_t, whh_t, b]
    flat_inputs += [clf_w_t, clf_b]

    kernel = _make_fused_kernel(n_layers=n_layers, T=T, B=B, H=H)

    return pl.pallas_call(
        kernel,
        out_shape=jax.ShapeDtypeStruct((B, C), jnp.float32),
        in_specs=[pl.BlockSpec(memory_space=pltpu.MemorySpace.VMEM)
                  for _ in flat_inputs],
        out_specs=pl.BlockSpec(memory_space=pltpu.MemorySpace.VMEM),
        scratch_shapes=[
            pltpu.VMEM((T, B, 4 * H), jnp.float32),   # hoisted input-projection gates
            pltpu.VMEM((T, B, H), jnp.float32),       # inter-layer hidden seq (ping)
            pltpu.VMEM((T, B, H), jnp.float32),       # inter-layer hidden seq (pong)
        ],
    )(*flat_inputs)


# ---------------------------- deterministic parameters ---------------------------- #

def init_params(key, n_features, n_hidden, n_layers, n_classes):
    lstm_params = []
    in_sz = n_features
    k = 1.0 / jnp.sqrt(jnp.float32(n_hidden))
    for _ in range(n_layers):
        key, k1, k2, k3, k4 = jax.random.split(key, 5)
        w_ih = jax.random.uniform(k1, (4 * n_hidden, in_sz), jnp.float32, -k, k)
        w_hh = jax.random.uniform(k2, (4 * n_hidden, n_hidden), jnp.float32, -k, k)
        b_ih = jax.random.uniform(k3, (4 * n_hidden,), jnp.float32, -k, k)
        b_hh = jax.random.uniform(k4, (4 * n_hidden,), jnp.float32, -k, k)
        # pre-transpose to (in, 4H); combine biases (b_ih + b_hh) like PyTorch's sum.
        lstm_params.append((w_ih.T, w_hh.T, (b_ih + b_hh).reshape(1, -1)))
        in_sz = n_hidden
    key, k5, k6 = jax.random.split(key, 3)
    kc = 1.0 / jnp.sqrt(jnp.float32(n_hidden))
    w_c = jax.random.uniform(k5, (n_classes, n_hidden), jnp.float32, -kc, kc)
    b_c = jax.random.uniform(k6, (n_classes,), jnp.float32, -kc, kc)
    return lstm_params, w_c.T, b_c.reshape(1, -1)


# ------------------------------- pure-JAX reference -------------------------------- #

def reference_forward(x, lstm_params, clf_w_t, clf_b):
    hi = jax.lax.Precision.HIGHEST
    seq = jnp.transpose(x, (1, 0, 2))          # (T, B, F)
    h_last = None
    for (wih_t, whh_t, b) in lstm_params:
        H = whh_t.shape[0]
        B = seq.shape[1]

        def step(carry, x_t, wih_t=wih_t, whh_t=whh_t, b=b, H=H):
            h, c = carry
            g = (jnp.dot(x_t, wih_t, precision=hi)
                 + jnp.dot(h, whh_t, precision=hi) + b)
            i = jax.nn.sigmoid(g[:, :H])
            f = jax.nn.sigmoid(g[:, H:2 * H])
            gg = jnp.tanh(g[:, 2 * H:3 * H])
            o = jax.nn.sigmoid(g[:, 3 * H:])
            c = f * c + i * gg
            h = o * jnp.tanh(c)
            return (h, c), h

        (h_last, _), seq = jax.lax.scan(
            step, (jnp.zeros((B, H)), jnp.zeros((B, H))), seq)
    return jnp.dot(h_last, clf_w_t, precision=hi) + clf_b


# --------------------------------------- main --------------------------------------- #

if __name__ == "__main__":
    # Small shapes consistent with the module (n_features=6; SequenceModel defaults
    # n_layers=3; n_hidden scaled down so 4H = 128 = one lane tile).
    B, T, F = 8, 16, 6
    n_hidden, n_layers, n_classes = 32, 3, 4

    key = jax.random.PRNGKey(0)
    key, kx = jax.random.split(key)
    x = jax.random.normal(kx, (B, T, F), jnp.float32)

    lstm_params, clf_w_t, clf_b = init_params(key, F, n_hidden, n_layers, n_classes)

    fwd = jax.jit(sequence_model_forward)
    out = jax.block_until_ready(fwd(x, lstm_params, clf_w_t, clf_b))

    ref = reference_forward(x, lstm_params, clf_w_t, clf_b)
    assert out.shape == (B, n_classes)
    assert jnp.allclose(out, ref, atol=1e-3, rtol=1e-3), (
        "mismatch vs reference, max abs diff = "
        f"{float(jnp.max(jnp.abs(out - ref)))}")

    print("KERNEL_OK")
</pallas_src>

<mosaic_0001>
module attributes {stable_mosaic.version = 11 : i64} {
  func.func @kernel(%arg0: memref<16x8x6xf32, #tpu.memory_space<vmem>>, %arg1: memref<6x128xf32, #tpu.memory_space<vmem>>, %arg2: memref<32x128xf32, #tpu.memory_space<vmem>>, %arg3: memref<1x128xf32, #tpu.memory_space<vmem>>, %arg4: memref<32x128xf32, #tpu.memory_space<vmem>>, %arg5: memref<32x128xf32, #tpu.memory_space<vmem>>, %arg6: memref<1x128xf32, #tpu.memory_space<vmem>>, %arg7: memref<32x128xf32, #tpu.memory_space<vmem>>, %arg8: memref<32x128xf32, #tpu.memory_space<vmem>>, %arg9: memref<1x128xf32, #tpu.memory_space<vmem>>, %arg10: memref<32x4xf32, #tpu.memory_space<vmem>>, %arg11: memref<1x4xf32, #tpu.memory_space<vmem>>, %arg12: memref<8x4xf32, #tpu.memory_space<vmem>>, %arg13: memref<16x8x128xf32, #tpu.memory_space<vmem>>, %arg14: memref<16x8x32xf32, #tpu.memory_space<vmem>>, %arg15: memref<16x8x32xf32, #tpu.memory_space<vmem>>) attributes {dimension_semantics = [], scalar_prefetch = 0 : i64, scratch_operands = 3 : i64, tpu.core_type = #tpu.core_type<tc>} {
    %c0 = arith.constant 0 : index
    %c0_0 = arith.constant 0 : index
    %c0_1 = arith.constant 0 : index
    %0 = vector.load %arg0[%c0, %c0_0, %c0_1] : memref<16x8x6xf32, #tpu.memory_space<vmem>>, vector<16x8x6xf32>
    %1 = vector.shape_cast %0 : vector<16x8x6xf32> to vector<128x6xf32>
    %c0_2 = arith.constant 0 : index
    %c0_3 = arith.constant 0 : index
    %2 = vector.load %arg1[%c0_2, %c0_3] : memref<6x128xf32, #tpu.memory_space<vmem>>, vector<6x128xf32>
    %cst = arith.constant dense<0.000000e+00> : vector<128x128xf32>
    %3 = tpu.matmul %1, %2, %cst {dimension_numbers = #tpu.dot_dimension_numbers<[1], [0], [0], [1], [0, 0, 1, 1], [], []>} : vector<128x6xf32>, vector<6x128xf32>, vector<128x128xf32> -> vector<128x128xf32>
    %c0_4 = arith.constant 0 : index
    %c0_5 = arith.constant 0 : index
    %4 = vector.load %arg3[%c0_4, %c0_5] : memref<1x128xf32, #tpu.memory_space<vmem>>, vector<1x128xf32>
    %5 = vector.broadcast %4 : vector<1x128xf32> to vector<128x128xf32>
    %6 = arith.addf %3, %5 : vector<128x128xf32>
    %7 = vector.shape_cast %6 : vector<128x128xf32> to vector<16x8x128xf32>
    %c0_6 = arith.constant 0 : index
    %c0_7 = arith.constant 0 : index
    %c0_8 = arith.constant 0 : index
    %8 = vector.load %arg13[%c0_6, %c0_7, %c0_8] : memref<16x8x128xf32, #tpu.memory_space<vmem>>, vector<16x8x128xf32>
    tpu.vector_store %arg13[%c0_6, %c0_7, %c0_8], %7 {strides = array<i32>} : memref<16x8x128xf32, #tpu.memory_space<vmem>>, vector<16x8x128xf32>,
    %c0_9 = arith.constant 0 : index
    %c0_10 = arith.constant 0 : index
    %9 = vector.load %arg2[%c0_9, %c0_10] : memref<32x128xf32, #tpu.memory_space<vmem>>, vector<32x128xf32>
    %cst_11 = arith.constant 0.000000e+00 : f32
    %10 = vector.broadcast %cst_11 : f32 to vector<8x32xf32>
    %c0_i32 = arith.constant 0 : i32
    %11 = arith.index_cast %c0_i32 : i32 to index
    %c0_12 = arith.constant 0 : index
    %c0_13 = arith.constant 0 : index
    %12 = vector.load %arg13[%11, %c0_12, %c0_13] : memref<16x8x128xf32, #tpu.memory_space<vmem>>, vector<1x8x128xf32>
    %13 = vector.shape_cast %12 : vector<1x8x128xf32> to vector<8x128xf32>
    %cst_14 = arith.constant dense<0.000000e+00> : vector<8x128xf32>
    %14 = tpu.matmul %10, %9, %cst_14 {dimension_numbers = #tpu.dot_dimension_numbers<[1], [0], [0], [1], [0, 0, 1, 1], [], []>} : vector<8x32xf32>, vector<32x128xf32>, vector<8x128xf32> -> vector<8x128xf32>
    %15 = arith.addf %13, %14 : vector<8x128xf32>
    %16 = arith.negf %15 : vector<8x128xf32>
    %17 = math.exp %16 : vector<8x128xf32>
    %cst_15 = arith.constant 1.000000e+00 : f32
    %18 = vector.broadcast %cst_15 : f32 to vector<8x128xf32>
    %19 = arith.addf %18, %17 : vector<8x128xf32>
    %20 = arith.divf %18, %19 : vector<8x128xf32>
    %21 = math.tanh %15 : vector<8x128xf32>
    %22 = vector.extract_strided_slice %20 {offsets = [0, 0], sizes = [8, 32], strides = [1, 1]} : vector<8x128xf32> to vector<8x32xf32>
    %23 = vector.extract_strided_slice %20 {offsets = [0, 32], sizes = [8, 32], strides = [1, 1]} : vector<8x128xf32> to vector<8x32xf32>
    %24 = vector.extract_strided_slice %21 {offsets = [0, 64], sizes = [8, 32], strides = [1, 1]} : vector<8x128xf32> to vector<8x32xf32>
    %25 = vector.extract_strided_slice %20 {offsets = [0, 96], sizes = [8, 32], strides = [1, 1]} : vector<8x128xf32> to vector<8x32xf32>
    %26 = arith.mulf %23, %10 : vector<8x32xf32>
    %27 = arith.mulf %22, %24 : vector<8x32xf32>
    %28 = arith.addf %26, %27 : vector<8x32xf32>
    %29 = math.tanh %28 : vector<8x32xf32>
    %30 = arith.mulf %25, %29 : vector<8x32xf32>
    %31 = arith.index_cast %c0_i32 : i32 to index
    %c0_16 = arith.constant 0 : index
    %c0_17 = arith.constant 0 : index
    %32 = vector.load %arg14[%31, %c0_16, %c0_17] : memref<16x8x32xf32, #tpu.memory_space<vmem>>, vector<1x8x32xf32>
    %33 = vector.shape_cast %32 : vector<1x8x32xf32> to vector<8x32xf32>
    %34 = vector.shape_cast %30 : vector<8x32xf32> to vector<1x8x32xf32>
    tpu.vector_store %arg14[%31, %c0_16, %c0_17], %34 {strides = array<i32>} : memref<16x8x32xf32, #tpu.memory_space<vmem>>, vector<1x8x32xf32>,
    %c1_i32 = arith.constant 1 : i32
    %35 = arith.index_cast %c1_i32 : i32 to index
    %c0_18 = arith.constant 0 : index
    %c0_19 = arith.constant 0 : index
    %36 = vector.load %arg13[%35, %c0_18, %c0_19] : memref<16x8x128xf32, #tpu.memory_space<vmem>>, vector<1x8x128xf32>
    %37 = vector.shape_cast %36 : vector<1x8x128xf32> to vector<8x128xf32>
    %cst_20 = arith.constant dense<0.000000e+00> : vector<8x128xf32>
    %38 = tpu.matmul %30, %9, %cst_20 {dimension_numbers = #tpu.dot_dimension_numbers<[1], [0], [0], [1], [0, 0, 1, 1], [], []>} : vector<8x32xf32>, vector<32x128xf32>, vector<8x128xf32> -> vector<8x128xf32>
    %39 = arith.addf %37, %38 : vector<8x128xf32>
    %40 = arith.negf %39 : vector<8x128xf32>
    %41 = math.exp %40 : vector<8x128xf32>
    %cst_21 = arith.constant 1.000000e+00 : f32
    %42 = vector.broadcast %cst_21 : f32 to vector<8x128xf32>
    %43 = arith.addf %42, %41 : vector<8x128xf32>
    %44 = arith.divf %42, %43 : vector<8x128xf32>
    %45 = math.tanh %39 : vector<8x128xf32>
    %46 = vector.extract_strided_slice %44 {offsets = [0, 0], sizes = [8, 32], strides = [1, 1]} : vector<8x128xf32> to vector<8x32xf32>
    %47 = vector.extract_strided_slice %44 {offsets = [0, 32], sizes = [8, 32], strides = [1, 1]} : vector<8x128xf32> to vector<8x32xf32>
    %48 = vector.extract_strided_slice %45 {offsets = [0, 64], sizes = [8, 32], strides = [1, 1]} : vector<8x128xf32> to vector<8x32xf32>
    %49 = vector.extract_strided_slice %44 {offsets = [0, 96], sizes = [8, 32], strides = [1, 1]} : vector<8x128xf32> to vector<8x32xf32>
    %50 = arith.mulf %47, %28 : vector<8x32xf32>
    %51 = arith.mulf %46, %48 : vector<8x32xf32>
    %52 = arith.addf %50, %51 : vector<8x32xf32>
    %53 = math.tanh %52 : vector<8x32xf32>
    %54 = arith.mulf %49, %53 : vector<8x32xf32>
    %55 = arith.index_cast %c1_i32 : i32 to index
    %c0_22 = arith.constant 0 : index
    %c0_23 = arith.constant 0 : index
    %56 = vector.load %arg14[%55, %c0_22, %c0_23] : memref<16x8x32xf32, #tpu.memory_space<vmem>>, vector<1x8x32xf32>
    %57 = vector.shape_cast %56 : vector<1x8x32xf32> to vector<8x32xf32>
    %58 = vector.shape_cast %54 : vector<8x32xf32> to vector<1x8x32xf32>
    tpu.vector_store %arg14[%55, %c0_22, %c0_23], %58 {strides = array<i32>} : memref<16x8x32xf32, #tpu.memory_space<vmem>>, vector<1x8x32xf32>,
    %c2_i32 = arith.constant 2 : i32
    %59 = arith.index_cast %c2_i32 : i32 to index
    %c0_24 = arith.constant 0 : index
    %c0_25 = arith.constant 0 : index
    %60 = vector.load %arg13[%59, %c0_24, %c0_25] : memref<16x8x128xf32, #tpu.memory_space<vmem>>, vector<1x8x128xf32>
    %61 = vector.shape_cast %60 : vector<1x8x128xf32> to vector<8x128xf32>
    %cst_26 = arith.constant dense<0.000000e+00> : vector<8x128xf32>
    %62 = tpu.matmul %54, %9, %cst_26 {dimension_numbers = #tpu.dot_dimension_numbers<[1], [0], [0], [1], [0, 0, 1, 1], [], []>} : vector<8x32xf32>, vector<32x128xf32>, vector<8x128xf32> -> vector<8x128xf32>
    %63 = arith.addf %61, %62 : vector<8x128xf32>
    %64 = arith.negf %63 : vector<8x128xf32>
    %65 = math.exp %64 : vector<8x128xf32>
    %cst_27 = arith.constant 1.000000e+00 : f32
    %66 = vector.broadcast %cst_27 : f32 to vector<8x128xf32>
    %67 = arith.addf %66, %65 : vector<8x128xf32>
    %68 = arith.divf %66, %67 : vector<8x128xf32>
    %69 = math.tanh %63 : vector<8x128xf32>
    %70 = vector.extract_strided_slice %68 {offsets = [0, 0], sizes = [8, 32], strides = [1, 1]} : vector<8x128xf32> to vector<8x32xf32>
    %71 = vector.extract_strided_slice %68 {offsets = [0, 32], sizes = [8, 32], strides = [1, 1]} : vector<8x128xf32> to vector<8x32xf32>
    %72 = vector.extract_strided_slice %69 {offsets = [0, 64], sizes = [8, 32], strides = [1, 1]} : vector<8x128xf32> to vector<8x32xf32>
    %73 = vector.extract_strided_slice %68 {offsets = [0, 96], sizes = [8, 32], strides = [1, 1]} : vector<8x128xf32> to vector<8x32xf32>
    %74 = arith.mulf %71, %52 : vector<8x32xf32>
    %75 = arith.mulf %70, %72 : vector<8x32xf32>
    %76 = arith.addf %74, %75 : vector<8x32xf32>
    %77 = math.tanh %76 : vector<8x32xf32>
    %78 = arith.mulf %73, %77 : vector<8x32xf32>
    %79 = arith.index_cast %c2_i32 : i32 to index
    %c0_28 = arith.constant 0 : index
    %c0_29 = arith.constant 0 : index
    %80 = vector.load %arg14[%79, %c0_28, %c0_29] : memref<16x8x32xf32, #tpu.memory_space<vmem>>, vector<1x8x32xf32>
    %81 = vector.shape_cast %80 : vector<1x8x32xf32> to vector<8x32xf32>
    %82 = vector.shape_cast %78 : vector<8x32xf32> to vector<1x8x32xf32>
    tpu.vector_store %arg14[%79, %c0_28, %c0_29], %82 {strides = array<i32>} : memref<16x8x32xf32, #tpu.memory_space<vmem>>, vector<1x8x32xf32>,
    %c3_i32 = arith.constant 3 : i32
    %83 = arith.index_cast %c3_i32 : i32 to index
    %c0_30 = arith.constant 0 : index
    %c0_31 = arith.constant 0 : index
    %84 = vector.load %arg13[%83, %c0_30, %c0_31] : memref<16x8x128xf32, #tpu.memory_space<vmem>>, vector<1x8x128xf32>
    %85 = vector.shape_cast %84 : vector<1x8x128xf32> to vector<8x128xf32>
    %cst_32 = arith.constant dense<0.000000e+00> : vector<8x128xf32>
    %86 = tpu.matmul %78, %9, %cst_32 {dimension_numbers = #tpu.dot_dimension_numbers<[1], [0], [0], [1], [0, 0, 1, 1], [], []>} : vector<8x32xf32>, vector<32x128xf32>, vector<8x128xf32> -> vector<8x128xf32>
    %87 = arith.addf %85, %86 : vector<8x128xf32>
    %88 = arith.negf %87 : vector<8x128xf32>
    %89 = math.exp %88 : vector<8x128xf32>
    %cst_33 = arith.constant 1.000000e+00 : f32
    %90 = vector.broadcast %cst_33 : f32 to vector<8x128xf32>
    %91 = arith.addf %90, %89 : vector<8x128xf32>
    %92 = arith.divf %90, %91 : vector<8x128xf32>
    %93 = math.tanh %87 : vector<8x128xf32>
    %94 = vector.extract_strided_slice %92 {offsets = [0, 0], sizes = [8, 32], strides = [1, 1]} : vector<8x128xf32> to vector<8x32xf32>
    %95 = vector.extract_strided_slice %92 {offsets = [0, 32], sizes = [8, 32], strides = [1, 1]} : vector<8x128xf32> to vector<8x32xf32>
    %96 = vector.extract_strided_slice %93 {offsets = [0, 64], sizes = [8, 32], strides = [1, 1]} : vector<8x128xf32> to vector<8x32xf32>
    %97 = vector.extract_strided_slice %92 {offsets = [0, 96], sizes = [8, 32], strides = [1, 1]} : vector<8x128xf32> to vector<8x32xf32>
    %98 = arith.mulf %95, %76 : vector<8x32xf32>
    %99 = arith.mulf %94, %96 : vector<8x32xf32>
    %100 = arith.addf %98, %99 : vector<8x32xf32>
    %101 = math.tanh %100 : vector<8x32xf32>
    %102 = arith.mulf %97, %101 : vector<8x32xf32>
    %103 = arith.index_cast %c3_i32 : i32 to index
    %c0_34 = arith.constant 0 : index
    %c0_35 = arith.constant 0 : index
    %104 = vector.load %arg14[%103, %c0_34, %c0_35] : memref<16x8x32xf32, #tpu.memory_space<vmem>>, vector<1x8x32xf32>
    %105 = vector.shape_cast %104 : vector<1x8x32xf32> to vector<8x32xf32>
    %106 = vector.shape_cast %102 : vector<8x32xf32> to vector<1x8x32xf32>
    tpu.vector_store %arg14[%103, %c0_34, %c0_35], %106 {strides = array<i32>} : memref<16x8x32xf32, #tpu.memory_space<vmem>>, vector<1x8x32xf32>,
    %c4_i32 = arith.constant 4 : i32
    %107 = arith.index_cast %c4_i32 : i32 to index
    %c0_36 = arith.constant 0 : index
    %c0_37 = arith.constant 0 : index
    %108 = vector.load %arg13[%107, %c0_36, %c0_37] : memref<16x8x128xf32, #tpu.memory_space<vmem>>, vector<1x8x128xf32>
    %109 = vector.shape_cast %108 : vector<1x8x128xf32> to vector<8x128xf32>
    %cst_38 = arith.constant dense<0.000000e+00> : vector<8x128xf32>
    %110 = tpu.matmul %102, %9, %cst_38 {dimension_numbers = #tpu.dot_dimension_numbers<[1], [0], [0], [1], [0, 0, 1, 1], [], []>} : vector<8x32xf32>, vector<32x128xf32>, vector<8x128xf32> -> vector<8x128xf32>
    %111 = arith.addf %109, %110 : vector<8x128xf32>
    %112 = arith.negf %111 : vector<8x128xf32>
    %113 = math.exp %112 : vector<8x128xf32>
    %cst_39 = arith.constant 1.000000e+00 : f32
    %114 = vector.broadcast %cst_39 : f32 to vector<8x128xf32>
    %115 = arith.addf %114, %113 : vector<8x128xf32>
    %116 = arith.divf %114, %115 : vector<8x128xf32>
    %117 = math.tanh %111 : vector<8x128xf32>
    %118 = vector.extract_strided_slice %116 {offsets = [0, 0], sizes = [8, 32], strides = [1, 1]} : vector<8x128xf32> to vector<8x32xf32>
    %119 = vector.extract_strided_slice %116 {offsets = [0, 32], sizes = [8, 32], strides = [1, 1]} : vector<8x128xf32> to vector<8x32xf32>
    %120 = vector.extract_strided_slice %117 {offsets = [0, 64], sizes = [8, 32], strides = [1, 1]} : vector<8x128xf32> to vector<8x32xf32>
    %121 = vector.extract_strided_slice %116 {offsets = [0, 96], sizes = [8, 32], strides = [1, 1]} : vector<8x128xf32> to vector<8x32xf32>
    %122 = arith.mulf %119, %100 : vector<8x32xf32>
    %123 = arith.mulf %118, %120 : vector<8x32xf32>
    %124 = arith.addf %122, %123 : vector<8x32xf32>
    %125 = math.tanh %124 : vector<8x32xf32>
    %126 = arith.mulf %121, %125 : vector<8x32xf32>
    %127 = arith.index_cast %c4_i32 : i32 to index
    %c0_40 = arith.constant 0 : index
    %c0_41 = arith.constant 0 : index
    %128 = vector.load %arg14[%127, %c0_40, %c0_41] : memref<16x8x32xf32, #tpu.memory_space<vmem>>, vector<1x8x32xf32>
    %129 = vector.shape_cast %128 : vector<1x8x32xf32> to vector<8x32xf32>
    %130 = vector.shape_cast %126 : vector<8x32xf32> to vector<1x8x32xf32>
    tpu.vector_store %arg14[%127, %c0_40, %c0_41], %130 {strides = array<i32>} : memref<16x8x32xf32, #tpu.memory_space<vmem>>, vector<1x8x32xf32>,
    %c5_i32 = arith.constant 5 : i32
    %131 = arith.index_cast %c5_i32 : i32 to index
    %c0_42 = arith.constant 0 : index
    %c0_43 = arith.constant 0 : index
    %132 = vector.load %arg13[%131, %c0_42, %c0_43] : memref<16x8x128xf32, #tpu.memory_space<vmem>>, vector<1x8x128xf32>
    %133 = vector.shape_cast %132 : vector<1x8x128xf32> to vector<8x128xf32>
    %cst_44 = arith.constant dense<0.000000e+00> : vector<8x128xf32>
    %134 = tpu.matmul %126, %9, %cst_44 {dimension_numbers = #tpu.dot_dimension_numbers<[1], [0], [0], [1], [0, 0, 1, 1], [], []>} : vector<8x32xf32>, vector<32x128xf32>, vector<8x128xf32> -> vector<8x128xf32>
    %135 = arith.addf %133, %134 : vector<8x128xf32>
    %136 = arith.negf %135 : vector<8x128xf32>
    %137 = math.exp %136 : vector<8x128xf32>
    %cst_45 = arith.constant 1.000000e+00 : f32
    %138 = vector.broadcast %cst_45 : f32 to vector<8x128xf32>
    %139 = arith.addf %138, %137 : vector<8x128xf32>
    %140 = arith.divf %138, %139 : vector<8x128xf32>
    %141 = math.tanh %135 : vector<8x128xf32>
    %142 = vector.extract_strided_slice %140 {offsets = [0, 0], sizes = [8, 32], strides = [1, 1]} : vector<8x128xf32> to vector<8x32xf32>
    %143 = vector.extract_strided_slice %140 {offsets = [0, 32], sizes = [8, 32], strides = [1, 1]} : vector<8x128xf32> to vector<8x32xf32>
    %144 = vector.extract_strided_slice %141 {offsets = [0, 64], sizes = [8, 32], strides = [1, 1]} : vector<8x128xf32> to vector<8x32xf32>
    %145 = vector.extract_strided_slice %140 {offsets = [0, 96], sizes = [8, 32], strides = [1, 1]} : vector<8x128xf32> to vector<8x32xf32>
    %146 = arith.mulf %143, %124 : vector<8x32xf32>
    %147 = arith.mulf %142, %144 : vector<8x32xf32>
    %148 = arith.addf %146, %147 : vector<8x32xf32>
    %149 = math.tanh %148 : vector<8x32xf32>
    %150 = arith.mulf %145, %149 : vector<8x32xf32>
    %151 = arith.index_cast %c5_i32 : i32 to index
    %c0_46 = arith.constant 0 : index
    %c0_47 = arith.constant 0 : index
    %152 = vector.load %arg14[%151, %c0_46, %c0_47] : memref<16x8x32xf32, #tpu.memory_space<vmem>>, vector<1x8x32xf32>
    %153 = vector.shape_cast %152 : vector<1x8x32xf32> to vector<8x32xf32>
    %154 = vector.shape_cast %150 : vector<8x32xf32> to vector<1x8x32xf32>
    tpu.vector_store %arg14[%151, %c0_46, %c0_47], %154 {strides = array<i32>} : memref<16x8x32xf32, #tpu.memory_space<vmem>>, vector<1x8x32xf32>,
    %c6_i32 = arith.constant 6 : i32
    %155 = arith.index_cast %c6_i32 : i32 to index
    %c0_48 = arith.constant 0 : index
    %c0_49 = arith.constant 0 : index
    %156 = vector.load %arg13[%155, %c0_48, %c0_49] : memref<16x8x128xf32, #tpu.memory_space<vmem>>, vector<1x8x128xf32>
    %157 = vector.shape_cast %156 : vector<1x8x128xf32> to vector<8x128xf32>
    %cst_50 = arith.constant dense<0.000000e+00> : vector<8x128xf32>
    %158 = tpu.matmul %150, %9, %cst_50 {dimension_numbers = #tpu.dot_dimension_numbers<[1], [0], [0], [1], [0, 0, 1, 1], [], []>} : vector<8x32xf32>, vector<32x128xf32>, vector<8x128xf32> -> vector<8x128xf32>
    %159 = arith.addf %157, %158 : vector<8x128xf32>
    %160 = arith.negf %159 : vector<8x128xf32>
    %161 = math.exp %160 : vector<8x128xf32>
    %cst_51 = arith.constant 1.000000e+00 : f32
    %162 = vector.broadcast %cst_51 : f32 to vector<8x128xf32>
    %163 = arith.addf %162, %161 : vector<8x128xf32>
    %164 = arith.divf %162, %163 : vector<8x128xf32>
    %165 = math.tanh %159 : vector<8x128xf32>
    %166 = vector.extract_strided_slice %164 {offsets = [0, 0], sizes = [8, 32], strides = [1, 1]} : vector<8x128xf32> to vector<8x32xf32>
    %167 = vector.extract_strided_slice %164 {offsets = [0, 32], sizes = [8, 32], strides = [1, 1]} : vector<8x128xf32> to vector<8x32xf32>
    %168 = vector.extract_strided_slice %165 {offsets = [0, 64], sizes = [8, 32], strides = [1, 1]} : vector<8x128xf32> to vector<8x32xf32>
    %169 = vector.extract_strided_slice %164 {offsets = [0, 96], sizes = [8, 32], strides = [1, 1]} : vector<8x128xf32> to vector<8x32xf32>
    %170 = arith.mulf %167, %148 : vector<8x32xf32>
    %171 = arith.mulf %166, %168 : vector<8x32xf32>
    %172 = arith.addf %170, %171 : vector<8x32xf32>
    %173 = math.tanh %172 : vector<8x32xf32>
    %174 = arith.mulf %169, %173 : vector<8x32xf32>
    %175 = arith.index_cast %c6_i32 : i32 to index
    %c0_52 = arith.constant 0 : index
    %c0_53 = arith.constant 0 : index
    %176 = vector.load %arg14[%175, %c0_52, %c0_53] : memref<16x8x32xf32, #tpu.memory_space<vmem>>, vector<1x8x32xf32>
    %177 = vector.shape_cast %176 : vector<1x8x32xf32> to vector<8x32xf32>
    %178 = vector.shape_cast %174 : vector<8x32xf32> to vector<1x8x32xf32>
    tpu.vector_store %arg14[%175, %c0_52, %c0_53], %178 {strides = array<i32>} : memref<16x8x32xf32, #tpu.memory_space<vmem>>, vector<1x8x32xf32>,
    %c7_i32 = arith.constant 7 : i32
    %179 = arith.index_cast %c7_i32 : i32 to index
    %c0_54 = arith.constant 0 : index
    %c0_55 = arith.constant 0 : index
    %180 = vector.load %arg13[%179, %c0_54, %c0_55] : memref<16x8x128xf32, #tpu.memory_space<vmem>>, vector<1x8x128xf32>
    %181 = vector.shape_cast %180 : vector<1x8x128xf32> to vector<8x128xf32>
    %cst_56 = arith.constant dense<0.000000e+00> : vector<8x128xf32>
    %182 = tpu.matmul %174, %9, %cst_56 {dimension_numbers = #tpu.dot_dimension_numbers<[1], [0], [0], [1], [0, 0, 1, 1], [], []>} : vector<8x32xf32>, vector<32x128xf32>, vector<8x128xf32> -> vector<8x128xf32>
    %183 = arith.addf %181, %182 : vector<8x128xf32>
    %184 = arith.negf %183 : vector<8x128xf32>
    %185 = math.exp %184 : vector<8x128xf32>
    %cst_57 = arith.constant 1.000000e+00 : f32
    %186 = vector.broadcast %cst_57 : f32 to vector<8x128xf32>
    %187 = arith.addf %186, %185 : vector<8x128xf32>
    %188 = arith.divf %186, %187 : vector<8x128xf32>
    %189 = math.tanh %183 : vector<8x128xf32>
    %190 = vector.extract_strided_slice %188 {offsets = [0, 0], sizes = [8, 32], strides = [1, 1]} : vector<8x128xf32> to vector<8x32xf32>
    %191 = vector.extract_strided_slice %188 {offsets = [0, 32], sizes = [8, 32], strides = [1, 1]} : vector<8x128xf32> to vector<8x32xf32>
    %192 = vector.extract_strided_slice %189 {offsets = [0, 64], sizes = [8, 32], strides = [1, 1]} : vector<8x128xf32> to vector<8x32xf32>
    %193 = vector.extract_strided_slice %188 {offsets = [0, 96], sizes = [8, 32], strides = [1, 1]} : vector<8x128xf32> to vector<8x32xf32>
    %194 = arith.mulf %191, %172 : vector<8x32xf32>
    %195 = arith.mulf %190, %192 : vector<8x32xf32>
    %196 = arith.addf %194, %195 : vector<8x32xf32>
    %197 = math.tanh %196 : vector<8x32xf32>
    %198 = arith.mulf %193, %197 : vector<8x32xf32>
    %199 = arith.index_cast %c7_i32 : i32 to index
    %c0_58 = arith.constant 0 : index
    %c0_59 = arith.constant 0 : index
    %200 = vector.load %arg14[%199, %c0_58, %c0_59] : memref<16x8x32xf32, #tpu.memory_space<vmem>>, vector<1x8x32xf32>
    %201 = vector.shape_cast %200 : vector<1x8x32xf32> to vector<8x32xf32>
    %202 = vector.shape_cast %198 : vector<8x32xf32> to vector<1x8x32xf32>
    tpu.vector_store %arg14[%199, %c0_58, %c0_59], %202 {strides = array<i32>} : memref<16x8x32xf32, #tpu.memory_space<vmem>>, vector<1x8x32xf32>,
    %c8_i32 = arith.constant 8 : i32
    %203 = arith.index_cast %c8_i32 : i32 to index
    %c0_60 = arith.constant 0 : index
    %c0_61 = arith.constant 0 : index
    %204 = vector.load %arg13[%203, %c0_60, %c0_61] : memref<16x8x128xf32, #tpu.memory_space<vmem>>, vector<1x8x128xf32>
    %205 = vector.shape_cast %204 : vector<1x8x128xf32> to vector<8x128xf32>
    %cst_62 = arith.constant dense<0.000000e+00> : vector<8x128xf32>
    %206 = tpu.matmul %198, %9, %cst_62 {dimension_numbers = #tpu.dot_dimension_numbers<[1], [0], [0], [1], [0, 0, 1, 1], [], []>} : vector<8x32xf32>, vector<32x128xf32>, vector<8x128xf32> -> vector<8x128xf32>
    %207 = arith.addf %205, %206 : vector<8x128xf32>
    %208 = arith.negf %207 : vector<8x128xf32>
    %209 = math.exp %208 : vector<8x128xf32>
    %cst_63 = arith.constant 1.000000e+00 : f32
    %210 = vector.broadcast %cst_63 : f32 to vector<8x128xf32>
    %211 = arith.addf %210, %209 : vector<8x128xf32>
    %212 = arith.divf %210, %211 : vector<8x128xf32>
    %213 = math.tanh %207 : vector<8x128xf32>
    %214 = vector.extract_strided_slice %212 {offsets = [0, 0], sizes = [8, 32], strides = [1, 1]} : vector<8x128xf32> to vector<8x32xf32>
    %215 = vector.extract_strided_slice %212 {offsets = [0, 32], sizes = [8, 32], strides = [1, 1]} : vector<8x128xf32> to vector<8x32xf32>
    %216 = vector.extract_strided_slice %213 {offsets = [0, 64], sizes = [8, 32], strides = [1, 1]} : vector<8x128xf32> to vector<8x32xf32>
    %217 = vector.extract_strided_slice %212 {offsets = [0, 96], sizes = [8, 32], strides = [1, 1]} : vector<8x128xf32> to vector<8x32xf32>
    %218 = arith.mulf %215, %196 : vector<8x32xf32>
    %219 = arith.mulf %214, %216 : vector<8x32xf32>
    %220 = arith.addf %218, %219 : vector<8x32xf32>
    %221 = math.tanh %220 : vector<8x32xf32>
    %222 = arith.mulf %217, %221 : vector<8x32xf32>
    %223 = arith.index_cast %c8_i32 : i32 to index
    %c0_64 = arith.constant 0 : index
    %c0_65 = arith.constant 0 : index
    %224 = vector.load %arg14[%223, %c0_64, %c0_65] : memref<16x8x32xf32, #tpu.memory_space<vmem>>, vector<1x8x32xf32>
    %225 = vector.shape_cast %224 : vector<1x8x32xf32> to vector<8x32xf32>
    %226 = vector.shape_cast %222 : vector<8x32xf32> to vector<1x8x32xf32>
    tpu.vector_store %arg14[%223, %c0_64, %c0_65], %226 {strides = array<i32>} : memref<16x8x32xf32, #tpu.memory_space<vmem>>, vector<1x8x32xf32>,
    %c9_i32 = arith.constant 9 : i32
    %227 = arith.index_cast %c9_i32 : i32 to index
    %c0_66 = arith.constant 0 : index
    %c0_67 = arith.constant 0 : index
    %228 = vector.load %arg13[%227, %c0_66, %c0_67] : memref<16x8x128xf32, #tpu.memory_space<vmem>>, vector<1x8x128xf32>
    %229 = vector.shape_cast %228 : vector<1x8x128xf32> to vector<8x128xf32>
    %cst_68 = arith.constant dense<0.000000e+00> : vector<8x128xf32>
    %230 = tpu.matmul %222, %9, %cst_68 {dimension_numbers = #tpu.dot_dimension_numbers<[1], [0], [0], [1], [0, 0, 1, 1], [], []>} : vector<8x32xf32>, vector<32x128xf32>, vector<8x128xf32> -> vector<8x128xf32>
    %231 = arith.addf %229, %230 : vector<8x128xf32>
    %232 = arith.negf %231 : vector<8x128xf32>
    %233 = math.exp %232 : vector<8x128xf32>
    %cst_69 = arith.constant 1.000000e+00 : f32
    %234 = vector.broadcast %cst_69 : f32 to vector<8x128xf32>
    %235 = arith.addf %234, %233 : vector<8x128xf32>
    %236 = arith.divf %234, %235 : vector<8x128xf32>
    %237 = math.tanh %231 : vector<8x128xf32>
    %238 = vector.extract_strided_slice %236 {offsets = [0, 0], sizes = [8, 32], strides = [1, 1]} : vector<8x128xf32> to vector<8x32xf32>
    %239 = vector.extract_strided_slice %236 {offsets = [0, 32], sizes = [8, 32], strides = [1, 1]} : vector<8x128xf32> to vector<8x32xf32>
    %240 = vector.extract_strided_slice %237 {offsets = [0, 64], sizes = [8, 32], strides = [1, 1]} : vector<8x128xf32> to vector<8x32xf32>
    %241 = vector.extract_strided_slice %236 {offsets = [0, 96], sizes = [8, 32], strides = [1, 1]} : vector<8x128xf32> to vector<8x32xf32>
    %242 = arith.mulf %239, %220 : vector<8x32xf32>
    %243 = arith.mulf %238, %240 : vector<8x32xf32>
    %244 = arith.addf %242, %243 : vector<8x32xf32>
    %245 = math.tanh %244 : vector<8x32xf32>
    %246 = arith.mulf %241, %245 : vector<8x32xf32>
    %247 = arith.index_cast %c9_i32 : i32 to index
    %c0_70 = arith.constant 0 : index
    %c0_71 = arith.constant 0 : index
    %248 = vector.load %arg14[%247, %c0_70, %c0_71] : memref<16x8x32xf32, #tpu.memory_space<vmem>>, vector<1x8x32xf32>
    %249 = vector.shape_cast %248 : vector<1x8x32xf32> to vector<8x32xf32>
    %250 = vector.shape_cast %246 : vector<8x32xf32> to vector<1x8x32xf32>
    tpu.vector_store %arg14[%247, %c0_70, %c0_71], %250 {strides = array<i32>} : memref<16x8x32xf32, #tpu.memory_space<vmem>>, vector<1x8x32xf32>,
    %c10_i32 = arith.constant 10 : i32
    %251 = arith.index_cast %c10_i32 : i32 to index
    %c0_72 = arith.constant 0 : index
    %c0_73 = arith.constant 0 : index
    %252 = vector.load %arg13[%251, %c0_72, %c0_73] : memref<16x8x128xf32, #tpu.memory_space<vmem>>, vector<1x8x128xf32>
    %253 = vector.shape_cast %252 : vector<1x8x128xf32> to vector<8x128xf32>
    %cst_74 = arith.constant dense<0.000000e+00> : vector<8x128xf32>
    %254 = tpu.matmul %246, %9, %cst_74 {dimension_numbers = #tpu.dot_dimension_numbers<[1], [0], [0], [1], [0, 0, 1, 1], [], []>} : vector<8x32xf32>, vector<32x128xf32>, vector<8x128xf32> -> vector<8x128xf32>
    %255 = arith.addf %253, %254 : vector<8x128xf32>
    %256 = arith.negf %255 : vector<8x128xf32>
    %257 = math.exp %256 : vector<8x128xf32>
    %cst_75 = arith.constant 1.000000e+00 : f32
    %258 = vector.broadcast %cst_75 : f32 to vector<8x128xf32>
    %259 = arith.addf %258, %257 : vector<8x128xf32>
    %260 = arith.divf %258, %259 : vector<8x128xf32>
    %261 = math.tanh %255 : vector<8x128xf32>
    %262 = vector.extract_strided_slice %260 {offsets = [0, 0], sizes = [8, 32], strides = [1, 1]} : vector<8x128xf32> to vector<8x32xf32>
    %263 = vector.extract_strided_slice %260 {offsets = [0, 32], sizes = [8, 32], strides = [1, 1]} : vector<8x128xf32> to vector<8x32xf32>
    %264 = vector.extract_strided_slice %261 {offsets = [0, 64], sizes = [8, 32], strides = [1, 1]} : vector<8x128xf32> to vector<8x32xf32>
    %265 = vector.extract_strided_slice %260 {offsets = [0, 96], sizes = [8, 32], strides = [1, 1]} : vector<8x128xf32> to vector<8x32xf32>
    %266 = arith.mulf %263, %244 : vector<8x32xf32>
    %267 = arith.mulf %262, %264 : vector<8x32xf32>
    %268 = arith.addf %266, %267 : vector<8x32xf32>
    %269 = math.tanh %268 : vector<8x32xf32>
    %270 = arith.mulf %265, %269 : vector<8x32xf32>
    %271 = arith.index_cast %c10_i32 : i32 to index
    %c0_76 = arith.constant 0 : index
    %c0_77 = arith.constant 0 : index
    %272 = vector.load %arg14[%271, %c0_76, %c0_77] : memref<16x8x32xf32, #tpu.memory_space<vmem>>, vector<1x8x32xf32>
    %273 = vector.shape_cast %272 : vector<1x8x32xf32> to vector<8x32xf32>
    %274 = vector.shape_cast %270 : vector<8x32xf32> to vector<1x8x32xf32>
    tpu.vector_store %arg14[%271, %c0_76, %c0_77], %274 {strides = array<i32>} : memref<16x8x32xf32, #tpu.memory_space<vmem>>, vector<1x8x32xf32>,
    %c11_i32 = arith.constant 11 : i32
    %275 = arith.index_cast %c11_i32 : i32 to index
    %c0_78 = arith.constant 0 : index
    %c0_79 = arith.constant 0 : index
    %276 = vector.load %arg13[%275, %c0_78, %c0_79] : memref<16x8x128xf32, #tpu.memory_space<vmem>>, vector<1x8x128xf32>
    %277 = vector.shape_cast %276 : vector<1x8x128xf32> to vector<8x128xf32>
    %cst_80 = arith.constant dense<0.000000e+00> : vector<8x128xf32>
    %278 = tpu.matmul %270, %9, %cst_80 {dimension_numbers = #tpu.dot_dimension_numbers<[1], [0], [0], [1], [0, 0, 1, 1], [], []>} : vector<8x32xf32>, vector<32x128xf32>, vector<8x128xf32> -> vector<8x128xf32>
    %279 = arith.addf %277, %278 : vector<8x128xf32>
    %280 = arith.negf %279 : vector<8x128xf32>
    %281 = math.exp %280 : vector<8x128xf32>
    %cst_81 = arith.constant 1.000000e+00 : f32
    %282 = vector.broadcast %cst_81 : f32 to vector<8x128xf32>
    %283 = arith.addf %282, %281 : vector<8x128xf32>
    %284 = arith.divf %282, %283 : vector<8x128xf32>
    %285 = math.tanh %279 : vector<8x128xf32>
    %286 = vector.extract_strided_slice %284 {offsets = [0, 0], sizes = [8, 32], strides = [1, 1]} : vector<8x128xf32> to vector<8x32xf32>
    %287 = vector.extract_strided_slice %284 {offsets = [0, 32], sizes = [8, 32], strides = [1, 1]} : vector<8x128xf32> to vector<8x32xf32>
    %288 = vector.extract_strided_slice %285 {offsets = [0, 64], sizes = [8, 32], strides = [1, 1]} : vector<8x128xf32> to vector<8x32xf32>
    %289 = vector.extract_strided_slice %284 {offsets = [0, 96], sizes = [8, 32], strides = [1, 1]} : vector<8x128xf32> to vector<8x32xf32>
    %290 = arith.mulf %287, %268 : vector<8x32xf32>
    %291 = arith.mulf %286, %288 : vector<8x32xf32>
    %292 = arith.addf %290, %291 : vector<8x32xf32>
    %293 = math.tanh %292 : vector<8x32xf32>
    %294 = arith.mulf %289, %293 : vector<8x32xf32>
    %295 = arith.index_cast %c11_i32 : i32 to index
    %c0_82 = arith.constant 0 : index
    %c0_83 = arith.constant 0 : index
    %296 = vector.load %arg14[%295, %c0_82, %c0_83] : memref<16x8x32xf32, #tpu.memory_space<vmem>>, vector<1x8x32xf32>
    %297 = vector.shape_cast %296 : vector<1x8x32xf32> to vector<8x32xf32>
    %298 = vector.shape_cast %294 : vector<8x32xf32> to vector<1x8x32xf32>
    tpu.vector_store %arg14[%295, %c0_82, %c0_83], %298 {strides = array<i32>} : memref<16x8x32xf32, #tpu.memory_space<vmem>>, vector<1x8x32xf32>,
    %c12_i32 = arith.constant 12 : i32
    %299 = arith.index_cast %c12_i32 : i32 to index
    %c0_84 = arith.constant 0 : index
    %c0_85 = arith.constant 0 : index
    %300 = vector.load %arg13[%299, %c0_84, %c0_85] : memref<16x8x128xf32, #tpu.memory_space<vmem>>, vector<1x8x128xf32>
    %301 = vector.shape_cast %300 : vector<1x8x128xf32> to vector<8x128xf32>
    %cst_86 = arith.constant dense<0.000000e+00> : vector<8x128xf32>
    %302 = tpu.matmul %294, %9, %cst_86 {dimension_numbers = #tpu.dot_dimension_numbers<[1], [0], [0], [1], [0, 0, 1, 1], [], []>} : vector<8x32xf32>, vector<32x128xf32>, vector<8x128xf32> -> vector<8x128xf32>
    %303 = arith.addf %301, %302 : vector<8x128xf32>
    %304 = arith.negf %303 : vector<8x128xf32>
    %305 = math.exp %304 : vector<8x128xf32>
    %cst_87 = arith.constant 1.000000e+00 : f32
    %306 = vector.broadcast %cst_87 : f32 to vector<8x128xf32>
    %307 = arith.addf %306, %305 : vector<8x128xf32>
    %308 = arith.divf %306, %307 : vector<8x128xf32>
    %309 = math.tanh %303 : vector<8x128xf32>
    %310 = vector.extract_strided_slice %308 {offsets = [0, 0], sizes = [8, 32], strides = [1, 1]} : vector<8x128xf32> to vector<8x32xf32>
    %311 = vector.extract_strided_slice %308 {offsets = [0, 32], sizes = [8, 32], strides = [1, 1]} : vector<8x128xf32> to vector<8x32xf32>
    %312 = vector.extract_strided_slice %309 {offsets = [0, 64], sizes = [8, 32], strides = [1, 1]} : vector<8x128xf32> to vector<8x32xf32>
    %313 = vector.extract_strided_slice %308 {offsets = [0, 96], sizes = [8, 32], strides = [1, 1]} : vector<8x128xf32> to vector<8x32xf32>
    %314 = arith.mulf %311, %292 : vector<8x32xf32>
    %315 = arith.mulf %310, %312 : vector<8x32xf32>
    %316 = arith.addf %314, %315 : vector<8x32xf32>
    %317 = math.tanh %316 : vector<8x32xf32>
    %318 = arith.mulf %313, %317 : vector<8x32xf32>
    %319 = arith.index_cast %c12_i32 : i32 to index
    %c0_88 = arith.constant 0 : index
    %c0_89 = arith.constant 0 : index
    %320 = vector.load %arg14[%319, %c0_88, %c0_89] : memref<16x8x32xf32, #tpu.memory_space<vmem>>, vector<1x8x32xf32>
    %321 = vector.shape_cast %320 : vector<1x8x32xf32> to vector<8x32xf32>
    %322 = vector.shape_cast %318 : vector<8x32xf32> to vector<1x8x32xf32>
    tpu.vector_store %arg14[%319, %c0_88, %c0_89], %322 {strides = array<i32>} : memref<16x8x32xf32, #tpu.memory_space<vmem>>, vector<1x8x32xf32>,
    %c13_i32 = arith.constant 13 : i32
    %323 = arith.index_cast %c13_i32 : i32 to index
    %c0_90 = arith.constant 0 : index
    %c0_91 = arith.constant 0 : index
    %324 = vector.load %arg13[%323, %c0_90, %c0_91] : memref<16x8x128xf32, #tpu.memory_space<vmem>>, vector<1x8x128xf32>
    %325 = vector.shape_cast %324 : vector<1x8x128xf32> to vector<8x128xf32>
    %cst_92 = arith.constant dense<0.000000e+00> : vector<8x128xf32>
    %326 = tpu.matmul %318, %9, %cst_92 {dimension_numbers = #tpu.dot_dimension_numbers<[1], [0], [0], [1], [0, 0, 1, 1], [], []>} : vector<8x32xf32>, vector<32x128xf32>, vector<8x128xf32> -> vector<8x128xf32>
    %327 = arith.addf %325, %326 : vector<8x128xf32>
    %328 = arith.negf %327 : vector<8x128xf32>
    %329 = math.exp %328 : vector<8x128xf32>
    %cst_93 = arith.constant 1.000000e+00 : f32
    %330 = vector.broadcast %cst_93 : f32 to vector<8x128xf32>
    %331 = arith.addf %330, %329 : vector<8x128xf32>
    %332 = arith.divf %330, %331 : vector<8x128xf32>
    %333 = math.tanh %327 : vector<8x128xf32>
    %334 = vector.extract_strided_slice %332 {offsets = [0, 0], sizes = [8, 32], strides = [1, 1]} : vector<8x128xf32> to vector<8x32xf32>
    %335 = vector.extract_strided_slice %332 {offsets = [0, 32], sizes = [8, 32], strides = [1, 1]} : vector<8x128xf32> to vector<8x32xf32>
    %336 = vector.extract_strided_slice %333 {offsets = [0, 64], sizes = [8, 32], strides = [1, 1]} : vector<8x128xf32> to vector<8x32xf32>
    %337 = vector.extract_strided_slice %332 {offsets = [0, 96], sizes = [8, 32], strides = [1, 1]} : vector<8x128xf32> to vector<8x32xf32>
    %338 = arith.mulf %335, %316 : vector<8x32xf32>
    %339 = arith.mulf %334, %336 : vector<8x32xf32>
    %340 = arith.addf %338, %339 : vector<8x32xf32>
    %341 = math.tanh %340 : vector<8x32xf32>
    %342 = arith.mulf %337, %341 : vector<8x32xf32>
    %343 = arith.index_cast %c13_i32 : i32 to index
    %c0_94 = arith.constant 0 : index
    %c0_95 = arith.constant 0 : index
    %344 = vector.load %arg14[%343, %c0_94, %c0_95] : memref<16x8x32xf32, #tpu.memory_space<vmem>>, vector<1x8x32xf32>
    %345 = vector.shape_cast %344 : vector<1x8x32xf32> to vector<8x32xf32>
    %346 = vector.shape_cast %342 : vector<8x32xf32> to vector<1x8x32xf32>
    tpu.vector_store %arg14[%343, %c0_94, %c0_95], %346 {strides = array<i32>} : memref<16x8x32xf32, #tpu.memory_space<vmem>>, vector<1x8x32xf32>,
    %c14_i32 = arith.constant 14 : i32
    %347 = arith.index_cast %c14_i32 : i32 to index
    %c0_96 = arith.constant 0 : index
    %c0_97 = arith.constant 0 : index
    %348 = vector.load %arg13[%347, %c0_96, %c0_97] : memref<16x8x128xf32, #tpu.memory_space<vmem>>, vector<1x8x128xf32>
    %349 = vector.shape_cast %348 : vector<1x8x128xf32> to vector<8x128xf32>
    %cst_98 = arith.constant dense<0.000000e+00> : vector<8x128xf32>
    %350 = tpu.matmul %342, %9, %cst_98 {dimension_numbers = #tpu.dot_dimension_numbers<[1], [0], [0], [1], [0, 0, 1, 1], [], []>} : vector<8x32xf32>, vector<32x128xf32>, vector<8x128xf32> -> vector<8x128xf32>
    %351 = arith.addf %349, %350 : vector<8x128xf32>
    %352 = arith.negf %351 : vector<8x128xf32>
    %353 = math.exp %352 : vector<8x128xf32>
    %cst_99 = arith.constant 1.000000e+00 : f32
    %354 = vector.broadcast %cst_99 : f32 to vector<8x128xf32>
    %355 = arith.addf %354, %353 : vector<8x128xf32>
    %356 = arith.divf %354, %355 : vector<8x128xf32>
    %357 = math.tanh %351 : vector<8x128xf32>
    %358 = vector.extract_strided_slice %356 {offsets = [0, 0], sizes = [8, 32], strides = [1, 1]} : vector<8x128xf32> to vector<8x32xf32>
    %359 = vector.extract_strided_slice %356 {offsets = [0, 32], sizes = [8, 32], strides = [1, 1]} : vector<8x128xf32> to vector<8x32xf32>
    %360 = vector.extract_strided_slice %357 {offsets = [0, 64], sizes = [8, 32], strides = [1, 1]} : vector<8x128xf32> to vector<8x32xf32>
    %361 = vector.extract_strided_slice %356 {offsets = [0, 96], sizes = [8, 32], strides = [1, 1]} : vector<8x128xf32> to vector<8x32xf32>
    %362 = arith.mulf %359, %340 : vector<8x32xf32>
    %363 = arith.mulf %358, %360 : vector<8x32xf32>
    %364 = arith.addf %362, %363 : vector<8x32xf32>
    %365 = math.tanh %364 : vector<8x32xf32>
    %366 = arith.mulf %361, %365 : vector<8x32xf32>
    %367 = arith.index_cast %c14_i32 : i32 to index
    %c0_100 = arith.constant 0 : index
    %c0_101 = arith.constant 0 : index
    %368 = vector.load %arg14[%367, %c0_100, %c0_101] : memref<16x8x32xf32, #tpu.memory_space<vmem>>, vector<1x8x32xf32>
    %369 = vector.shape_cast %368 : vector<1x8x32xf32> to vector<8x32xf32>
    %370 = vector.shape_cast %366 : vector<8x32xf32> to vector<1x8x32xf32>
    tpu.vector_store %arg14[%367, %c0_100, %c0_101], %370 {strides = array<i32>} : memref<16x8x32xf32, #tpu.memory_space<vmem>>, vector<1x8x32xf32>,
    %c15_i32 = arith.constant 15 : i32
    %371 = arith.index_cast %c15_i32 : i32 to index
    %c0_102 = arith.constant 0 : index
    %c0_103 = arith.constant 0 : index
    %372 = vector.load %arg13[%371, %c0_102, %c0_103] : memref<16x8x128xf32, #tpu.memory_space<vmem>>, vector<1x8x128xf32>
    %373 = vector.shape_cast %372 : vector<1x8x128xf32> to vector<8x128xf32>
    %cst_104 = arith.constant dense<0.000000e+00> : vector<8x128xf32>
    %374 = tpu.matmul %366, %9, %cst_104 {dimension_numbers = #tpu.dot_dimension_numbers<[1], [0], [0], [1], [0, 0, 1, 1], [], []>} : vector<8x32xf32>, vector<32x128xf32>, vector<8x128xf32> -> vector<8x128xf32>
    %375 = arith.addf %373, %374 : vector<8x128xf32>
    %376 = arith.negf %375 : vector<8x128xf32>
    %377 = math.exp %376 : vector<8x128xf32>
    %cst_105 = arith.constant 1.000000e+00 : f32
    %378 = vector.broadcast %cst_105 : f32 to vector<8x128xf32>
    %379 = arith.addf %378, %377 : vector<8x128xf32>
    %380 = arith.divf %378, %379 : vector<8x128xf32>
    %381 = math.tanh %375 : vector<8x128xf32>
    %382 = vector.extract_strided_slice %380 {offsets = [0, 0], sizes = [8, 32], strides = [1, 1]} : vector<8x128xf32> to vector<8x32xf32>
    %383 = vector.extract_strided_slice %380 {offsets = [0, 32], sizes = [8, 32], strides = [1, 1]} : vector<8x128xf32> to vector<8x32xf32>
    %384 = vector.extract_strided_slice %381 {offsets = [0, 64], sizes = [8, 32], strides = [1, 1]} : vector<8x128xf32> to vector<8x32xf32>
    %385 = vector.extract_strided_slice %380 {offsets = [0, 96], sizes = [8, 32], strides = [1, 1]} : vector<8x128xf32> to vector<8x32xf32>
    %386 = arith.mulf %383, %364 : vector<8x32xf32>
    %387 = arith.mulf %382, %384 : vector<8x32xf32>
    %388 = arith.addf %386, %387 : vector<8x32xf32>
    %389 = math.tanh %388 : vector<8x32xf32>
    %390 = arith.mulf %385, %389 : vector<8x32xf32>
    %391 = arith.index_cast %c15_i32 : i32 to index
    %c0_106 = arith.constant 0 : index
    %c0_107 = arith.constant 0 : index
    %392 = vector.load %arg14[%391, %c0_106, %c0_107] : memref<16x8x32xf32, #tpu.memory_space<vmem>>, vector<1x8x32xf32>
    %393 = vector.shape_cast %392 : vector<1x8x32xf32> to vector<8x32xf32>
    %394 = vector.shape_cast %390 : vector<8x32xf32> to vector<1x8x32xf32>
    tpu.vector_store %arg14[%391, %c0_106, %c0_107], %394 {strides = array<i32>} : memref<16x8x32xf32, #tpu.memory_space<vmem>>, vector<1x8x32xf32>,
    %c16_i32 = arith.constant 16 : i32
    %c0_108 = arith.constant 0 : index
    %c0_109 = arith.constant 0 : index
    %c0_110 = arith.constant 0 : index
    %395 = vector.load %arg14[%c0_108, %c0_109, %c0_110] : memref<16x8x32xf32, #tpu.memory_space<vmem>>, vector<16x8x32xf32>
    %396 = vector.shape_cast %395 : vector<16x8x32xf32> to vector<128x32xf32>
    %c0_111 = arith.constant 0 : index
    %c0_112 = arith.constant 0 : index
    %397 = vector.load %arg4[%c0_111, %c0_112] : memref<32x128xf32, #tpu.memory_space<vmem>>, vector<32x128xf32>
    %cst_113 = arith.constant dense<0.000000e+00> : vector<128x128xf32>
    %398 = tpu.matmul %396, %397, %cst_113 {dimension_numbers = #tpu.dot_dimension_numbers<[1], [0], [0], [1], [0, 0, 1, 1], [], []>} : vector<128x32xf32>, vector<32x128xf32>, vector<128x128xf32> -> vector<128x128xf32>
    %c0_114 = arith.constant 0 : index
    %c0_115 = arith.constant 0 : index
    %399 = vector.load %arg6[%c0_114, %c0_115] : memref<1x128xf32, #tpu.memory_space<vmem>>, vector<1x128xf32>
    %400 = vector.broadcast %399 : vector<1x128xf32> to vector<128x128xf32>
    %401 = arith.addf %398, %400 : vector<128x128xf32>
    %402 = vector.shape_cast %401 : vector<128x128xf32> to vector<16x8x128xf32>
    %c0_116 = arith.constant 0 : index
    %c0_117 = arith.constant 0 : index
    %c0_118 = arith.constant 0 : index
    %403 = vector.load %arg13[%c0_116, %c0_117, %c0_118] : memref<16x8x128xf32, #tpu.memory_space<vmem>>, vector<16x8x128xf32>
    tpu.vector_store %arg13[%c0_116, %c0_117, %c0_118], %402 {strides = array<i32>} : memref<16x8x128xf32, #tpu.memory_space<vmem>>, vector<16x8x128xf32>,
    %c0_119 = arith.constant 0 : index
    %c0_120 = arith.constant 0 : index
    %404 = vector.load %arg5[%c0_119, %c0_120] : memref<32x128xf32, #tpu.memory_space<vmem>>, vector<32x128xf32>
    %cst_121 = arith.constant 0.000000e+00 : f32
    %405 = vector.broadcast %cst_121 : f32 to vector<8x32xf32>
    %c0_i32_122 = arith.constant 0 : i32
    %406 = arith.index_cast %c0_i32_122 : i32 to index
    %c0_123 = arith.constant 0 : index
    %c0_124 = arith.constant 0 : index
    %407 = vector.load %arg13[%406, %c0_123, %c0_124] : memref<16x8x128xf32, #tpu.memory_space<vmem>>, vector<1x8x128xf32>
    %408 = vector.shape_cast %407 : vector<1x8x128xf32> to vector<8x128xf32>
    %cst_125 = arith.constant dense<0.000000e+00> : vector<8x128xf32>
    %409 = tpu.matmul %405, %404, %cst_125 {dimension_numbers = #tpu.dot_dimension_numbers<[1], [0], [0], [1], [0, 0, 1, 1], [], []>} : vector<8x32xf32>, vector<32x128xf32>, vector<8x128xf32> -> vector<8x128xf32>
    %410 = arith.addf %408, %409 : vector<8x128xf32>
    %411 = arith.negf %410 : vector<8x128xf32>
    %412 = math.exp %411 : vector<8x128xf32>
    %cst_126 = arith.constant 1.000000e+00 : f32
    %413 = vector.broadcast %cst_126 : f32 to vector<8x128xf32>
    %414 = arith.addf %413, %412 : vector<8x128xf32>
    %415 = arith.divf %413, %414 : vector<8x128xf32>
    %416 = math.tanh %410 : vector<8x128xf32>
    %417 = vector.extract_strided_slice %415 {offsets = [0, 0], sizes = [8, 32], strides = [1, 1]} : vector<8x128xf32> to vector<8x32xf32>
    %418 = vector.extract_strided_slice %415 {offsets = [0, 32], sizes = [8, 32], strides = [1, 1]} : vector<8x128xf32> to vector<8x32xf32>
    %419 = vector.extract_strided_slice %416 {offsets = [0, 64], sizes = [8, 32], strides = [1, 1]} : vector<8x128xf32> to vector<8x32xf32>
    %420 = vector.extract_strided_slice %415 {offsets = [0, 96], sizes = [8, 32], strides = [1, 1]} : vector<8x128xf32> to vector<8x32xf32>
    %421 = arith.mulf %418, %405 : vector<8x32xf32>
    %422 = arith.mulf %417, %419 : vector<8x32xf32>
    %423 = arith.addf %421, %422 : vector<8x32xf32>
    %424 = math.tanh %423 : vector<8x32xf32>
    %425 = arith.mulf %420, %424 : vector<8x32xf32>
    %426 = arith.index_cast %c0_i32_122 : i32 to index
    %c0_127 = arith.constant 0 : index
    %c0_128 = arith.constant 0 : index
    %427 = vector.load %arg15[%426, %c0_127, %c0_128] : memref<16x8x32xf32, #tpu.memory_space<vmem>>, vector<1x8x32xf32>
    %428 = vector.shape_cast %427 : vector<1x8x32xf32> to vector<8x32xf32>
    %429 = vector.shape_cast %425 : vector<8x32xf32> to vector<1x8x32xf32>
    tpu.vector_store %arg15[%426, %c0_127, %c0_128], %429 {strides = array<i32>} : memref<16x8x32xf32, #tpu.memory_space<vmem>>, vector<1x8x32xf32>,
    %c1_i32_129 = arith.constant 1 : i32
    %430 = arith.index_cast %c1_i32_129 : i32 to index
    %c0_130 = arith.constant 0 : index
    %c0_131 = arith.constant 0 : index
    %431 = vector.load %arg13[%430, %c0_130, %c0_131] : memref<16x8x128xf32, #tpu.memory_space<vmem>>, vector<1x8x128xf32>
    %432 = vector.shape_cast %431 : vector<1x8x128xf32> to vector<8x128xf32>
    %cst_132 = arith.constant dense<0.000000e+00> : vector<8x128xf32>
    %433 = tpu.matmul %425, %404, %cst_132 {dimension_numbers = #tpu.dot_dimension_numbers<[1], [0], [0], [1], [0, 0, 1, 1], [], []>} : vector<8x32xf32>, vector<32x128xf32>, vector<8x128xf32> -> vector<8x128xf32>
    %434 = arith.addf %432, %433 : vector<8x128xf32>
    %435 = arith.negf %434 : vector<8x128xf32>
    %436 = math.exp %435 : vector<8x128xf32>
    %cst_133 = arith.constant 1.000000e+00 : f32
    %437 = vector.broadcast %cst_133 : f32 to vector<8x128xf32>
    %438 = arith.addf %437, %436 : vector<8x128xf32>
    %439 = arith.divf %437, %438 : vector<8x128xf32>
    %440 = math.tanh %434 : vector<8x128xf32>
    %441 = vector.extract_strided_slice %439 {offsets = [0, 0], sizes = [8, 32], strides = [1, 1]} : vector<8x128xf32> to vector<8x32xf32>
    %442 = vector.extract_strided_slice %439 {offsets = [0, 32], sizes = [8, 32], strides = [1, 1]} : vector<8x128xf32> to vector<8x32xf32>
    %443 = vector.extract_strided_slice %440 {offsets = [0, 64], sizes = [8, 32], strides = [1, 1]} : vector<8x128xf32> to vector<8x32xf32>
    %444 = vector.extract_strided_slice %439 {offsets = [0, 96], sizes = [8, 32], strides = [1, 1]} : vector<8x128xf32> to vector<8x32xf32>
    %445 = arith.mulf %442, %423 : vector<8x32xf32>
    %446 = arith.mulf %441, %443 : vector<8x32xf32>
    %447 = arith.addf %445, %446 : vector<8x32xf32>
    %448 = math.tanh %447 : vector<8x32xf32>
    %449 = arith.mulf %444, %448 : vector<8x32xf32>
    %450 = arith.index_cast %c1_i32_129 : i32 to index
    %c0_134 = arith.constant 0 : index
    %c0_135 = arith.constant 0 : index
    %451 = vector.load %arg15[%450, %c0_134, %c0_135] : memref<16x8x32xf32, #tpu.memory_space<vmem>>, vector<1x8x32xf32>
    %452 = vector.shape_cast %451 : vector<1x8x32xf32> to vector<8x32xf32>
    %453 = vector.shape_cast %449 : vector<8x32xf32> to vector<1x8x32xf32>
    tpu.vector_store %arg15[%450, %c0_134, %c0_135], %453 {strides = array<i32>} : memref<16x8x32xf32, #tpu.memory_space<vmem>>, vector<1x8x32xf32>,
    %c2_i32_136 = arith.constant 2 : i32
    %454 = arith.index_cast %c2_i32_136 : i32 to index
    %c0_137 = arith.constant 0 : index
    %c0_138 = arith.constant 0 : index
    %455 = vector.load %arg13[%454, %c0_137, %c0_138] : memref<16x8x128xf32, #tpu.memory_space<vmem>>, vector<1x8x128xf32>
    %456 = vector.shape_cast %455 : vector<1x8x128xf32> to vector<8x128xf32>
    %cst_139 = arith.constant dense<0.000000e+00> : vector<8x128xf32>
    %457 = tpu.matmul %449, %404, %cst_139 {dimension_numbers = #tpu.dot_dimension_numbers<[1], [0], [0], [1], [0, 0, 1, 1], [], []>} : vector<8x32xf32>, vector<32x128xf32>, vector<8x128xf32> -> vector<8x128xf32>
    %458 = arith.addf %456, %457 : vector<8x128xf32>
    %459 = arith.negf %458 : vector<8x128xf32>
    %460 = math.exp %459 : vector<8x128xf32>
    %cst_140 = arith.constant 1.000000e+00 : f32
    %461 = vector.broadcast %cst_140 : f32 to vector<8x128xf32>
    %462 = arith.addf %461, %460 : vector<8x128xf32>
    %463 = arith.divf %461, %462 : vector<8x128xf32>
    %464 = math.tanh %458 : vector<8x128xf32>
    %465 = vector.extract_strided_slice %463 {offsets = [0, 0], sizes = [8, 32], strides = [1, 1]} : vector<8x128xf32> to vector<8x32xf32>
    %466 = vector.extract_strided_slice %463 {offsets = [0, 32], sizes = [8, 32], strides = [1, 1]} : vector<8x128xf32> to vector<8x32xf32>
    %467 = vector.extract_strided_slice %464 {offsets = [0, 64], sizes = [8, 32], strides = [1, 1]} : vector<8x128xf32> to vector<8x32xf32>
    %468 = vector.extract_strided_slice %463 {offsets = [0, 96], sizes = [8, 32], strides = [1, 1]} : vector<8x128xf32> to vector<8x32xf32>
    %469 = arith.mulf %466, %447 : vector<8x32xf32>
    %470 = arith.mulf %465, %467 : vector<8x32xf32>
    %471 = arith.addf %469, %470 : vector<8x32xf32>
    %472 = math.tanh %471 : vector<8x32xf32>
    %473 = arith.mulf %468, %472 : vector<8x32xf32>
    %474 = arith.index_cast %c2_i32_136 : i32 to index
    %c0_141 = arith.constant 0 : index
    %c0_142 = arith.constant 0 : index
    %475 = vector.load %arg15[%474, %c0_141, %c0_142] : memref<16x8x32xf32, #tpu.memory_space<vmem>>, vector<1x8x32xf32>
    %476 = vector.shape_cast %475 : vector<1x8x32xf32> to vector<8x32xf32>
    %477 = vector.shape_cast %473 : vector<8x32xf32> to vector<1x8x32xf32>
    tpu.vector_store %arg15[%474, %c0_141, %c0_142], %477 {strides = array<i32>} : memref<16x8x32xf32, #tpu.memory_space<vmem>>, vector<1x8x32xf32>,
    %c3_i32_143 = arith.constant 3 : i32
    %478 = arith.index_cast %c3_i32_143 : i32 to index
    %c0_144 = arith.constant 0 : index
    %c0_145 = arith.constant 0 : index
    %479 = vector.load %arg13[%478, %c0_144, %c0_145] : memref<16x8x128xf32, #tpu.memory_space<vmem>>, vector<1x8x128xf32>
    %480 = vector.shape_cast %479 : vector<1x8x128xf32> to vector<8x128xf32>
    %cst_146 = arith.constant dense<0.000000e+00> : vector<8x128xf32>
    %481 = tpu.matmul %473, %404, %cst_146 {dimension_numbers = #tpu.dot_dimension_numbers<[1], [0], [0], [1], [0, 0, 1, 1], [], []>} : vector<8x32xf32>, vector<32x128xf32>, vector<8x128xf32> -> vector<8x128xf32>
    %482 = arith.addf %480, %481 : vector<8x128xf32>
    %483 = arith.negf %482 : vector<8x128xf32>
    %484 = math.exp %483 : vector<8x128xf32>
    %cst_147 = arith.constant 1.000000e+00 : f32
    %485 = vector.broadcast %cst_147 : f32 to vector<8x128xf32>
    %486 = arith.addf %485, %484 : vector<8x128xf32>
    %487 = arith.divf %485, %486 : vector<8x128xf32>
    %488 = math.tanh %482 : vector<8x128xf32>
    %489 = vector.extract_strided_slice %487 {offsets = [0, 0], sizes = [8, 32], strides = [1, 1]} : vector<8x128xf32> to vector<8x32xf32>
    %490 = vector.extract_strided_slice %487 {offsets = [0, 32], sizes = [8, 32], strides = [1, 1]} : vector<8x128xf32> to vector<8x32xf32>
    %491 = vector.extract_strided_slice %488 {offsets = [0, 64], sizes = [8, 32], strides = [1, 1]} : vector<8x128xf32> to vector<8x32xf32>
    %492 = vector.extract_strided_slice %487 {offsets = [0, 96], sizes = [8, 32], strides = [1, 1]} : vector<8x128xf32> to vector<8x32xf32>
    %493 = arith.mulf %490, %471 : vector<8x32xf32>
    %494 = arith.mulf %489, %491 : vector<8x32xf32>
    %495 = arith.addf %493, %494 : vector<8x32xf32>
    %496 = math.tanh %495 : vector<8x32xf32>
    %497 = arith.mulf %492, %496 : vector<8x32xf32>
    %498 = arith.index_cast %c3_i32_143 : i32 to index
    %c0_148 = arith.constant 0 : index
    %c0_149 = arith.constant 0 : index
    %499 = vector.load %arg15[%498, %c0_148, %c0_149] : memref<16x8x32xf32, #tpu.memory_space<vmem>>, vector<1x8x32xf32>
    %500 = vector.shape_cast %499 : vector<1x8x32xf32> to vector<8x32xf32>
    %501 = vector.shape_cast %497 : vector<8x32xf32> to vector<1x8x32xf32>
    tpu.vector_store %arg15[%498, %c0_148, %c0_149], %501 {strides = array<i32>} : memref<16x8x32xf32, #tpu.memory_space<vmem>>, vector<1x8x32xf32>,
    %c4_i32_150 = arith.constant 4 : i32
    %502 = arith.index_cast %c4_i32_150 : i32 to index
    %c0_151 = arith.constant 0 : index
    %c0_152 = arith.constant 0 : index
    %503 = vector.load %arg13[%502, %c0_151, %c0_152] : memref<16x8x128xf32, #tpu.memory_space<vmem>>, vector<1x8x128xf32>
    %504 = vector.shape_cast %503 : vector<1x8x128xf32> to vector<8x128xf32>
    %cst_153 = arith.constant dense<0.000000e+00> : vector<8x128xf32>
    %505 = tpu.matmul %497, %404, %cst_153 {dimension_numbers = #tpu.dot_dimension_numbers<[1], [0], [0], [1], [0, 0, 1, 1], [], []>} : vector<8x32xf32>, vector<32x128xf32>, vector<8x128xf32> -> vector<8x128xf32>
    %506 = arith.addf %504, %505 : vector<8x128xf32>
    %507 = arith.negf %506 : vector<8x128xf32>
    %508 = math.exp %507 : vector<8x128xf32>
    %cst_154 = arith.constant 1.000000e+00 : f32
    %509 = vector.broadcast %cst_154 : f32 to vector<8x128xf32>
    %510 = arith.addf %509, %508 : vector<8x128xf32>
    %511 = arith.divf %509, %510 : vector<8x128xf32>
    %512 = math.tanh %506 : vector<8x128xf32>
    %513 = vector.extract_strided_slice %511 {offsets = [0, 0], sizes = [8, 32], strides = [1, 1]} : vector<8x128xf32> to vector<8x32xf32>
    %514 = vector.extract_strided_slice %511 {offsets = [0, 32], sizes = [8, 32], strides = [1, 1]} : vector<8x128xf32> to vector<8x32xf32>
    %515 = vector.extract_strided_slice %512 {offsets = [0, 64], sizes = [8, 32], strides = [1, 1]} : vector<8x128xf32> to vector<8x32xf32>
    %516 = vector.extract_strided_slice %511 {offsets = [0, 96], sizes = [8, 32], strides = [1, 1]} : vector<8x128xf32> to vector<8x32xf32>
    %517 = arith.mulf %514, %495 : vector<8x32xf32>
    %518 = arith.mulf %513, %515 : vector<8x32xf32>
    %519 = arith.addf %517, %518 : vector<8x32xf32>
    %520 = math.tanh %519 : vector<8x32xf32>
    %521 = arith.mulf %516, %520 : vector<8x32xf32>
    %522 = arith.index_cast %c4_i32_150 : i32 to index
    %c0_155 = arith.constant 0 : index
    %c0_156 = arith.constant 0 : index
    %523 = vector.load %arg15[%522, %c0_155, %c0_156] : memref<16x8x32xf32, #tpu.memory_space<vmem>>, vector<1x8x32xf32>
    %524 = vector.shape_cast %523 : vector<1x8x32xf32> to vector<8x32xf32>
    %525 = vector.shape_cast %521 : vector<8x32xf32> to vector<1x8x32xf32>
    tpu.vector_store %arg15[%522, %c0_155, %c0_156], %525 {strides = array<i32>} : memref<16x8x32xf32, #tpu.memory_space<vmem>>, vector<1x8x32xf32>,
    %c5_i32_157 = arith.constant 5 : i32
    %526 = arith.index_cast %c5_i32_157 : i32 to index
    %c0_158 = arith.constant 0 : index
    %c0_159 = arith.constant 0 : index
    %527 = vector.load %arg13[%526, %c0_158, %c0_159] : memref<16x8x128xf32, #tpu.memory_space<vmem>>, vector<1x8x128xf32>
    %528 = vector.shape_cast %527 : vector<1x8x128xf32> to vector<8x128xf32>
    %cst_160 = arith.constant dense<0.000000e+00> : vector<8x128xf32>
    %529 = tpu.matmul %521, %404, %cst_160 {dimension_numbers = #tpu.dot_dimension_numbers<[1], [0], [0], [1], [0, 0, 1, 1], [], []>} : vector<8x32xf32>, vector<32x128xf32>, vector<8x128xf32> -> vector<8x128xf32>
    %530 = arith.addf %528, %529 : vector<8x128xf32>
    %531 = arith.negf %530 : vector<8x128xf32>
    %532 = math.exp %531 : vector<8x128xf32>
    %cst_161 = arith.constant 1.000000e+00 : f32
    %533 = vector.broadcast %cst_161 : f32 to vector<8x128xf32>
    %534 = arith.addf %533, %532 : vector<8x128xf32>
    %535 = arith.divf %533, %534 : vector<8x128xf32>
    %536 = math.tanh %530 : vector<8x128xf32>
    %537 = vector.extract_strided_slice %535 {offsets = [0, 0], sizes = [8, 32], strides = [1, 1]} : vector<8x128xf32> to vector<8x32xf32>
    %538 = vector.extract_strided_slice %535 {offsets = [0, 32], sizes = [8, 32], strides = [1, 1]} : vector<8x128xf32> to vector<8x32xf32>
    %539 = vector.extract_strided_slice %536 {offsets = [0, 64], sizes = [8, 32], strides = [1, 1]} : vector<8x128xf32> to vector<8x32xf32>
    %540 = vector.extract_strided_slice %535 {offsets = [0, 96], sizes = [8, 32], strides = [1, 1]} : vector<8x128xf32> to vector<8x32xf32>
    %541 = arith.mulf %538, %519 : vector<8x32xf32>
    %542 = arith.mulf %537, %539 : vector<8x32xf32>
    %543 = arith.addf %541, %542 : vector<8x32xf32>
    %544 = math.tanh %543 : vector<8x32xf32>
    %545 = arith.mulf %540, %544 : vector<8x32xf32>
    %546 = arith.index_cast %c5_i32_157 : i32 to index
    %c0_162 = arith.constant 0 : index
    %c0_163 = arith.constant 0 : index
    %547 = vector.load %arg15[%546, %c0_162, %c0_163] : memref<16x8x32xf32, #tpu.memory_space<vmem>>, vector<1x8x32xf32>
    %548 = vector.shape_cast %547 : vector<1x8x32xf32> to vector<8x32xf32>
    %549 = vector.shape_cast %545 : vector<8x32xf32> to vector<1x8x32xf32>
    tpu.vector_store %arg15[%546, %c0_162, %c0_163], %549 {strides = array<i32>} : memref<16x8x32xf32, #tpu.memory_space<vmem>>, vector<1x8x32xf32>,
    %c6_i32_164 = arith.constant 6 : i32
    %550 = arith.index_cast %c6_i32_164 : i32 to index
    %c0_165 = arith.constant 0 : index
    %c0_166 = arith.constant 0 : index
    %551 = vector.load %arg13[%550, %c0_165, %c0_166] : memref<16x8x128xf32, #tpu.memory_space<vmem>>, vector<1x8x128xf32>
    %552 = vector.shape_cast %551 : vector<1x8x128xf32> to vector<8x128xf32>
    %cst_167 = arith.constant dense<0.000000e+00> : vector<8x128xf32>
    %553 = tpu.matmul %545, %404, %cst_167 {dimension_numbers = #tpu.dot_dimension_numbers<[1], [0], [0], [1], [0, 0, 1, 1], [], []>} : vector<8x32xf32>, vector<32x128xf32>, vector<8x128xf32> -> vector<8x128xf32>
    %554 = arith.addf %552, %553 : vector<8x128xf32>
    %555 = arith.negf %554 : vector<8x128xf32>
    %556 = math.exp %555 : vector<8x128xf32>
    %cst_168 = arith.constant 1.000000e+00 : f32
    %557 = vector.broadcast %cst_168 : f32 to vector<8x128xf32>
    %558 = arith.addf %557, %556 : vector<8x128xf32>
    %559 = arith.divf %557, %558 : vector<8x128xf32>
    %560 = math.tanh %554 : vector<8x128xf32>
    %561 = vector.extract_strided_slice %559 {offsets = [0, 0], sizes = [8, 32], strides = [1, 1]} : vector<8x128xf32> to vector<8x32xf32>
    %562 = vector.extract_strided_slice %559 {offsets = [0, 32], sizes = [8, 32], strides = [1, 1]} : vector<8x128xf32> to vector<8x32xf32>
    %563 = vector.extract_strided_slice %560 {offsets = [0, 64], sizes = [8, 32], strides = [1, 1]} : vector<8x128xf32> to vector<8x32xf32>
    %564 = vector.extract_strided_slice %559 {offsets = [0, 96], sizes = [8, 32], strides = [1, 1]} : vector<8x128xf32> to vector<8x32xf32>
    %565 = arith.mulf %562, %543 : vector<8x32xf32>
    %566 = arith.mulf %561, %563 : vector<8x32xf32>
    %567 = arith.addf %565, %566 : vector<8x32xf32>
    %568 = math.tanh %567 : vector<8x32xf32>
    %569 = arith.mulf %564, %568 : vector<8x32xf32>
    %570 = arith.index_cast %c6_i32_164 : i32 to index
    %c0_169 = arith.constant 0 : index
    %c0_170 = arith.constant 0 : index
    %571 = vector.load %arg15[%570, %c0_169, %c0_170] : memref<16x8x32xf32, #tpu.memory_space<vmem>>, vector<1x8x32xf32>
    %572 = vector.shape_cast %571 : vector<1x8x32xf32> to vector<8x32xf32>
    %573 = vector.shape_cast %569 : vector<8x32xf32> to vector<1x8x32xf32>
    tpu.vector_store %arg15[%570, %c0_169, %c0_170], %573 {strides = array<i32>} : memref<16x8x32xf32, #tpu.memory_space<vmem>>, vector<1x8x32xf32>,
    %c7_i32_171 = arith.constant 7 : i32
    %574 = arith.index_cast %c7_i32_171 : i32 to index
    %c0_172 = arith.constant 0 : index
    %c0_173 = arith.constant 0 : index
    %575 = vector.load %arg13[%574, %c0_172, %c0_173] : memref<16x8x128xf32, #tpu.memory_space<vmem>>, vector<1x8x128xf32>
    %576 = vector.shape_cast %575 : vector<1x8x128xf32> to vector<8x128xf32>
    %cst_174 = arith.constant dense<0.000000e+00> : vector<8x128xf32>
    %577 = tpu.matmul %569, %404, %cst_174 {dimension_numbers = #tpu.dot_dimension_numbers<[1], [0], [0], [1], [0, 0, 1, 1], [], []>} : vector<8x32xf32>, vector<32x128xf32>, vector<8x128xf32> -> vector<8x128xf32>
    %578 = arith.addf %576, %577 : vector<8x128xf32>
    %579 = arith.negf %578 : vector<8x128xf32>
    %580 = math.exp %579 : vector<8x128xf32>
    %cst_175 = arith.constant 1.000000e+00 : f32
    %581 = vector.broadcast %cst_175 : f32 to vector<8x128xf32>
    %582 = arith.addf %581, %580 : vector<8x128xf32>
    %583 = arith.divf %581, %582 : vector<8x128xf32>
    %584 = math.tanh %578 : vector<8x128xf32>
    %585 = vector.extract_strided_slice %583 {offsets = [0, 0], sizes = [8, 32], strides = [1, 1]} : vector<8x128xf32> to vector<8x32xf32>
    %586 = vector.extract_strided_slice %583 {offsets = [0, 32], sizes = [8, 32], strides = [1, 1]} : vector<8x128xf32> to vector<8x32xf32>
    %587 = vector.extract_strided_slice %584 {offsets = [0, 64], sizes = [8, 32], strides = [1, 1]} : vector<8x128xf32> to vector<8x32xf32>
    %588 = vector.extract_strided_slice %583 {offsets = [0, 96], sizes = [8, 32], strides = [1, 1]} : vector<8x128xf32> to vector<8x32xf32>
    %589 = arith.mulf %586, %567 : vector<8x32xf32>
    %590 = arith.mulf %585, %587 : vector<8x32xf32>
    %591 = arith.addf %589, %590 : vector<8x32xf32>
    %592 = math.tanh %591 : vector<8x32xf32>
    %593 = arith.mulf %588, %592 : vector<8x32xf32>
    %594 = arith.index_cast %c7_i32_171 : i32 to index
    %c0_176 = arith.constant 0 : index
    %c0_177 = arith.constant 0 : index
    %595 = vector.load %arg15[%594, %c0_176, %c0_177] : memref<16x8x32xf32, #tpu.memory_space<vmem>>, vector<1x8x32xf32>
    %596 = vector.shape_cast %595 : vector<1x8x32xf32> to vector<8x32xf32>
    %597 = vector.shape_cast %593 : vector<8x32xf32> to vector<1x8x32xf32>
    tpu.vector_store %arg15[%594, %c0_176, %c0_177], %597 {strides = array<i32>} : memref<16x8x32xf32, #tpu.memory_space<vmem>>, vector<1x8x32xf32>,
    %c8_i32_178 = arith.constant 8 : i32
    %598 = arith.index_cast %c8_i32_178 : i32 to index
    %c0_179 = arith.constant 0 : index
    %c0_180 = arith.constant 0 : index
    %599 = vector.load %arg13[%598, %c0_179, %c0_180] : memref<16x8x128xf32, #tpu.memory_space<vmem>>, vector<1x8x128xf32>
    %600 = vector.shape_cast %599 : vector<1x8x128xf32> to vector<8x128xf32>
    %cst_181 = arith.constant dense<0.000000e+00> : vector<8x128xf32>
    %601 = tpu.matmul %593, %404, %cst_181 {dimension_numbers = #tpu.dot_dimension_numbers<[1], [0], [0], [1], [0, 0, 1, 1], [], []>} : vector<8x32xf32>, vector<32x128xf32>, vector<8x128xf32> -> vector<8x128xf32>
    %602 = arith.addf %600, %601 : vector<8x128xf32>
    %603 = arith.negf %602 : vector<8x128xf32>
    %604 = math.exp %603 : vector<8x128xf32>
    %cst_182 = arith.constant 1.000000e+00 : f32
    %605 = vector.broadcast %cst_182 : f32 to vector<8x128xf32>
    %606 = arith.addf %605, %604 : vector<8x128xf32>
    %607 = arith.divf %605, %606 : vector<8x128xf32>
    %608 = math.tanh %602 : vector<8x128xf32>
    %609 = vector.extract_strided_slice %607 {offsets = [0, 0], sizes = [8, 32], strides = [1, 1]} : vector<8x128xf32> to vector<8x32xf32>
    %610 = vector.extract_strided_slice %607 {offsets = [0, 32], sizes = [8, 32], strides = [1, 1]} : vector<8x128xf32> to vector<8x32xf32>
    %611 = vector.extract_strided_slice %608 {offsets = [0, 64], sizes = [8, 32], strides = [1, 1]} : vector<8x128xf32> to vector<8x32xf32>
    %612 = vector.extract_strided_slice %607 {offsets = [0, 96], sizes = [8, 32], strides = [1, 1]} : vector<8x128xf32> to vector<8x32xf32>
    %613 = arith.mulf %610, %591 : vector<8x32xf32>
    %614 = arith.mulf %609, %611 : vector<8x32xf32>
    %615 = arith.addf %613, %614 : vector<8x32xf32>
    %616 = math.tanh %615 : vector<8x32xf32>
    %617 = arith.mulf %612, %616 : vector<8x32xf32>
    %618 = arith.index_cast %c8_i32_178 : i32 to index
    %c0_183 = arith.constant 0 : index
    %c0_184 = arith.constant 0 : index
    %619 = vector.load %arg15[%618, %c0_183, %c0_184] : memref<16x8x32xf32, #tpu.memory_space<vmem>>, vector<1x8x32xf32>
    %620 = vector.shape_cast %619 : vector<1x8x32xf32> to vector<8x32xf32>
    %621 = vector.shape_cast %617 : vector<8x32xf32> to vector<1x8x32xf32>
    tpu.vector_store %arg15[%618, %c0_183, %c0_184], %621 {strides = array<i32>} : memref<16x8x32xf32, #tpu.memory_space<vmem>>, vector<1x8x32xf32>,
    %c9_i32_185 = arith.constant 9 : i32
    %622 = arith.index_cast %c9_i32_185 : i32 to index
    %c0_186 = arith.constant 0 : index
    %c0_187 = arith.constant 0 : index
    %623 = vector.load %arg13[%622, %c0_186, %c0_187] : memref<16x8x128xf32, #tpu.memory_space<vmem>>, vector<1x8x128xf32>
    %624 = vector.shape_cast %623 : vector<1x8x128xf32> to vector<8x128xf32>
    %cst_188 = arith.constant dense<0.000000e+00> : vector<8x128xf32>
    %625 = tpu.matmul %617, %404, %cst_188 {dimension_numbers = #tpu.dot_dimension_numbers<[1], [0], [0], [1], [0, 0, 1, 1], [], []>} : vector<8x32xf32>, vector<32x128xf32>, vector<8x128xf32> -> vector<8x128xf32>
    %626 = arith.addf %624, %625 : vector<8x128xf32>
    %627 = arith.negf %626 : vector<8x128xf32>
    %628 = math.exp %627 : vector<8x128xf32>
    %cst_189 = arith.constant 1.000000e+00 : f32
    %629 = vector.broadcast %cst_189 : f32 to vector<8x128xf32>
    %630 = arith.addf %629, %628 : vector<8x128xf32>
    %631 = arith.divf %629, %630 : vector<8x128xf32>
    %632 = math.tanh %626 : vector<8x128xf32>
    %633 = vector.extract_strided_slice %631 {offsets = [0, 0], sizes = [8, 32], strides = [1, 1]} : vector<8x128xf32> to vector<8x32xf32>
    %634 = vector.extract_strided_slice %631 {offsets = [0, 32], sizes = [8, 32], strides = [1, 1]} : vector<8x128xf32> to vector<8x32xf32>
    %635 = vector.extract_strided_slice %632 {offsets = [0, 64], sizes = [8, 32], strides = [1, 1]} : vector<8x128xf32> to vector<8x32xf32>
    %636 = vector.extract_strided_slice %631 {offsets = [0, 96], sizes = [8, 32], strides = [1, 1]} : vector<8x128xf32> to vector<8x32xf32>
    %637 = arith.mulf %634, %615 : vector<8x32xf32>
    %638 = arith.mulf %633, %635 : vector<8x32xf32>
    %639 = arith.addf %637, %638 : vector<8x32xf32>
    %640 = math.tanh %639 : vector<8x32xf32>
    %641 = arith.mulf %636, %640 : vector<8x32xf32>
    %642 = arith.index_cast %c9_i32_185 : i32 to index
    %c0_190 = arith.constant 0 : index
    %c0_191 = arith.constant 0 : index
    %643 = vector.load %arg15[%642, %c0_190, %c0_191] : memref<16x8x32xf32, #tpu.memory_space<vmem>>, vector<1x8x32xf32>
    %644 = vector.shape_cast %643 : vector<1x8x32xf32> to vector<8x32xf32>
    %645 = vector.shape_cast %641 : vector<8x32xf32> to vector<1x8x32xf32>
    tpu.vector_store %arg15[%642, %c0_190, %c0_191], %645 {strides = array<i32>} : memref<16x8x32xf32, #tpu.memory_space<vmem>>, vector<1x8x32xf32>,
    %c10_i32_192 = arith.constant 10 : i32
    %646 = arith.index_cast %c10_i32_192 : i32 to index
    %c0_193 = arith.constant 0 : index
    %c0_194 = arith.constant 0 : index
    %647 = vector.load %arg13[%646, %c0_193, %c0_194] : memref<16x8x128xf32, #tpu.memory_space<vmem>>, vector<1x8x128xf32>
    %648 = vector.shape_cast %647 : vector<1x8x128xf32> to vector<8x128xf32>
    %cst_195 = arith.constant dense<0.000000e+00> : vector<8x128xf32>
    %649 = tpu.matmul %641, %404, %cst_195 {dimension_numbers = #tpu.dot_dimension_numbers<[1], [0], [0], [1], [0, 0, 1, 1], [], []>} : vector<8x32xf32>, vector<32x128xf32>, vector<8x128xf32> -> vector<8x128xf32>
    %650 = arith.addf %648, %649 : vector<8x128xf32>
    %651 = arith.negf %650 : vector<8x128xf32>
    %652 = math.exp %651 : vector<8x128xf32>
    %cst_196 = arith.constant 1.000000e+00 : f32
    %653 = vector.broadcast %cst_196 : f32 to vector<8x128xf32>
    %654 = arith.addf %653, %652 : vector<8x128xf32>
    %655 = arith.divf %653, %654 : vector<8x128xf32>
    %656 = math.tanh %650 : vector<8x128xf32>
    %657 = vector.extract_strided_slice %655 {offsets = [0, 0], sizes = [8, 32], strides = [1, 1]} : vector<8x128xf32> to vector<8x32xf32>
    %658 = vector.extract_strided_slice %655 {offsets = [0, 32], sizes = [8, 32], strides = [1, 1]} : vector<8x128xf32> to vector<8x32xf32>
    %659 = vector.extract_strided_slice %656 {offsets = [0, 64], sizes = [8, 32], strides = [1, 1]} : vector<8x128xf32> to vector<8x32xf32>
    %660 = vector.extract_strided_slice %655 {offsets = [0, 96], sizes = [8, 32], strides = [1, 1]} : vector<8x128xf32> to vector<8x32xf32>
    %661 = arith.mulf %658, %639 : vector<8x32xf32>
    %662 = arith.mulf %657, %659 : vector<8x32xf32>
    %663 = arith.addf %661, %662 : vector<8x32xf32>
    %664 = math.tanh %663 : vector<8x32xf32>
    %665 = arith.mulf %660, %664 : vector<8x32xf32>
    %666 = arith.index_cast %c10_i32_192 : i32 to index
    %c0_197 = arith.constant 0 : index
    %c0_198 = arith.constant 0 : index
    %667 = vector.load %arg15[%666, %c0_197, %c0_198] : memref<16x8x32xf32, #tpu.memory_space<vmem>>, vector<1x8x32xf32>
    %668 = vector.shape_cast %667 : vector<1x8x32xf32> to vector<8x32xf32>
    %669 = vector.shape_cast %665 : vector<8x32xf32> to vector<1x8x32xf32>
    tpu.vector_store %arg15[%666, %c0_197, %c0_198], %669 {strides = array<i32>} : memref<16x8x32xf32, #tpu.memory_space<vmem>>, vector<1x8x32xf32>,
    %c11_i32_199 = arith.constant 11 : i32
    %670 = arith.index_cast %c11_i32_199 : i32 to index
    %c0_200 = arith.constant 0 : index
    %c0_201 = arith.constant 0 : index
    %671 = vector.load %arg13[%670, %c0_200, %c0_201] : memref<16x8x128xf32, #tpu.memory_space<vmem>>, vector<1x8x128xf32>
    %672 = vector.shape_cast %671 : vector<1x8x128xf32> to vector<8x128xf32>
    %cst_202 = arith.constant dense<0.000000e+00> : vector<8x128xf32>
    %673 = tpu.matmul %665, %404, %cst_202 {dimension_numbers = #tpu.dot_dimension_numbers<[1], [0], [0], [1], [0, 0, 1, 1], [], []>} : vector<8x32xf32>, vector<32x128xf32>, vector<8x128xf32> -> vector<8x128xf32>
    %674 = arith.addf %672, %673 : vector<8x128xf32>
    %675 = arith.negf %674 : vector<8x128xf32>
    %676 = math.exp %675 : vector<8x128xf32>
    %cst_203 = arith.constant 1.000000e+00 : f32
    %677 = vector.broadcast %cst_203 : f32 to vector<8x128xf32>
    %678 = arith.addf %677, %676 : vector<8x128xf32>
    %679 = arith.divf %677, %678 : vector<8x128xf32>
    %680 = math.tanh %674 : vector<8x128xf32>
    %681 = vector.extract_strided_slice %679 {offsets = [0, 0], sizes = [8, 32], strides = [1, 1]} : vector<8x128xf32> to vector<8x32xf32>
    %682 = vector.extract_strided_slice %679 {offsets = [0, 32], sizes = [8, 32], strides = [1, 1]} : vector<8x128xf32> to vector<8x32xf32>
    %683 = vector.extract_strided_slice %680 {offsets = [0, 64], sizes = [8, 32], strides = [1, 1]} : vector<8x128xf32> to vector<8x32xf32>
    %684 = vector.extract_strided_slice %679 {offsets = [0, 96], sizes = [8, 32], strides = [1, 1]} : vector<8x128xf32> to vector<8x32xf32>
    %685 = arith.mulf %682, %663 : vector<8x32xf32>
    %686 = arith.mulf %681, %683 : vector<8x32xf32>
    %687 = arith.addf %685, %686 : vector<8x32xf32>
    %688 = math.tanh %687 : vector<8x32xf32>
    %689 = arith.mulf %684, %688 : vector<8x32xf32>
    %690 = arith.index_cast %c11_i32_199 : i32 to index
    %c0_204 = arith.constant 0 : index
    %c0_205 = arith.constant 0 : index
    %691 = vector.load %arg15[%690, %c0_204, %c0_205] : memref<16x8x32xf32, #tpu.memory_space<vmem>>, vector<1x8x32xf32>
    %692 = vector.shape_cast %691 : vector<1x8x32xf32> to vector<8x32xf32>
    %693 = vector.shape_cast %689 : vector<8x32xf32> to vector<1x8x32xf32>
    tpu.vector_store %arg15[%690, %c0_204, %c0_205], %693 {strides = array<i32>} : memref<16x8x32xf32, #tpu.memory_space<vmem>>, vector<1x8x32xf32>,
    %c12_i32_206 = arith.constant 12 : i32
    %694 = arith.index_cast %c12_i32_206 : i32 to index
    %c0_207 = arith.constant 0 : index
    %c0_208 = arith.constant 0 : index
    %695 = vector.load %arg13[%694, %c0_207, %c0_208] : memref<16x8x128xf32, #tpu.memory_space<vmem>>, vector<1x8x128xf32>
    %696 = vector.shape_cast %695 : vector<1x8x128xf32> to vector<8x128xf32>
    %cst_209 = arith.constant dense<0.000000e+00> : vector<8x128xf32>
    %697 = tpu.matmul %689, %404, %cst_209 {dimension_numbers = #tpu.dot_dimension_numbers<[1], [0], [0], [1], [0, 0, 1, 1], [], []>} : vector<8x32xf32>, vector<32x128xf32>, vector<8x128xf32> -> vector<8x128xf32>
    %698 = arith.addf %696, %697 : vector<8x128xf32>
    %699 = arith.negf %698 : vector<8x128xf32>
    %700 = math.exp %699 : vector<8x128xf32>
    %cst_210 = arith.constant 1.000000e+00 : f32
    %701 = vector.broadcast %cst_210 : f32 to vector<8x128xf32>
    %702 = arith.addf %701, %700 : vector<8x128xf32>
    %703 = arith.divf %701, %702 : vector<8x128xf32>
    %704 = math.tanh %698 : vector<8x128xf32>
    %705 = vector.extract_strided_slice %703 {offsets = [0, 0], sizes = [8, 32], strides = [1, 1]} : vector<8x128xf32> to vector<8x32xf32>
    %706 = vector.extract_strided_slice %703 {offsets = [0, 32], sizes = [8, 32], strides = [1, 1]} : vector<8x128xf32> to vector<8x32xf32>
    %707 = vector.extract_strided_slice %704 {offsets = [0, 64], sizes = [8, 32], strides = [1, 1]} : vector<8x128xf32> to vector<8x32xf32>
    %708 = vector.extract_strided_slice %703 {offsets = [0, 96], sizes = [8, 32], strides = [1, 1]} : vector<8x128xf32> to vector<8x32xf32>
    %709 = arith.mulf %706, %687 : vector<8x32xf32>
    %710 = arith.mulf %705, %707 : vector<8x32xf32>
    %711 = arith.addf %709, %710 : vector<8x32xf32>
    %712 = math.tanh %711 : vector<8x32xf32>
    %713 = arith.mulf %708, %712 : vector<8x32xf32>
    %714 = arith.index_cast %c12_i32_206 : i32 to index
    %c0_211 = arith.constant 0 : index
    %c0_212 = arith.constant 0 : index
    %715 = vector.load %arg15[%714, %c0_211, %c0_212] : memref<16x8x32xf32, #tpu.memory_space<vmem>>, vector<1x8x32xf32>
    %716 = vector.shape_cast %715 : vector<1x8x32xf32> to vector<8x32xf32>
    %717 = vector.shape_cast %713 : vector<8x32xf32> to vector<1x8x32xf32>
    tpu.vector_store %arg15[%714, %c0_211, %c0_212], %717 {strides = array<i32>} : memref<16x8x32xf32, #tpu.memory_space<vmem>>, vector<1x8x32xf32>,
    %c13_i32_213 = arith.constant 13 : i32
    %718 = arith.index_cast %c13_i32_213 : i32 to index
    %c0_214 = arith.constant 0 : index
    %c0_215 = arith.constant 0 : index
    %719 = vector.load %arg13[%718, %c0_214, %c0_215] : memref<16x8x128xf32, #tpu.memory_space<vmem>>, vector<1x8x128xf32>
    %720 = vector.shape_cast %719 : vector<1x8x128xf32> to vector<8x128xf32>
    %cst_216 = arith.constant dense<0.000000e+00> : vector<8x128xf32>
    %721 = tpu.matmul %713, %404, %cst_216 {dimension_numbers = #tpu.dot_dimension_numbers<[1], [0], [0], [1], [0, 0, 1, 1], [], []>} : vector<8x32xf32>, vector<32x128xf32>, vector<8x128xf32> -> vector<8x128xf32>
    %722 = arith.addf %720, %721 : vector<8x128xf32>
    %723 = arith.negf %722 : vector<8x128xf32>
    %724 = math.exp %723 : vector<8x128xf32>
    %cst_217 = arith.constant 1.000000e+00 : f32
    %725 = vector.broadcast %cst_217 : f32 to vector<8x128xf32>
    %726 = arith.addf %725, %724 : vector<8x128xf32>
    %727 = arith.divf %725, %726 : vector<8x128xf32>
    %728 = math.tanh %722 : vector<8x128xf32>
    %729 = vector.extract_strided_slice %727 {offsets = [0, 0], sizes = [8, 32], strides = [1, 1]} : vector<8x128xf32> to vector<8x32xf32>
    %730 = vector.extract_strided_slice %727 {offsets = [0, 32], sizes = [8, 32], strides = [1, 1]} : vector<8x128xf32> to vector<8x32xf32>
    %731 = vector.extract_strided_slice %728 {offsets = [0, 64], sizes = [8, 32], strides = [1, 1]} : vector<8x128xf32> to vector<8x32xf32>
    %732 = vector.extract_strided_slice %727 {offsets = [0, 96], sizes = [8, 32], strides = [1, 1]} : vector<8x128xf32> to vector<8x32xf32>
    %733 = arith.mulf %730, %711 : vector<8x32xf32>
    %734 = arith.mulf %729, %731 : vector<8x32xf32>
    %735 = arith.addf %733, %734 : vector<8x32xf32>
    %736 = math.tanh %735 : vector<8x32xf32>
    %737 = arith.mulf %732, %736 : vector<8x32xf32>
    %738 = arith.index_cast %c13_i32_213 : i32 to index
    %c0_218 = arith.constant 0 : index
    %c0_219 = arith.constant 0 : index
    %739 = vector.load %arg15[%738, %c0_218, %c0_219] : memref<16x8x32xf32, #tpu.memory_space<vmem>>, vector<1x8x32xf32>
    %740 = vector.shape_cast %739 : vector<1x8x32xf32> to vector<8x32xf32>
    %741 = vector.shape_cast %737 : vector<8x32xf32> to vector<1x8x32xf32>
    tpu.vector_store %arg15[%738, %c0_218, %c0_219], %741 {strides = array<i32>} : memref<16x8x32xf32, #tpu.memory_space<vmem>>, vector<1x8x32xf32>,
    %c14_i32_220 = arith.constant 14 : i32
    %742 = arith.index_cast %c14_i32_220 : i32 to index
    %c0_221 = arith.constant 0 : index
    %c0_222 = arith.constant 0 : index
    %743 = vector.load %arg13[%742, %c0_221, %c0_222] : memref<16x8x128xf32, #tpu.memory_space<vmem>>, vector<1x8x128xf32>
    %744 = vector.shape_cast %743 : vector<1x8x128xf32> to vector<8x128xf32>
    %cst_223 = arith.constant dense<0.000000e+00> : vector<8x128xf32>
    %745 = tpu.matmul %737, %404, %cst_223 {dimension_numbers = #tpu.dot_dimension_numbers<[1], [0], [0], [1], [0, 0, 1, 1], [], []>} : vector<8x32xf32>, vector<32x128xf32>, vector<8x128xf32> -> vector<8x128xf32>
    %746 = arith.addf %744, %745 : vector<8x128xf32>
    %747 = arith.negf %746 : vector<8x128xf32>
    %748 = math.exp %747 : vector<8x128xf32>
    %cst_224 = arith.constant 1.000000e+00 : f32
    %749 = vector.broadcast %cst_224 : f32 to vector<8x128xf32>
    %750 = arith.addf %749, %748 : vector<8x128xf32>
    %751 = arith.divf %749, %750 : vector<8x128xf32>
    %752 = math.tanh %746 : vector<8x128xf32>
    %753 = vector.extract_strided_slice %751 {offsets = [0, 0], sizes = [8, 32], strides = [1, 1]} : vector<8x128xf32> to vector<8x32xf32>
    %754 = vector.extract_strided_slice %751 {offsets = [0, 32], sizes = [8, 32], strides = [1, 1]} : vector<8x128xf32> to vector<8x32xf32>
    %755 = vector.extract_strided_slice %752 {offsets = [0, 64], sizes = [8, 32], strides = [1, 1]} : vector<8x128xf32> to vector<8x32xf32>
    %756 = vector.extract_strided_slice %751 {offsets = [0, 96], sizes = [8, 32], strides = [1, 1]} : vector<8x128xf32> to vector<8x32xf32>
    %757 = arith.mulf %754, %735 : vector<8x32xf32>
    %758 = arith.mulf %753, %755 : vector<8x32xf32>
    %759 = arith.addf %757, %758 : vector<8x32xf32>
    %760 = math.tanh %759 : vector<8x32xf32>
    %761 = arith.mulf %756, %760 : vector<8x32xf32>
    %762 = arith.index_cast %c14_i32_220 : i32 to index
    %c0_225 = arith.constant 0 : index
    %c0_226 = arith.constant 0 : index
    %763 = vector.load %arg15[%762, %c0_225, %c0_226] : memref<16x8x32xf32, #tpu.memory_space<vmem>>, vector<1x8x32xf32>
    %764 = vector.shape_cast %763 : vector<1x8x32xf32> to vector<8x32xf32>
    %765 = vector.shape_cast %761 : vector<8x32xf32> to vector<1x8x32xf32>
    tpu.vector_store %arg15[%762, %c0_225, %c0_226], %765 {strides = array<i32>} : memref<16x8x32xf32, #tpu.memory_space<vmem>>, vector<1x8x32xf32>,
    %c15_i32_227 = arith.constant 15 : i32
    %766 = arith.index_cast %c15_i32_227 : i32 to index
    %c0_228 = arith.constant 0 : index
    %c0_229 = arith.constant 0 : index
    %767 = vector.load %arg13[%766, %c0_228, %c0_229] : memref<16x8x128xf32, #tpu.memory_space<vmem>>, vector<1x8x128xf32>
    %768 = vector.shape_cast %767 : vector<1x8x128xf32> to vector<8x128xf32>
    %cst_230 = arith.constant dense<0.000000e+00> : vector<8x128xf32>
    %769 = tpu.matmul %761, %404, %cst_230 {dimension_numbers = #tpu.dot_dimension_numbers<[1], [0], [0], [1], [0, 0, 1, 1], [], []>} : vector<8x32xf32>, vector<32x128xf32>, vector<8x128xf32> -> vector<8x128xf32>
    %770 = arith.addf %768, %769 : vector<8x128xf32>
    %771 = arith.negf %770 : vector<8x128xf32>
    %772 = math.exp %771 : vector<8x128xf32>
    %cst_231 = arith.constant 1.000000e+00 : f32
    %773 = vector.broadcast %cst_231 : f32 to vector<8x128xf32>
    %774 = arith.addf %773, %772 : vector<8x128xf32>
    %775 = arith.divf %773, %774 : vector<8x128xf32>
    %776 = math.tanh %770 : vector<8x128xf32>
    %777 = vector.extract_strided_slice %775 {offsets = [0, 0], sizes = [8, 32], strides = [1, 1]} : vector<8x128xf32> to vector<8x32xf32>
    %778 = vector.extract_strided_slice %775 {offsets = [0, 32], sizes = [8, 32], strides = [1, 1]} : vector<8x128xf32> to vector<8x32xf32>
    %779 = vector.extract_strided_slice %776 {offsets = [0, 64], sizes = [8, 32], strides = [1, 1]} : vector<8x128xf32> to vector<8x32xf32>
    %780 = vector.extract_strided_slice %775 {offsets = [0, 96], sizes = [8, 32], strides = [1, 1]} : vector<8x128xf32> to vector<8x32xf32>
    %781 = arith.mulf %778, %759 : vector<8x32xf32>
    %782 = arith.mulf %777, %779 : vector<8x32xf32>
    %783 = arith.addf %781, %782 : vector<8x32xf32>
    %784 = math.tanh %783 : vector<8x32xf32>
    %785 = arith.mulf %780, %784 : vector<8x32xf32>
    %786 = arith.index_cast %c15_i32_227 : i32 to index
    %c0_232 = arith.constant 0 : index
    %c0_233 = arith.constant 0 : index
    %787 = vector.load %arg15[%786, %c0_232, %c0_233] : memref<16x8x32xf32, #tpu.memory_space<vmem>>, vector<1x8x32xf32>
    %788 = vector.shape_cast %787 : vector<1x8x32xf32> to vector<8x32xf32>
    %789 = vector.shape_cast %785 : vector<8x32xf32> to vector<1x8x32xf32>
    tpu.vector_store %arg15[%786, %c0_232, %c0_233], %789 {strides = array<i32>} : memref<16x8x32xf32, #tpu.memory_space<vmem>>, vector<1x8x32xf32>,
    %c16_i32_234 = arith.constant 16 : i32
    %c0_235 = arith.constant 0 : index
    %c0_236 = arith.constant 0 : index
    %c0_237 = arith.constant 0 : index
    %790 = vector.load %arg15[%c0_235, %c0_236, %c0_237] : memref<16x8x32xf32, #tpu.memory_space<vmem>>, vector<16x8x32xf32>
    %791 = vector.shape_cast %790 : vector<16x8x32xf32> to vector<128x32xf32>
    %c0_238 = arith.constant 0 : index
    %c0_239 = arith.constant 0 : index
    %792 = vector.load %arg7[%c0_238, %c0_239] : memref<32x128xf32, #tpu.memory_space<vmem>>, vector<32x128xf32>
    %cst_240 = arith.constant dense<0.000000e+00> : vector<128x128xf32>
    %793 = tpu.matmul %791, %792, %cst_240 {dimension_numbers = #tpu.dot_dimension_numbers<[1], [0], [0], [1], [0, 0, 1, 1], [], []>} : vector<128x32xf32>, vector<32x128xf32>, vector<128x128xf32> -> vector<128x128xf32>
    %c0_241 = arith.constant 0 : index
    %c0_242 = arith.constant 0 : index
    %794 = vector.load %arg9[%c0_241, %c0_242] : memref<1x128xf32, #tpu.memory_space<vmem>>, vector<1x128xf32>
    %795 = vector.broadcast %794 : vector<1x128xf32> to vector<128x128xf32>
    %796 = arith.addf %793, %795 : vector<128x128xf32>
    %797 = vector.shape_cast %796 : vector<128x128xf32> to vector<16x8x128xf32>
    %c0_243 = arith.constant 0 : index
    %c0_244 = arith.constant 0 : index
    %c0_245 = arith.constant 0 : index
    %798 = vector.load %arg13[%c0_243, %c0_244, %c0_245] : memref<16x8x128xf32, #tpu.memory_space<vmem>>, vector<16x8x128xf32>
    tpu.vector_store %arg13[%c0_243, %c0_244, %c0_245], %797 {strides = array<i32>} : memref<16x8x128xf32, #tpu.memory_space<vmem>>, vector<16x8x128xf32>,
    %c0_246 = arith.constant 0 : index
    %c0_247 = arith.constant 0 : index
    %799 = vector.load %arg8[%c0_246, %c0_247] : memref<32x128xf32, #tpu.memory_space<vmem>>, vector<32x128xf32>
    %cst_248 = arith.constant 0.000000e+00 : f32
    %800 = vector.broadcast %cst_248 : f32 to vector<8x32xf32>
    %c0_i32_249 = arith.constant 0 : i32
    %801 = arith.index_cast %c0_i32_249 : i32 to index
    %c0_250 = arith.constant 0 : index
    %c0_251 = arith.constant 0 : index
    %802 = vector.load %arg13[%801, %c0_250, %c0_251] : memref<16x8x128xf32, #tpu.memory_space<vmem>>, vector<1x8x128xf32>
    %803 = vector.shape_cast %802 : vector<1x8x128xf32> to vector<8x128xf32>
    %cst_252 = arith.constant dense<0.000000e+00> : vector<8x128xf32>
    %804 = tpu.matmul %800, %799, %cst_252 {dimension_numbers = #tpu.dot_dimension_numbers<[1], [0], [0], [1], [0, 0, 1, 1], [], []>} : vector<8x32xf32>, vector<32x128xf32>, vector<8x128xf32> -> vector<8x128xf32>
    %805 = arith.addf %803, %804 : vector<8x128xf32>
    %806 = arith.negf %805 : vector<8x128xf32>
    %807 = math.exp %806 : vector<8x128xf32>
    %cst_253 = arith.constant 1.000000e+00 : f32
    %808 = vector.broadcast %cst_253 : f32 to vector<8x128xf32>
    %809 = arith.addf %808, %807 : vector<8x128xf32>
    %810 = arith.divf %808, %809 : vector<8x128xf32>
    %811 = math.tanh %805 : vector<8x128xf32>
    %812 = vector.extract_strided_slice %810 {offsets = [0, 0], sizes = [8, 32], strides = [1, 1]} : vector<8x128xf32> to vector<8x32xf32>
    %813 = vector.extract_strided_slice %810 {offsets = [0, 32], sizes = [8, 32], strides = [1, 1]} : vector<8x128xf32> to vector<8x32xf32>
    %814 = vector.extract_strided_slice %811 {offsets = [0, 64], sizes = [8, 32], strides = [1, 1]} : vector<8x128xf32> to vector<8x32xf32>
    %815 = vector.extract_strided_slice %810 {offsets = [0, 96], sizes = [8, 32], strides = [1, 1]} : vector<8x128xf32> to vector<8x32xf32>
    %816 = arith.mulf %813, %800 : vector<8x32xf32>
    %817 = arith.mulf %812, %814 : vector<8x32xf32>
    %818 = arith.addf %816, %817 : vector<8x32xf32>
    %819 = math.tanh %818 : vector<8x32xf32>
    %820 = arith.mulf %815, %819 : vector<8x32xf32>
    %c1_i32_254 = arith.constant 1 : i32
    %821 = arith.index_cast %c1_i32_254 : i32 to index
    %c0_255 = arith.constant 0 : index
    %c0_256 = arith.constant 0 : index
    %822 = vector.load %arg13[%821, %c0_255, %c0_256] : memref<16x8x128xf32, #tpu.memory_space<vmem>>, vector<1x8x128xf32>
    %823 = vector.shape_cast %822 : vector<1x8x128xf32> to vector<8x128xf32>
    %cst_257 = arith.constant dense<0.000000e+00> : vector<8x128xf32>
    %824 = tpu.matmul %820, %799, %cst_257 {dimension_numbers = #tpu.dot_dimension_numbers<[1], [0], [0], [1], [0, 0, 1, 1], [], []>} : vector<8x32xf32>, vector<32x128xf32>, vector<8x128xf32> -> vector<8x128xf32>
    %825 = arith.addf %823, %824 : vector<8x128xf32>
    %826 = arith.negf %825 : vector<8x128xf32>
    %827 = math.exp %826 : vector<8x128xf32>
    %cst_258 = arith.constant 1.000000e+00 : f32
    %828 = vector.broadcast %cst_258 : f32 to vector<8x128xf32>
    %829 = arith.addf %828, %827 : vector<8x128xf32>
    %830 = arith.divf %828, %829 : vector<8x128xf32>
    %831 = math.tanh %825 : vector<8x128xf32>
    %832 = vector.extract_strided_slice %830 {offsets = [0, 0], sizes = [8, 32], strides = [1, 1]} : vector<8x128xf32> to vector<8x32xf32>
    %833 = vector.extract_strided_slice %830 {offsets = [0, 32], sizes = [8, 32], strides = [1, 1]} : vector<8x128xf32> to vector<8x32xf32>
    %834 = vector.extract_strided_slice %831 {offsets = [0, 64], sizes = [8, 32], strides = [1, 1]} : vector<8x128xf32> to vector<8x32xf32>
    %835 = vector.extract_strided_slice %830 {offsets = [0, 96], sizes = [8, 32], strides = [1, 1]} : vector<8x128xf32> to vector<8x32xf32>
    %836 = arith.mulf %833, %818 : vector<8x32xf32>
    %837 = arith.mulf %832, %834 : vector<8x32xf32>
    %838 = arith.addf %836, %837 : vector<8x32xf32>
    %839 = math.tanh %838 : vector<8x32xf32>
    %840 = arith.mulf %835, %839 : vector<8x32xf32>
    %c2_i32_259 = arith.constant 2 : i32
    %841 = arith.index_cast %c2_i32_259 : i32 to index
    %c0_260 = arith.constant 0 : index
    %c0_261 = arith.constant 0 : index
    %842 = vector.load %arg13[%841, %c0_260, %c0_261] : memref<16x8x128xf32, #tpu.memory_space<vmem>>, vector<1x8x128xf32>
    %843 = vector.shape_cast %842 : vector<1x8x128xf32> to vector<8x128xf32>
    %cst_262 = arith.constant dense<0.000000e+00> : vector<8x128xf32>
    %844 = tpu.matmul %840, %799, %cst_262 {dimension_numbers = #tpu.dot_dimension_numbers<[1], [0], [0], [1], [0, 0, 1, 1], [], []>} : vector<8x32xf32>, vector<32x128xf32>, vector<8x128xf32> -> vector<8x128xf32>
    %845 = arith.addf %843, %844 : vector<8x128xf32>
    %846 = arith.negf %845 : vector<8x128xf32>
    %847 = math.exp %846 : vector<8x128xf32>
    %cst_263 = arith.constant 1.000000e+00 : f32
    %848 = vector.broadcast %cst_263 : f32 to vector<8x128xf32>
    %849 = arith.addf %848, %847 : vector<8x128xf32>
    %850 = arith.divf %848, %849 : vector<8x128xf32>
    %851 = math.tanh %845 : vector<8x128xf32>
    %852 = vector.extract_strided_slice %850 {offsets = [0, 0], sizes = [8, 32], strides = [1, 1]} : vector<8x128xf32> to vector<8x32xf32>
    %853 = vector.extract_strided_slice %850 {offsets = [0, 32], sizes = [8, 32], strides = [1, 1]} : vector<8x128xf32> to vector<8x32xf32>
    %854 = vector.extract_strided_slice %851 {offsets = [0, 64], sizes = [8, 32], strides = [1, 1]} : vector<8x128xf32> to vector<8x32xf32>
    %855 = vector.extract_strided_slice %850 {offsets = [0, 96], sizes = [8, 32], strides = [1, 1]} : vector<8x128xf32> to vector<8x32xf32>
    %856 = arith.mulf %853, %838 : vector<8x32xf32>
    %857 = arith.mulf %852, %854 : vector<8x32xf32>
    %858 = arith.addf %856, %857 : vector<8x32xf32>
    %859 = math.tanh %858 : vector<8x32xf32>
    %860 = arith.mulf %855, %859 : vector<8x32xf32>
    %c3_i32_264 = arith.constant 3 : i32
    %861 = arith.index_cast %c3_i32_264 : i32 to index
    %c0_265 = arith.constant 0 : index
    %c0_266 = arith.constant 0 : index
    %862 = vector.load %arg13[%861, %c0_265, %c0_266] : memref<16x8x128xf32, #tpu.memory_space<vmem>>, vector<1x8x128xf32>
    %863 = vector.shape_cast %862 : vector<1x8x128xf32> to vector<8x128xf32>
    %cst_267 = arith.constant dense<0.000000e+00> : vector<8x128xf32>
    %864 = tpu.matmul %860, %799, %cst_267 {dimension_numbers = #tpu.dot_dimension_numbers<[1], [0], [0], [1], [0, 0, 1, 1], [], []>} : vector<8x32xf32>, vector<32x128xf32>, vector<8x128xf32> -> vector<8x128xf32>
    %865 = arith.addf %863, %864 : vector<8x128xf32>
    %866 = arith.negf %865 : vector<8x128xf32>
    %867 = math.exp %866 : vector<8x128xf32>
    %cst_268 = arith.constant 1.000000e+00 : f32
    %868 = vector.broadcast %cst_268 : f32 to vector<8x128xf32>
    %869 = arith.addf %868, %867 : vector<8x128xf32>
    %870 = arith.divf %868, %869 : vector<8x128xf32>
    %871 = math.tanh %865 : vector<8x128xf32>
    %872 = vector.extract_strided_slice %870 {offsets = [0, 0], sizes = [8, 32], strides = [1, 1]} : vector<8x128xf32> to vector<8x32xf32>
    %873 = vector.extract_strided_slice %870 {offsets = [0, 32], sizes = [8, 32], strides = [1, 1]} : vector<8x128xf32> to vector<8x32xf32>
    %874 = vector.extract_strided_slice %871 {offsets = [0, 64], sizes = [8, 32], strides = [1, 1]} : vector<8x128xf32> to vector<8x32xf32>
    %875 = vector.extract_strided_slice %870 {offsets = [0, 96], sizes = [8, 32], strides = [1, 1]} : vector<8x128xf32> to vector<8x32xf32>
    %876 = arith.mulf %873, %858 : vector<8x32xf32>
    %877 = arith.mulf %872, %874 : vector<8x32xf32>
    %878 = arith.addf %876, %877 : vector<8x32xf32>
    %879 = math.tanh %878 : vector<8x32xf32>
    %880 = arith.mulf %875, %879 : vector<8x32xf32>
    %c4_i32_269 = arith.constant 4 : i32
    %881 = arith.index_cast %c4_i32_269 : i32 to index
    %c0_270 = arith.constant 0 : index
    %c0_271 = arith.constant 0 : index
    %882 = vector.load %arg13[%881, %c0_270, %c0_271] : memref<16x8x128xf32, #tpu.memory_space<vmem>>, vector<1x8x128xf32>
    %883 = vector.shape_cast %882 : vector<1x8x128xf32> to vector<8x128xf32>
    %cst_272 = arith.constant dense<0.000000e+00> : vector<8x128xf32>
    %884 = tpu.matmul %880, %799, %cst_272 {dimension_numbers = #tpu.dot_dimension_numbers<[1], [0], [0], [1], [0, 0, 1, 1], [], []>} : vector<8x32xf32>, vector<32x128xf32>, vector<8x128xf32> -> vector<8x128xf32>
    %885 = arith.addf %883, %884 : vector<8x128xf32>
    %886 = arith.negf %885 : vector<8x128xf32>
    %887 = math.exp %886 : vector<8x128xf32>
    %cst_273 = arith.constant 1.000000e+00 : f32
    %888 = vector.broadcast %cst_273 : f32 to vector<8x128xf32>
    %889 = arith.addf %888, %887 : vector<8x128xf32>
    %890 = arith.divf %888, %889 : vector<8x128xf32>
    %891 = math.tanh %885 : vector<8x128xf32>
    %892 = vector.extract_strided_slice %890 {offsets = [0, 0], sizes = [8, 32], strides = [1, 1]} : vector<8x128xf32> to vector<8x32xf32>
    %893 = vector.extract_strided_slice %890 {offsets = [0, 32], sizes = [8, 32], strides = [1, 1]} : vector<8x128xf32> to vector<8x32xf32>
    %894 = vector.extract_strided_slice %891 {offsets = [0, 64], sizes = [8, 32], strides = [1, 1]} : vector<8x128xf32> to vector<8x32xf32>
    %895 = vector.extract_strided_slice %890 {offsets = [0, 96], sizes = [8, 32], strides = [1, 1]} : vector<8x128xf32> to vector<8x32xf32>
    %896 = arith.mulf %893, %878 : vector<8x32xf32>
    %897 = arith.mulf %892, %894 : vector<8x32xf32>
    %898 = arith.addf %896, %897 : vector<8x32xf32>
    %899 = math.tanh %898 : vector<8x32xf32>
    %900 = arith.mulf %895, %899 : vector<8x32xf32>
    %c5_i32_274 = arith.constant 5 : i32
    %901 = arith.index_cast %c5_i32_274 : i32 to index
    %c0_275 = arith.constant 0 : index
    %c0_276 = arith.constant 0 : index
    %902 = vector.load %arg13[%901, %c0_275, %c0_276] : memref<16x8x128xf32, #tpu.memory_space<vmem>>, vector<1x8x128xf32>
    %903 = vector.shape_cast %902 : vector<1x8x128xf32> to vector<8x128xf32>
    %cst_277 = arith.constant dense<0.000000e+00> : vector<8x128xf32>
    %904 = tpu.matmul %900, %799, %cst_277 {dimension_numbers = #tpu.dot_dimension_numbers<[1], [0], [0], [1], [0, 0, 1, 1], [], []>} : vector<8x32xf32>, vector<32x128xf32>, vector<8x128xf32> -> vector<8x128xf32>
    %905 = arith.addf %903, %904 : vector<8x128xf32>
    %906 = arith.negf %905 : vector<8x128xf32>
    %907 = math.exp %906 : vector<8x128xf32>
    %cst_278 = arith.constant 1.000000e+00 : f32
    %908 = vector.broadcast %cst_278 : f32 to vector<8x128xf32>
    %909 = arith.addf %908, %907 : vector<8x128xf32>
    %910 = arith.divf %908, %909 : vector<8x128xf32>
    %911 = math.tanh %905 : vector<8x128xf32>
    %912 = vector.extract_strided_slice %910 {offsets = [0, 0], sizes = [8, 32], strides = [1, 1]} : vector<8x128xf32> to vector<8x32xf32>
    %913 = vector.extract_strided_slice %910 {offsets = [0, 32], sizes = [8, 32], strides = [1, 1]} : vector<8x128xf32> to vector<8x32xf32>
    %914 = vector.extract_strided_slice %911 {offsets = [0, 64], sizes = [8, 32], strides = [1, 1]} : vector<8x128xf32> to vector<8x32xf32>
    %915 = vector.extract_strided_slice %910 {offsets = [0, 96], sizes = [8, 32], strides = [1, 1]} : vector<8x128xf32> to vector<8x32xf32>
    %916 = arith.mulf %913, %898 : vector<8x32xf32>
    %917 = arith.mulf %912, %914 : vector<8x32xf32>
    %918 = arith.addf %916, %917 : vector<8x32xf32>
    %919 = math.tanh %918 : vector<8x32xf32>
    %920 = arith.mulf %915, %919 : vector<8x32xf32>
    %c6_i32_279 = arith.constant 6 : i32
    %921 = arith.index_cast %c6_i32_279 : i32 to index
    %c0_280 = arith.constant 0 : index
    %c0_281 = arith.constant 0 : index
    %922 = vector.load %arg13[%921, %c0_280, %c0_281] : memref<16x8x128xf32, #tpu.memory_space<vmem>>, vector<1x8x128xf32>
    %923 = vector.shape_cast %922 : vector<1x8x128xf32> to vector<8x128xf32>
    %cst_282 = arith.constant dense<0.000000e+00> : vector<8x128xf32>
    %924 = tpu.matmul %920, %799, %cst_282 {dimension_numbers = #tpu.dot_dimension_numbers<[1], [0], [0], [1], [0, 0, 1, 1], [], []>} : vector<8x32xf32>, vector<32x128xf32>, vector<8x128xf32> -> vector<8x128xf32>
    %925 = arith.addf %923, %924 : vector<8x128xf32>
    %926 = arith.negf %925 : vector<8x128xf32>
    %927 = math.exp %926 : vector<8x128xf32>
    %cst_283 = arith.constant 1.000000e+00 : f32
    %928 = vector.broadcast %cst_283 : f32 to vector<8x128xf32>
    %929 = arith.addf %928, %927 : vector<8x128xf32>
    %930 = arith.divf %928, %929 : vector<8x128xf32>
    %931 = math.tanh %925 : vector<8x128xf32>
    %932 = vector.extract_strided_slice %930 {offsets = [0, 0], sizes = [8, 32], strides = [1, 1]} : vector<8x128xf32> to vector<8x32xf32>
    %933 = vector.extract_strided_slice %930 {offsets = [0, 32], sizes = [8, 32], strides = [1, 1]} : vector<8x128xf32> to vector<8x32xf32>
    %934 = vector.extract_strided_slice %931 {offsets = [0, 64], sizes = [8, 32], strides = [1, 1]} : vector<8x128xf32> to vector<8x32xf32>
    %935 = vector.extract_strided_slice %930 {offsets = [0, 96], sizes = [8, 32], strides = [1, 1]} : vector<8x128xf32> to vector<8x32xf32>
    %936 = arith.mulf %933, %918 : vector<8x32xf32>
    %937 = arith.mulf %932, %934 : vector<8x32xf32>
    %938 = arith.addf %936, %937 : vector<8x32xf32>
    %939 = math.tanh %938 : vector<8x32xf32>
    %940 = arith.mulf %935, %939 : vector<8x32xf32>
    %c7_i32_284 = arith.constant 7 : i32
    %941 = arith.index_cast %c7_i32_284 : i32 to index
    %c0_285 = arith.constant 0 : index
    %c0_286 = arith.constant 0 : index
    %942 = vector.load %arg13[%941, %c0_285, %c0_286] : memref<16x8x128xf32, #tpu.memory_space<vmem>>, vector<1x8x128xf32>
    %943 = vector.shape_cast %942 : vector<1x8x128xf32> to vector<8x128xf32>
    %cst_287 = arith.constant dense<0.000000e+00> : vector<8x128xf32>
    %944 = tpu.matmul %940, %799, %cst_287 {dimension_numbers = #tpu.dot_dimension_numbers<[1], [0], [0], [1], [0, 0, 1, 1], [], []>} : vector<8x32xf32>, vector<32x128xf32>, vector<8x128xf32> -> vector<8x128xf32>
    %945 = arith.addf %943, %944 : vector<8x128xf32>
    %946 = arith.negf %945 : vector<8x128xf32>
    %947 = math.exp %946 : vector<8x128xf32>
    %cst_288 = arith.constant 1.000000e+00 : f32
    %948 = vector.broadcast %cst_288 : f32 to vector<8x128xf32>
    %949 = arith.addf %948, %947 : vector<8x128xf32>
    %950 = arith.divf %948, %949 : vector<8x128xf32>
    %951 = math.tanh %945 : vector<8x128xf32>
    %952 = vector.extract_strided_slice %950 {offsets = [0, 0], sizes = [8, 32], strides = [1, 1]} : vector<8x128xf32> to vector<8x32xf32>
    %953 = vector.extract_strided_slice %950 {offsets = [0, 32], sizes = [8, 32], strides = [1, 1]} : vector<8x128xf32> to vector<8x32xf32>
    %954 = vector.extract_strided_slice %951 {offsets = [0, 64], sizes = [8, 32], strides = [1, 1]} : vector<8x128xf32> to vector<8x32xf32>
    %955 = vector.extract_strided_slice %950 {offsets = [0, 96], sizes = [8, 32], strides = [1, 1]} : vector<8x128xf32> to vector<8x32xf32>
    %956 = arith.mulf %953, %938 : vector<8x32xf32>
    %957 = arith.mulf %952, %954 : vector<8x32xf32>
    %958 = arith.addf %956, %957 : vector<8x32xf32>
    %959 = math.tanh %958 : vector<8x32xf32>
    %960 = arith.mulf %955, %959 : vector<8x32xf32>
    %c8_i32_289 = arith.constant 8 : i32
    %961 = arith.index_cast %c8_i32_289 : i32 to index
    %c0_290 = arith.constant 0 : index
    %c0_291 = arith.constant 0 : index
    %962 = vector.load %arg13[%961, %c0_290, %c0_291] : memref<16x8x128xf32, #tpu.memory_space<vmem>>, vector<1x8x128xf32>
    %963 = vector.shape_cast %962 : vector<1x8x128xf32> to vector<8x128xf32>
    %cst_292 = arith.constant dense<0.000000e+00> : vector<8x128xf32>
    %964 = tpu.matmul %960, %799, %cst_292 {dimension_numbers = #tpu.dot_dimension_numbers<[1], [0], [0], [1], [0, 0, 1, 1], [], []>} : vector<8x32xf32>, vector<32x128xf32>, vector<8x128xf32> -> vector<8x128xf32>
    %965 = arith.addf %963, %964 : vector<8x128xf32>
    %966 = arith.negf %965 : vector<8x128xf32>
    %967 = math.exp %966 : vector<8x128xf32>
    %cst_293 = arith.constant 1.000000e+00 : f32
    %968 = vector.broadcast %cst_293 : f32 to vector<8x128xf32>
    %969 = arith.addf %968, %967 : vector<8x128xf32>
    %970 = arith.divf %968, %969 : vector<8x128xf32>
    %971 = math.tanh %965 : vector<8x128xf32>
    %972 = vector.extract_strided_slice %970 {offsets = [0, 0], sizes = [8, 32], strides = [1, 1]} : vector<8x128xf32> to vector<8x32xf32>
    %973 = vector.extract_strided_slice %970 {offsets = [0, 32], sizes = [8, 32], strides = [1, 1]} : vector<8x128xf32> to vector<8x32xf32>
    %974 = vector.extract_strided_slice %971 {offsets = [0, 64], sizes = [8, 32], strides = [1, 1]} : vector<8x128xf32> to vector<8x32xf32>
    %975 = vector.extract_strided_slice %970 {offsets = [0, 96], sizes = [8, 32], strides = [1, 1]} : vector<8x128xf32> to vector<8x32xf32>
    %976 = arith.mulf %973, %958 : vector<8x32xf32>
    %977 = arith.mulf %972, %974 : vector<8x32xf32>
    %978 = arith.addf %976, %977 : vector<8x32xf32>
    %979 = math.tanh %978 : vector<8x32xf32>
    %980 = arith.mulf %975, %979 : vector<8x32xf32>
    %c9_i32_294 = arith.constant 9 : i32
    %981 = arith.index_cast %c9_i32_294 : i32 to index
    %c0_295 = arith.constant 0 : index
    %c0_296 = arith.constant 0 : index
    %982 = vector.load %arg13[%981, %c0_295, %c0_296] : memref<16x8x128xf32, #tpu.memory_space<vmem>>, vector<1x8x128xf32>
    %983 = vector.shape_cast %982 : vector<1x8x128xf32> to vector<8x128xf32>
    %cst_297 = arith.constant dense<0.000000e+00> : vector<8x128xf32>
    %984 = tpu.matmul %980, %799, %cst_297 {dimension_numbers = #tpu.dot_dimension_numbers<[1], [0], [0], [1], [0, 0, 1, 1], [], []>} : vector<8x32xf32>, vector<32x128xf32>, vector<8x128xf32> -> vector<8x128xf32>
    %985 = arith.addf %983, %984 : vector<8x128xf32>
    %986 = arith.negf %985 : vector<8x128xf32>
    %987 = math.exp %986 : vector<8x128xf32>
    %cst_298 = arith.constant 1.000000e+00 : f32
    %988 = vector.broadcast %cst_298 : f32 to vector<8x128xf32>
    %989 = arith.addf %988, %987 : vector<8x128xf32>
    %990 = arith.divf %988, %989 : vector<8x128xf32>
    %991 = math.tanh %985 : vector<8x128xf32>
    %992 = vector.extract_strided_slice %990 {offsets = [0, 0], sizes = [8, 32], strides = [1, 1]} : vector<8x128xf32> to vector<8x32xf32>
    %993 = vector.extract_strided_slice %990 {offsets = [0, 32], sizes = [8, 32], strides = [1, 1]} : vector<8x128xf32> to vector<8x32xf32>
    %994 = vector.extract_strided_slice %991 {offsets = [0, 64], sizes = [8, 32], strides = [1, 1]} : vector<8x128xf32> to vector<8x32xf32>
    %995 = vector.extract_strided_slice %990 {offsets = [0, 96], sizes = [8, 32], strides = [1, 1]} : vector<8x128xf32> to vector<8x32xf32>
    %996 = arith.mulf %993, %978 : vector<8x32xf32>
    %997 = arith.mulf %992, %994 : vector<8x32xf32>
    %998 = arith.addf %996, %997 : vector<8x32xf32>
    %999 = math.tanh %998 : vector<8x32xf32>
    %1000 = arith.mulf %995, %999 : vector<8x32xf32>
    %c10_i32_299 = arith.constant 10 : i32
    %1001 = arith.index_cast %c10_i32_299 : i32 to index
    %c0_300 = arith.constant 0 : index
    %c0_301 = arith.constant 0 : index
    %1002 = vector.load %arg13[%1001, %c0_300, %c0_301] : memref<16x8x128xf32, #tpu.memory_space<vmem>>, vector<1x8x128xf32>
    %1003 = vector.shape_cast %1002 : vector<1x8x128xf32> to vector<8x128xf32>
    %cst_302 = arith.constant dense<0.000000e+00> : vector<8x128xf32>
    %1004 = tpu.matmul %1000, %799, %cst_302 {dimension_numbers = #tpu.dot_dimension_numbers<[1], [0], [0], [1], [0, 0, 1, 1], [], []>} : vector<8x32xf32>, vector<32x128xf32>, vector<8x128xf32> -> vector<8x128xf32>
    %1005 = arith.addf %1003, %1004 : vector<8x128xf32>
    %1006 = arith.negf %1005 : vector<8x128xf32>
    %1007 = math.exp %1006 : vector<8x128xf32>
    %cst_303 = arith.constant 1.000000e+00 : f32
    %1008 = vector.broadcast %cst_303 : f32 to vector<8x128xf32>
    %1009 = arith.addf %1008, %1007 : vector<8x128xf32>
    %1010 = arith.divf %1008, %1009 : vector<8x128xf32>
    %1011 = math.tanh %1005 : vector<8x128xf32>
    %1012 = vector.extract_strided_slice %1010 {offsets = [0, 0], sizes = [8, 32], strides = [1, 1]} : vector<8x128xf32> to vector<8x32xf32>
    %1013 = vector.extract_strided_slice %1010 {offsets = [0, 32], sizes = [8, 32], strides = [1, 1]} : vector<8x128xf32> to vector<8x32xf32>
    %1014 = vector.extract_strided_slice %1011 {offsets = [0, 64], sizes = [8, 32], strides = [1, 1]} : vector<8x128xf32> to vector<8x32xf32>
    %1015 = vector.extract_strided_slice %1010 {offsets = [0, 96], sizes = [8, 32], strides = [1, 1]} : vector<8x128xf32> to vector<8x32xf32>
    %1016 = arith.mulf %1013, %998 : vector<8x32xf32>
    %1017 = arith.mulf %1012, %1014 : vector<8x32xf32>
    %1018 = arith.addf %1016, %1017 : vector<8x32xf32>
    %1019 = math.tanh %1018 : vector<8x32xf32>
    %1020 = arith.mulf %1015, %1019 : vector<8x32xf32>
    %c11_i32_304 = arith.constant 11 : i32
    %1021 = arith.index_cast %c11_i32_304 : i32 to index
    %c0_305 = arith.constant 0 : index
    %c0_306 = arith.constant 0 : index
    %1022 = vector.load %arg13[%1021, %c0_305, %c0_306] : memref<16x8x128xf32, #tpu.memory_space<vmem>>, vector<1x8x128xf32>
    %1023 = vector.shape_cast %1022 : vector<1x8x128xf32> to vector<8x128xf32>
    %cst_307 = arith.constant dense<0.000000e+00> : vector<8x128xf32>
    %1024 = tpu.matmul %1020, %799, %cst_307 {dimension_numbers = #tpu.dot_dimension_numbers<[1], [0], [0], [1], [0, 0, 1, 1], [], []>} : vector<8x32xf32>, vector<32x128xf32>, vector<8x128xf32> -> vector<8x128xf32>
    %1025 = arith.addf %1023, %1024 : vector<8x128xf32>
    %1026 = arith.negf %1025 : vector<8x128xf32>
    %1027 = math.exp %1026 : vector<8x128xf32>
    %cst_308 = arith.constant 1.000000e+00 : f32
    %1028 = vector.broadcast %cst_308 : f32 to vector<8x128xf32>
    %1029 = arith.addf %1028, %1027 : vector<8x128xf32>
    %1030 = arith.divf %1028, %1029 : vector<8x128xf32>
    %1031 = math.tanh %1025 : vector<8x128xf32>
    %1032 = vector.extract_strided_slice %1030 {offsets = [0, 0], sizes = [8, 32], strides = [1, 1]} : vector<8x128xf32> to vector<8x32xf32>
    %1033 = vector.extract_strided_slice %1030 {offsets = [0, 32], sizes = [8, 32], strides = [1, 1]} : vector<8x128xf32> to vector<8x32xf32>
    %1034 = vector.extract_strided_slice %1031 {offsets = [0, 64], sizes = [8, 32], strides = [1, 1]} : vector<8x128xf32> to vector<8x32xf32>
    %1035 = vector.extract_strided_slice %1030 {offsets = [0, 96], sizes = [8, 32], strides = [1, 1]} : vector<8x128xf32> to vector<8x32xf32>
    %1036 = arith.mulf %1033, %1018 : vector<8x32xf32>
    %1037 = arith.mulf %1032, %1034 : vector<8x32xf32>
    %1038 = arith.addf %1036, %1037 : vector<8x32xf32>
    %1039 = math.tanh %1038 : vector<8x32xf32>
    %1040 = arith.mulf %1035, %1039 : vector<8x32xf32>
    %c12_i32_309 = arith.constant 12 : i32
    %1041 = arith.index_cast %c12_i32_309 : i32 to index
    %c0_310 = arith.constant 0 : index
    %c0_311 = arith.constant 0 : index
    %1042 = vector.load %arg13[%1041, %c0_310, %c0_311] : memref<16x8x128xf32, #tpu.memory_space<vmem>>, vector<1x8x128xf32>
    %1043 = vector.shape_cast %1042 : vector<1x8x128xf32> to vector<8x128xf32>
    %cst_312 = arith.constant dense<0.000000e+00> : vector<8x128xf32>
    %1044 = tpu.matmul %1040, %799, %cst_312 {dimension_numbers = #tpu.dot_dimension_numbers<[1], [0], [0], [1], [0, 0, 1, 1], [], []>} : vector<8x32xf32>, vector<32x128xf32>, vector<8x128xf32> -> vector<8x128xf32>
    %1045 = arith.addf %1043, %1044 : vector<8x128xf32>
    %1046 = arith.negf %1045 : vector<8x128xf32>
    %1047 = math.exp %1046 : vector<8x128xf32>
    %cst_313 = arith.constant 1.000000e+00 : f32
    %1048 = vector.broadcast %cst_313 : f32 to vector<8x128xf32>
    %1049 = arith.addf %1048, %1047 : vector<8x128xf32>
    %1050 = arith.divf %1048, %1049 : vector<8x128xf32>
    %1051 = math.tanh %1045 : vector<8x128xf32>
    %1052 = vector.extract_strided_slice %1050 {offsets = [0, 0], sizes = [8, 32], strides = [1, 1]} : vector<8x128xf32> to vector<8x32xf32>
    %1053 = vector.extract_strided_slice %1050 {offsets = [0, 32], sizes = [8, 32], strides = [1, 1]} : vector<8x128xf32> to vector<8x32xf32>
    %1054 = vector.extract_strided_slice %1051 {offsets = [0, 64], sizes = [8, 32], strides = [1, 1]} : vector<8x128xf32> to vector<8x32xf32>
    %1055 = vector.extract_strided_slice %1050 {offsets = [0, 96], sizes = [8, 32], strides = [1, 1]} : vector<8x128xf32> to vector<8x32xf32>
    %1056 = arith.mulf %1053, %1038 : vector<8x32xf32>
    %1057 = arith.mulf %1052, %1054 : vector<8x32xf32>
    %1058 = arith.addf %1056, %1057 : vector<8x32xf32>
    %1059 = math.tanh %1058 : vector<8x32xf32>
    %1060 = arith.mulf %1055, %1059 : vector<8x32xf32>
    %c13_i32_314 = arith.constant 13 : i32
    %1061 = arith.index_cast %c13_i32_314 : i32 to index
    %c0_315 = arith.constant 0 : index
    %c0_316 = arith.constant 0 : index
    %1062 = vector.load %arg13[%1061, %c0_315, %c0_316] : memref<16x8x128xf32, #tpu.memory_space<vmem>>, vector<1x8x128xf32>
    %1063 = vector.shape_cast %1062 : vector<1x8x128xf32> to vector<8x128xf32>
    %cst_317 = arith.constant dense<0.000000e+00> : vector<8x128xf32>
    %1064 = tpu.matmul %1060, %799, %cst_317 {dimension_numbers = #tpu.dot_dimension_numbers<[1], [0], [0], [1], [0, 0, 1, 1], [], []>} : vector<8x32xf32>, vector<32x128xf32>, vector<8x128xf32> -> vector<8x128xf32>
    %1065 = arith.addf %1063, %1064 : vector<8x128xf32>
    %1066 = arith.negf %1065 : vector<8x128xf32>
    %1067 = math.exp %1066 : vector<8x128xf32>
    %cst_318 = arith.constant 1.000000e+00 : f32
    %1068 = vector.broadcast %cst_318 : f32 to vector<8x128xf32>
    %1069 = arith.addf %1068, %1067 : vector<8x128xf32>
    %1070 = arith.divf %1068, %1069 : vector<8x128xf32>
    %1071 = math.tanh %1065 : vector<8x128xf32>
    %1072 = vector.extract_strided_slice %1070 {offsets = [0, 0], sizes = [8, 32], strides = [1, 1]} : vector<8x128xf32> to vector<8x32xf32>
    %1073 = vector.extract_strided_slice %1070 {offsets = [0, 32], sizes = [8, 32], strides = [1, 1]} : vector<8x128xf32> to vector<8x32xf32>
    %1074 = vector.extract_strided_slice %1071 {offsets = [0, 64], sizes = [8, 32], strides = [1, 1]} : vector<8x128xf32> to vector<8x32xf32>
    %1075 = vector.extract_strided_slice %1070 {offsets = [0, 96], sizes = [8, 32], strides = [1, 1]} : vector<8x128xf32> to vector<8x32xf32>
    %1076 = arith.mulf %1073, %1058 : vector<8x32xf32>
    %1077 = arith.mulf %1072, %1074 : vector<8x32xf32>
    %1078 = arith.addf %1076, %1077 : vector<8x32xf32>
    %1079 = math.tanh %1078 : vector<8x32xf32>
    %1080 = arith.mulf %1075, %1079 : vector<8x32xf32>
    %c14_i32_319 = arith.constant 14 : i32
    %1081 = arith.index_cast %c14_i32_319 : i32 to index
    %c0_320 = arith.constant 0 : index
    %c0_321 = arith.constant 0 : index
    %1082 = vector.load %arg13[%1081, %c0_320, %c0_321] : memref<16x8x128xf32, #tpu.memory_space<vmem>>, vector<1x8x128xf32>
    %1083 = vector.shape_cast %1082 : vector<1x8x128xf32> to vector<8x128xf32>
    %cst_322 = arith.constant dense<0.000000e+00> : vector<8x128xf32>
    %1084 = tpu.matmul %1080, %799, %cst_322 {dimension_numbers = #tpu.dot_dimension_numbers<[1], [0], [0], [1], [0, 0, 1, 1], [], []>} : vector<8x32xf32>, vector<32x128xf32>, vector<8x128xf32> -> vector<8x128xf32>
    %1085 = arith.addf %1083, %1084 : vector<8x128xf32>
    %1086 = arith.negf %1085 : vector<8x128xf32>
    %1087 = math.exp %1086 : vector<8x128xf32>
    %cst_323 = arith.constant 1.000000e+00 : f32
    %1088 = vector.broadcast %cst_323 : f32 to vector<8x128xf32>
    %1089 = arith.addf %1088, %1087 : vector<8x128xf32>
    %1090 = arith.divf %1088, %1089 : vector<8x128xf32>
    %1091 = math.tanh %1085 : vector<8x128xf32>
    %1092 = vector.extract_strided_slice %1090 {offsets = [0, 0], sizes = [8, 32], strides = [1, 1]} : vector<8x128xf32> to vector<8x32xf32>
    %1093 = vector.extract_strided_slice %1090 {offsets = [0, 32], sizes = [8, 32], strides = [1, 1]} : vector<8x128xf32> to vector<8x32xf32>
    %1094 = vector.extract_strided_slice %1091 {offsets = [0, 64], sizes = [8, 32], strides = [1, 1]} : vector<8x128xf32> to vector<8x32xf32>
    %1095 = vector.extract_strided_slice %1090 {offsets = [0, 96], sizes = [8, 32], strides = [1, 1]} : vector<8x128xf32> to vector<8x32xf32>
    %1096 = arith.mulf %1093, %1078 : vector<8x32xf32>
    %1097 = arith.mulf %1092, %1094 : vector<8x32xf32>
    %1098 = arith.addf %1096, %1097 : vector<8x32xf32>
    %1099 = math.tanh %1098 : vector<8x32xf32>
    %1100 = arith.mulf %1095, %1099 : vector<8x32xf32>
    %c15_i32_324 = arith.constant 15 : i32
    %1101 = arith.index_cast %c15_i32_324 : i32 to index
    %c0_325 = arith.constant 0 : index
    %c0_326 = arith.constant 0 : index
    %1102 = vector.load %arg13[%1101, %c0_325, %c0_326] : memref<16x8x128xf32, #tpu.memory_space<vmem>>, vector<1x8x128xf32>
    %1103 = vector.shape_cast %1102 : vector<1x8x128xf32> to vector<8x128xf32>
    %cst_327 = arith.constant dense<0.000000e+00> : vector<8x128xf32>
    %1104 = tpu.matmul %1100, %799, %cst_327 {dimension_numbers = #tpu.dot_dimension_numbers<[1], [0], [0], [1], [0, 0, 1, 1], [], []>} : vector<8x32xf32>, vector<32x128xf32>, vector<8x128xf32> -> vector<8x128xf32>
    %1105 = arith.addf %1103, %1104 : vector<8x128xf32>
    %1106 = arith.negf %1105 : vector<8x128xf32>
    %1107 = math.exp %1106 : vector<8x128xf32>
    %cst_328 = arith.constant 1.000000e+00 : f32
    %1108 = vector.broadcast %cst_328 : f32 to vector<8x128xf32>
    %1109 = arith.addf %1108, %1107 : vector<8x128xf32>
    %1110 = arith.divf %1108, %1109 : vector<8x128xf32>
    %1111 = math.tanh %1105 : vector<8x128xf32>
    %1112 = vector.extract_strided_slice %1110 {offsets = [0, 0], sizes = [8, 32], strides = [1, 1]} : vector<8x128xf32> to vector<8x32xf32>
    %1113 = vector.extract_strided_slice %1110 {offsets = [0, 32], sizes = [8, 32], strides = [1, 1]} : vector<8x128xf32> to vector<8x32xf32>
    %1114 = vector.extract_strided_slice %1111 {offsets = [0, 64], sizes = [8, 32], strides = [1, 1]} : vector<8x128xf32> to vector<8x32xf32>
    %1115 = vector.extract_strided_slice %1110 {offsets = [0, 96], sizes = [8, 32], strides = [1, 1]} : vector<8x128xf32> to vector<8x32xf32>
    %1116 = arith.mulf %1113, %1098 : vector<8x32xf32>
    %1117 = arith.mulf %1112, %1114 : vector<8x32xf32>
    %1118 = arith.addf %1116, %1117 : vector<8x32xf32>
    %1119 = math.tanh %1118 : vector<8x32xf32>
    %1120 = arith.mulf %1115, %1119 : vector<8x32xf32>
    %c16_i32_329 = arith.constant 16 : i32
    %c0_330 = arith.constant 0 : index
    %c0_331 = arith.constant 0 : index
    %1121 = vector.load %arg10[%c0_330, %c0_331] : memref<32x4xf32, #tpu.memory_space<vmem>>, vector<32x4xf32>
    %cst_332 = arith.constant dense<0.000000e+00> : vector<8x4xf32>
    %1122 = tpu.matmul %1120, %1121, %cst_332 {dimension_numbers = #tpu.dot_dimension_numbers<[1], [0], [0], [1], [0, 0, 1, 1], [], []>} : vector<8x32xf32>, vector<32x4xf32>, vector<8x4xf32> -> vector<8x4xf32>
    %c0_333 = arith.constant 0 : index
    %c0_334 = arith.constant 0 : index
    %1123 = vector.load %arg11[%c0_333, %c0_334] : memref<1x4xf32, #tpu.memory_space<vmem>>, vector<1x4xf32>
    %1124 = vector.broadcast %1123 : vector<1x4xf32> to vector<8x4xf32>
    %1125 = arith.addf %1122, %1124 : vector<8x4xf32>
    %c0_335 = arith.constant 0 : index
    %c0_336 = arith.constant 0 : index
    %1126 = vector.load %arg12[%c0_335, %c0_336] : memref<8x4xf32, #tpu.memory_space<vmem>>, vector<8x4xf32>
    tpu.vector_store %arg12[%c0_335, %c0_336], %1125 {strides = array<i32>} : memref<8x4xf32, #tpu.memory_space<vmem>>, vector<8x4xf32>,
    return
  }
}

</mosaic_0001>

<bundles_post_ra>
// kernel: sequence_model_forward.1
= control target key start
LH: loop header
LB: loop body
LE: loop exit
PB: predicated region body
PF: predicated region fallthrough
CT: control target
= control target key end

     0   :  { %vm114_vm0 = vcmask 1045504   ;;  %vm65_vm1 = vcmask 48128   ;;  %v7586_v0 = vmov 0.0|0.0   ;;  %vm7587_vm2 = vmmov 0   ;;  %s7589_s17 = smov 64   ;;  %s7590_s18 = smov 32   ;;  %s8639_s2 = inlined_call_operand.vmem [shape: f32[32,128], index: 2, kind: input, shape index: {}]   ;;  %s8640_s1 = inlined_call_operand.vmem [shape: f32[6,128], index: 1, kind: input, shape index: {}]   ;;  %s8641_s0 = inlined_call_operand.vmem [shape: f32[16,8,6], index: 0, kind: input, shape index: {}]   ;;  %s8642_s3 = inlined_call_operand.vmem [shape: f32[1,128], index: 3, kind: input, shape index: {}]   ;;  %s8643_s4 = inlined_call_operand.vmem [shape: f32[32,128], index: 4, kind: input, shape index: {}]   ;;  %s8644_s5 = inlined_call_operand.vmem [shape: f32[32,128], index: 5, kind: input, shape index: {}]   ;;  %s8645_s6 = inlined_call_operand.vmem [shape: f32[1,128], index: 6, kind: input, shape index: {}]   ;;  %s8646_s7 = inlined_call_operand.vmem [shape: f32[32,128], index: 7, kind: input, shape index: {}]   ;;  %s8647_s8 = inlined_call_operand.vmem [shape: f32[32,128], index: 8, kind: input, shape index: {}]   ;;  %s8648_s9 = inlined_call_operand.vmem [shape: f32[1,128], index: 9, kind: input, shape index: {}]   ;;  %s8649_s10 = inlined_call_operand.vmem [shape: f32[32,4], index: 10, kind: input, shape index: {}]   ;;  %s8650_s11 = inlined_call_operand.vmem [shape: f32[1,4], index: 11, kind: input, shape index: {}]   ;;  %s8651_s12 = inlined_call_operand.vmem [shape: f32[8,4], index: 12, kind: output, shape index: {}]  }
   0x1   :  { %6885 = vmatprep.subr.bf16.mxu1 %v7586_v0  ;;  %v279_v1 = vld [vmem:[%s8639_s2] sm:$0xff]  ;;  %v280_v2 = vld [vmem:[%s8639_s2 + $0x8] sm:$0xff]  ;;  %v281_v7 = vld [vmem:[%s8639_s2 + $0x10] sm:$0xff]  ;;  %v7588_v8 = vmov 0.0   ;;  %vm284_vm3 = vcmask 261120   ;;  %vm5801_vm4 = vcmask 31744  }
   0x2   :  { %v57_v3 = vld [vmem:[%s8640_s1] sm:$0x3f]  ;;  %v7666_v4 = vpack.c.bf16 %v280_v2, %v279_v1  ;;  %v42_v6 = vld [vmem:[%s8641_s0 + $0x8] sm:$0xff]  ;;  %6290 = vmatprep.mubr.msk.f32.mxu1 %vm7587_vm2, %v7588_v8  ;;  %v282_v9 = vld [vmem:[%s8639_s2 + $0x18] sm:$0xff] }
   0x3   :  { %6256 = vmatprep.subr.msk.mxu0 %vm114_vm0, %v57_v3  ;;  %v41_v5 = vld [vmem:[%s8641_s0] sm:$0xff]  ;;  %v7687_v10 = vpack.c.bf16 %v282_v9, %v281_v7  ;;  %v43_v46 = vld [vmem:[%s8641_s0 + $0x10] sm:$0xff]  ;;  %v44_v47 = vld [vmem:[%s8641_s0 + $0x18] sm:$0xff] }
   0x4   :  { %6257 = vmatpush3.msk.msra.mxu0 %vm114_vm0, %v57_v3  ;;  %6258 = vmatprep.mubr.msk.f32.mxu0 %vm65_vm1, %v41_v5  ;;  %v7707_v12 = vld [vmem:[%s8642_s3] ss:$0 sm:$0xff] }
   0x5   :  { %6887 = vmatpush3.bf16.msra.mxu1 %v7666_v4  ;;  %6259 = vmatmul.mubr.msk.f32.vlgmr.msra.gmra.mrb[0].mxu0 %vm65_vm1, %v42_v6 }
   0x6   :  { %6888 = vmatprep.subr.bf16.mxu1 %v7586_v0  ;;  %6909 = vmatprep.subr.bf16.mxu0 %v7586_v0 }
   0x7   :  { %6911 = vmatpush3.bf16.msra.mxu0 %v7666_v4  ;;  %6261 = vmatprep.mubr.msk.f32.mxu0 %vm65_vm1, %v43_v46 }
   0x8   :  { %6912 = vmatprep.subr.bf16.mxu0 %v7586_v0 }
   0x9   :  { %6890 = vmatpush3.bf16.msra.mxu1 %v7687_v10  ;;  %6262 = vmatmul.mubr.msk.f32.gmra.mrb[2].mxu0 %vm65_vm1, %v44_v47 }
   0xa   :  { %6891 = vmatprep.subr.bf16.mxu1 %v7586_v0 }
   0xb   :  { %6914 = vmatpush3.bf16.msra.mxu0 %v7687_v10 }
   0xc   :  { %6291 = vmatmul.mubr.f32.vlgmr.msra.gmra.mrb[0].mxu1 %v7588_v8  ;;  %6921 = vmatprep.subr.bf16.mxu0 %v7586_v0 }
   0xd   :  { %6893 = vmatpush3.bf16.msra.mxu1 %v7666_v4  ;;  %6301 = vmatprep.mubr.msk.f32.mxu1 %vm7587_vm2, %v7588_v8 }
   0xe   :  { %6894 = vmatprep.subr.bf16.mxu1 %v7586_v0 }
  0x11   :  { %6896 = vmatpush3.bf16.msra.mxu1 %v7687_v10 }
  0x12   :  { %6897 = vmatprep.subr.bf16.mxu1 %v7586_v0 }
  0xd8   :  { %v6260_v11 = vpop.f32.mrb[0].mxu0 }
  0xd9   :  { %v184_v13 = vpop.f32.mrb[1].mxu0  ;;  %v190_v32 = vadd.f32 %v6260_v11, %v7707_v12 }
  0xda   :  { %v185_v14 = vadd.f32 %v7707_v12, %v184_v13 }
  0xdc   :  { %v6263_v51 = vpop.f32.mrb[2].mxu0 }
  0xdd   :  { %v194_v52 = vpop.f32.mrb[3].mxu0  ;;  %v200_v13 = vadd.f32 %v6263_v51, %v7707_v12 }
  0xde   :  { %v195_v54 = vadd.f32 %v7707_v12, %v194_v52 }
  0xdf   :  { %v354_v15 = vpop.f32.mrb[0].mxu1 }
  0xe0   :  { %v358_v16 = vadd.f32 %v354_v15, %v185_v14  ;;  %v6292_v17 = vpop.f32.mrb[1].mxu1 }
  0xe2   :  { %7200 = vtanh.f32 %v358_v16  ;;  %v5825_v19 = vmul.f32 -1.442695, %v358_v16 }
  0xe4   :  { %7202 = vpow2.f32 %v5825_v19 }
  0xec   :  { %v7201_v18 = vpop.eup %7200 }
  0xed   :  { %368 = vrot.lane.b32.xlu0 %v7201_v18, %s7589_s17 }
  0xee   :  { %v7203_v20 = vpop.eup %7202 }
  0xef   :  { %v362_v21 = vadd.f32 1.0, %v7203_v20 }
  0xf1   :  { %7204 = vrcp.f32 %v362_v21 }
  0xfb   :  { %v7205_v22 = vpop.eup %7204 }
  0xfc   :  { %v366_v25 = vmul.f32 0.0, %v7205_v22 }
 0x15f   :  { %v369_v23 = vpop.permute.xlu0 %368 }
 0x160   :  { %v371_v24 = vmul.f32 %v7205_v22, %v369_v23 }
 0x162   :  { %373 = vrot.lane.b32.xlu0 %v371_v24, %s7590_s18 }
 0x1d4   :  { %v374_v26 = vpop.permute.xlu0 %373 }
 0x1d5   :  { %v376_v27 = vadd.f32 %v374_v26, %v366_v25 }
 0x1d7   :  { %7206 = vtanh.f32 %v376_v27 }
 0x1e1   :  { %v7207_v28 = vpop.eup %7206 }
 0x1e2   :  { %379 = vrot.lane.b32.xlu1 %v7207_v28, %s7589_s17  ;;  %v46_v28 = vld [vmem:[%s8641_s0 + $0x28] sm:$0xff] }
 0x254   :  { %v380_v29 = vpop.permute.xlu1 %379 }
 0x255   :  { %v382_v30 = vmul.f32 %v7205_v22, %v380_v29  ;;  %v47_v29 = vld [vmem:[%s8641_s0 + $0x30] sm:$0xff] }
 0x257   :  { %384 = vrot.lane.b32.xlu1 %v382_v30, %s7590_s18  ;;  %v48_v30 = vld [vmem:[%s8641_s0 + $0x38] sm:$0xff] }
 0x2c9   :  { %v385_v31 = vpop.permute.xlu1 %384 }
 0x2ca   :  { %387 = vst.msk [vmem:[#allocation3] sm:$0xff] %vm284_vm3, %v385_v31  ;;  %6302 = vmatmul.mubr.msk.f32.vlgmr.msra.gmra.mrb[2].mxu1 %vm284_vm3, %v385_v31  ;;  %v49_v31 = vld [vmem:[%s8641_s0 + $0x40] sm:$0xff] }
 0x2cb   :  { %6899 = vmatpush3.bf16.msra.mxu1 %v7666_v4  ;;  %6312 = vmatprep.mubr.msk.f32.mxu1 %vm7587_vm2, %v7588_v8 }
 0x2cc   :  { %6900 = vmatprep.subr.bf16.mxu1 %v7586_v0 }
 0x2cf   :  { %6902 = vmatpush3.bf16.msra.mxu1 %v7687_v10 }
 0x2d0   :  { %6903 = vmatprep.subr.bf16.mxu1 %v7586_v0 }
 0x39d   :  { %v458_v33 = vpop.f32.mrb[2].mxu1 }
 0x39e   :  { %v462_v34 = vadd.f32 %v458_v33, %v190_v32  ;;  %v6303_v35 = vpop.f32.mrb[3].mxu1  ;;  %v50_v32 = vld [vmem:[%s8641_s0 + $0x48] sm:$0xff]  ;;  %v51_v33 = vld [vmem:[%s8641_s0 + $0x50] sm:$0xff] }
 0x39f   :  { %v52_v35 = vld [vmem:[%s8641_s0 + $0x58] sm:$0xff] }
 0x3a0   :  { %7208 = vtanh.f32 %v462_v34  ;;  %v5827_v37 = vmul.f32 -1.442695, %v462_v34 }
 0x3a2   :  { %7210 = vpow2.f32 %v5827_v37  ;;  %v54_v37 = vld [vmem:[%s8641_s0 + $0x68] sm:$0xff] }
 0x3aa   :  { %v7209_v36 = vpop.eup %7208 }
 0x3ab   :  { %472 = vrot.lane.b32.xlu0 %v7209_v36, %s7589_s17  ;;  %v53_v36 = vld [vmem:[%s8641_s0 + $0x60] sm:$0xff] }
 0x3ac   :  { %v7211_v38 = vpop.eup %7210 }
 0x3ad   :  { %v466_v39 = vadd.f32 1.0, %v7211_v38  ;;  %v55_v38 = vld [vmem:[%s8641_s0 + $0x70] sm:$0xff] }
 0x3af   :  { %7212 = vrcp.f32 %v466_v39  ;;  %v56_v39 = vld [vmem:[%s8641_s0 + $0x78] sm:$0xff] }
 0x3b9   :  { %v7213_v40 = vpop.eup %7212 }
 0x3ba   :  { %v470_v43 = vmul.f32 %v7213_v40, %v376_v27  ;;  %v45_v27 = vld [vmem:[%s8641_s0 + $0x20] sm:$0xff] }
 0x3bb   :  { %6264 = vmatprep.mubr.msk.f32.mxu0 %vm65_vm1, %v45_v27 }
 0x3bc   :  { %6265 = vmatmul.mubr.msk.f32.gmra.mrb[4].mxu0 %vm65_vm1, %v46_v28 }
 0x3bd   :  { %6267 = vmatprep.mubr.msk.f32.mxu0 %vm65_vm1, %v47_v29 }
 0x3c0   :  { %6268 = vmatmul.mubr.msk.f32.gmra.mrb[6].mxu0 %vm65_vm1, %v48_v30 }
 0x3c1   :  { %6270 = vmatprep.mubr.msk.f32.mxu0 %vm65_vm1, %v49_v31 }
 0x3c4   :  { %6271 = vmatmul.mubr.msk.f32.gmra.mrb[8].mxu0 %vm65_vm1, %v50_v32 }
 0x3c5   :  { %6273 = vmatprep.mubr.msk.f32.mxu0 %vm65_vm1, %v51_v33 }
 0x3c8   :  { %6274 = vmatmul.mubr.msk.f32.gmra.mrb[10].mxu0 %vm65_vm1, %v52_v35 }
 0x3c9   :  { %6276 = vmatprep.mubr.msk.f32.mxu0 %vm65_vm1, %v53_v36 }
 0x3cc   :  { %6277 = vmatmul.mubr.msk.f32.gmra.mrb[12].mxu0 %vm65_vm1, %v54_v37 }
 0x3cd   :  { %6279 = vmatprep.mubr.msk.f32.mxu0 %vm65_vm1, %v55_v38 }
 0x3d0   :  { %6280 = vmatmul.mubr.msk.f32.gmra.mrb[14].mxu0 %vm65_vm1, %v56_v39 }
 0x3d1   :  { %6334 = vmatprep.mubr.msk.f32.mxu0 %vm7587_vm2, %v7588_v8 }
 0x41d   :  { %v473_v41 = vpop.permute.xlu0 %472 }
 0x41e   :  { %v475_v42 = vmul.f32 %v7213_v40, %v473_v41 }
 0x420   :  { %477 = vrot.lane.b32.xlu1 %v475_v42, %s7590_s18 }
 0x48f   :  { %v6266_v42 = vpop.f32.mrb[4].mxu0 }
 0x492   :  { %v478_v44 = vpop.permute.xlu1 %477 }
 0x493   :  { %v480_v45 = vadd.f32 %v478_v44, %v470_v43  ;;  %v204_v43 = vpop.f32.mrb[5].mxu0 }
 0x494   :  { %v7814_v44 = vpop.f32.mrb[6].mxu0 }
 0x495   :  { %7214 = vtanh.f32 %v480_v45 }
 0x49f   :  { %v7215_v48 = vpop.eup %7214 }
 0x4a0   :  { %483 = vrot.lane.b32.xlu0 %v7215_v48, %s7589_s17 }
 0x512   :  { %v484_v49 = vpop.permute.xlu0 %483 }
 0x513   :  { %v486_v50 = vmul.f32 %v7213_v40, %v484_v49 }
 0x515   :  { %488 = vrot.lane.b32.xlu1 %v486_v50, %s7590_s18 }
 0x587   :  { %v489_v53 = vpop.permute.xlu1 %488 }
 0x588   :  { %492 = vst.msk [vmem:[#allocation3 + $0x8] sm:$0xff] %vm284_vm3, %v489_v53  ;;  %6313 = vmatmul.mubr.msk.f32.vlgmr.msra.gmra.mrb[4].mxu1 %vm284_vm3, %v489_v53 }
 0x589   :  { %6905 = vmatpush3.bf16.msra.mxu1 %v7666_v4  ;;  %6323 = vmatprep.mubr.msk.f32.mxu1 %vm7587_vm2, %v7588_v8 }
 0x58a   :  { %6906 = vmatprep.subr.bf16.mxu1 %v7586_v0 }
 0x58d   :  { %6908 = vmatpush3.bf16.msra.mxu1 %v7687_v10 }
 0x58e   :  { %6915 = vmatprep.subr.bf16.mxu1 %v7586_v0 }
 0x65b   :  { %v563_v55 = vpop.f32.mrb[4].mxu1 }
 0x65c   :  { %v567_v56 = vadd.f32 %v563_v55, %v195_v54  ;;  %v6314_v57 = vpop.f32.mrb[5].mxu1  ;;  %v205_v55 = vadd.f32 %v7707_v12, %v204_v43 }
 0x65e   :  { %7216 = vtanh.f32 %v567_v56  ;;  %v5829_v59 = vmul.f32 -1.442695, %v567_v56 }
 0x660   :  { %7218 = vpow2.f32 %v5829_v59 }
 0x668   :  { %v7217_v58 = vpop.eup %7216 }
 0x669   :  { %577 = vrot.lane.b32.xlu0 %v7217_v58, %s7589_s17 }
 0x66a   :  { %v7219_v60 = vpop.eup %7218 }
 0x66b   :  { %v571_v61 = vadd.f32 1.0, %v7219_v60 }
 0x66d   :  { %7220 = vrcp.f32 %v571_v61 }
 0x677   :  { %v7221_v62 = vpop.eup %7220 }
 0x678   :  { %v575_v2 = vmul.f32 %v7221_v62, %v480_v45  ;;  %v7816_v45 = vpop.f32.mrb[7].mxu0 }
 0x679   :  { %v7818_v46 = vpop.f32.mrb[8].mxu0  ;;  %v215_v32 = vadd.f32 %v7707_v12, %v7816_v45 }
 0x67a   :  { %v7820_v47 = vpop.f32.mrb[9].mxu0 }
 0x67b   :  { %v7822_v48 = vpop.f32.mrb[10].mxu0 }
 0x67c   :  { %v7824_v49 = vpop.f32.mrb[11].mxu0 }
 0x67d   :  { %v7826_v50 = vpop.f32.mrb[12].mxu0 }
 0x67e   :  { %v7828_v51 = vpop.f32.mrb[13].mxu0 }
 0x67f   :  { %v7830_v52 = vpop.f32.mrb[14].mxu0 }
 0x680   :  { %v7832_v53 = vpop.f32.mrb[15].mxu0 }
 0x6db   :  { %v578_v63 = vpop.permute.xlu0 %577 }
 0x6dc   :  { %v580_v1 = vmul.f32 %v7221_v62, %v578_v63 }
 0x6de   :  { %582 = vrot.lane.b32.xlu1 %v580_v1, %s7590_s18 }
 0x750   :  { %v583_v3 = vpop.permute.xlu1 %582 }
 0x751   :  { %v585_v5 = vadd.f32 %v583_v3, %v575_v2 }
 0x753   :  { %7222 = vtanh.f32 %v585_v5 }
 0x75d   :  { %v7223_v6 = vpop.eup %7222 }
 0x75e   :  { %588 = vrot.lane.b32.xlu0 %v7223_v6, %s7589_s17 }
 0x7d0   :  { %v589_v7 = vpop.permute.xlu0 %588 }
 0x7d1   :  { %v591_v9 = vmul.f32 %v7221_v62, %v589_v7 }
 0x7d3   :  { %593 = vrot.lane.b32.xlu1 %v591_v9, %s7590_s18 }
 0x845   :  { %v594_v11 = vpop.permute.xlu1 %593 }
 0x846   :  { %597 = vst.msk [vmem:[#allocation3 + $0x10] sm:$0xff] %vm284_vm3, %v594_v11  ;;  %6324 = vmatmul.mubr.msk.f32.vlgmr.msra.gmra.mrb[6].mxu1 %vm284_vm3, %v594_v11 }
 0x847   :  { %6917 = vmatpush3.bf16.msra.mxu1 %v7666_v4  ;;  %6345 = vmatprep.mubr.msk.f32.mxu1 %vm7587_vm2, %v7588_v8 }
 0x848   :  { %6918 = vmatprep.subr.bf16.mxu1 %v7586_v0 }
 0x84b   :  { %6920 = vmatpush3.bf16.msra.mxu1 %v7687_v10 }
 0x84c   :  { %6927 = vmatprep.subr.bf16.mxu1 %v7586_v0 }
 0x919   :  { %v668_v14 = vpop.f32.mrb[6].mxu1 }
 0x91a   :  { %v672_v15 = vadd.f32 %v668_v14, %v200_v13  ;;  %v6325_v16 = vpop.f32.mrb[7].mxu1  ;;  %v210_v14 = vadd.f32 %v6266_v42, %v7707_v12 }
 0x91c   :  { %7224 = vtanh.f32 %v672_v15  ;;  %v5831_v18 = vmul.f32 -1.442695, %v672_v15 }
 0x91e   :  { %7226 = vpow2.f32 %v5831_v18 }
 0x926   :  { %v7225_v17 = vpop.eup %7224 }
 0x927   :  { %682 = vrot.lane.b32.xlu0 %v7225_v17, %s7589_s17 }
 0x928   :  { %v7227_v19 = vpop.eup %7226 }
 0x929   :  { %v676_v20 = vadd.f32 1.0, %v7227_v19 }
 0x92b   :  { %7228 = vrcp.f32 %v676_v20 }
 0x935   :  { %v7229_v21 = vpop.eup %7228 }
 0x936   :  { %v680_v24 = vmul.f32 %v7229_v21, %v585_v5 }
 0x999   :  { %v683_v22 = vpop.permute.xlu0 %682 }
 0x99a   :  { %v685_v23 = vmul.f32 %v7229_v21, %v683_v22 }
 0x99c   :  { %687 = vrot.lane.b32.xlu1 %v685_v23, %s7590_s18 }
 0xa0e   :  { %v688_v25 = vpop.permute.xlu1 %687 }
 0xa0f   :  { %v7759_v26 = vadd.f32 %v688_v25, %v680_v24 }
 0xa11   :  { %7230 = vtanh.f32 %v7759_v26 }
 0xa1b   :  { %v7231_v34 = vpop.eup %7230 }
 0xa1c   :  { %693 = vrot.lane.b32.xlu0 %v7231_v34, %s7589_s17 }
 0xa8e   :  { %v694_v40 = vpop.permute.xlu0 %693 }
 0xa8f   :  { %v696_v41 = vmul.f32 %v7229_v21, %v694_v40 }
 0xa91   :  { %698 = vrot.lane.b32.xlu1 %v696_v41, %s7590_s18 }
 0xb03   :  { %v699_v54 = vpop.permute.xlu1 %698 }
 0xb04   :  { %702 = vst.msk [vmem:[#allocation3 + $0x18] sm:$0xff] %vm284_vm3, %v699_v54  ;;  %6335 = vmatmul.mubr.msk.f32.vlgmr.msra.gmra.mrb[16].mxu0 %vm284_vm3, %v699_v54 }
 0xb05   :  { %6923 = vmatpush3.bf16.msra.mxu0 %v7666_v4  ;;  %6356 = vmatprep.mubr.msk.f32.mxu0 %vm7587_vm2, %v7588_v8 }
 0xb06   :  { %6924 = vmatprep.subr.bf16.mxu0 %v7586_v0 }
 0xb09   :  { %6926 = vmatpush3.bf16.msra.mxu0 %v7687_v10 }
 0xb0a   :  { %6933 = vmatprep.subr.bf16.mxu0 %v7586_v0 }
 0xbd7   :  { %v773_v56 = vpop.f32.mrb[16].mxu0 }
 0xbd8   :  { %v777_v57 = vadd.f32 %v773_v56, %v205_v55  ;;  %v6336_v58 = vpop.f32.mrb[17].mxu0 }
 0xbda   :  { %7232 = vtanh.f32 %v777_v57  ;;  %v5833_v60 = vmul.f32 -1.442695, %v777_v57 }
 0xbdc   :  { %7234 = vpow2.f32 %v5833_v60 }
 0xbe4   :  { %v7233_v59 = vpop.eup %7232 }
 0xbe5   :  { %787 = vrot.lane.b32.xlu0 %v7233_v59, %s7589_s17  ;;  %v220_v59 = vadd.f32 %v7814_v44, %v7707_v12 }
 0xbe6   :  { %v7235_v61 = vpop.eup %7234 }
 0xbe7   :  { %v781_v62 = vadd.f32 1.0, %v7235_v61 }
 0xbe9   :  { %7236 = vrcp.f32 %v781_v62 }
 0xbf3   :  { %v7237_v63 = vpop.eup %7236 }
 0xbf4   :  { %v785_v3 = vmul.f32 %v7237_v63, %v7759_v26 }
 0xc57   :  { %v788_v1 = vpop.permute.xlu0 %787 }
 0xc58   :  { %v790_v2 = vmul.f32 %v7237_v63, %v788_v1 }
 0xc5a   :  { %792 = vrot.lane.b32.xlu1 %v790_v2, %s7590_s18 }
 0xccc   :  { %v793_v5 = vpop.permute.xlu1 %792 }
 0xccd   :  { %v795_v6 = vadd.f32 %v793_v5, %v785_v3 }
 0xccf   :  { %7238 = vtanh.f32 %v795_v6 }
 0xcd9   :  { %v7239_v7 = vpop.eup %7238 }
 0xcda   :  { %798 = vrot.lane.b32.xlu0 %v7239_v7, %s7589_s17 }
 0xd4c   :  { %v799_v9 = vpop.permute.xlu0 %798 }
 0xd4d   :  { %v801_v11 = vmul.f32 %v7237_v63, %v799_v9 }
 0xd4f   :  { %803 = vrot.lane.b32.xlu1 %v801_v11, %s7590_s18 }
 0xdc1   :  { %v804_v13 = vpop.permute.xlu1 %803 }
 0xdc2   :  { %807 = vst.msk [vmem:[#allocation3 + $0x20] sm:$0xff] %vm284_vm3, %v804_v13  ;;  %6346 = vmatmul.mubr.msk.f32.vlgmr.msra.gmra.mrb[8].mxu1 %vm284_vm3, %v804_v13 }
 0xdc3   :  { %6929 = vmatpush3.bf16.msra.mxu1 %v7666_v4  ;;  %6367 = vmatprep.mubr.msk.f32.mxu1 %vm7587_vm2, %v7588_v8 }
 0xdc4   :  { %6930 = vmatprep.subr.bf16.mxu1 %v7586_v0 }
 0xdc7   :  { %6932 = vmatpush3.bf16.msra.mxu1 %v7687_v10 }
 0xdc8   :  { %6939 = vmatprep.subr.bf16.mxu1 %v7586_v0 }
 0xe95   :  { %v878_v15 = vpop.f32.mrb[8].mxu1 }
 0xe96   :  { %v882_v16 = vadd.f32 %v878_v15, %v210_v14  ;;  %v6347_v17 = vpop.f32.mrb[9].mxu1 }
 0xe97   :  { %v225_v17 = vadd.f32 %v7707_v12, %v7820_v47 }
 0xe98   :  { %7240 = vtanh.f32 %v882_v16  ;;  %v5835_v19 = vmul.f32 -1.442695, %v882_v16 }
 0xe9a   :  { %7242 = vpow2.f32 %v5835_v19 }
 0xea2   :  { %v7241_v18 = vpop.eup %7240 }
 0xea3   :  { %892 = vrot.lane.b32.xlu0 %v7241_v18, %s7589_s17 }
 0xea4   :  { %v7243_v20 = vpop.eup %7242 }
 0xea5   :  { %v886_v21 = vadd.f32 1.0, %v7243_v20 }
 0xea7   :  { %7244 = vrcp.f32 %v886_v21 }
 0xeb1   :  { %v7245_v22 = vpop.eup %7244 }
 0xeb2   :  { %v890_v25 = vmul.f32 %v7245_v22, %v795_v6 }
 0xf15   :  { %v893_v23 = vpop.permute.xlu0 %892 }
 0xf16   :  { %v895_v24 = vmul.f32 %v7245_v22, %v893_v23 }
 0xf18   :  { %897 = vrot.lane.b32.xlu1 %v895_v24, %s7590_s18 }
 0xf8a   :  { %v898_v26 = vpop.permute.xlu1 %897 }
 0xf8b   :  { %v900_v27 = vadd.f32 %v898_v26, %v890_v25 }
 0xf8d   :  { %7246 = vtanh.f32 %v900_v27 }
 0xf97   :  { %v7247_v28 = vpop.eup %7246 }
 0xf98   :  { %903 = vrot.lane.b32.xlu0 %v7247_v28, %s7589_s17 }
0x100a   :  { %v904_v29 = vpop.permute.xlu0 %903 }
0x100b   :  { %v906_v30 = vmul.f32 %v7245_v22, %v904_v29 }
0x100d   :  { %908 = vrot.lane.b32.xlu1 %v906_v30, %s7590_s18 }
0x107f   :  { %v909_v31 = vpop.permute.xlu1 %908 }
0x1080   :  { %912 = vst.msk [vmem:[#allocation3 + $0x28] sm:$0xff] %vm284_vm3, %v909_v31  ;;  %6357 = vmatmul.mubr.msk.f32.vlgmr.msra.gmra.mrb[18].mxu0 %vm284_vm3, %v909_v31 }
0x1081   :  { %6935 = vmatpush3.bf16.msra.mxu0 %v7666_v4  ;;  %6378 = vmatprep.mubr.msk.f32.mxu0 %vm7587_vm2, %v7588_v8 }
0x1082   :  { %6936 = vmatprep.subr.bf16.mxu0 %v7586_v0 }
0x1085   :  { %6938 = vmatpush3.bf16.msra.mxu0 %v7687_v10 }
0x1086   :  { %6945 = vmatprep.subr.bf16.mxu0 %v7586_v0 }
0x1153   :  { %v983_v33 = vpop.f32.mrb[18].mxu0 }
0x1154   :  { %v987_v34 = vadd.f32 %v983_v33, %v215_v32  ;;  %v6358_v35 = vpop.f32.mrb[19].mxu0 }
0x1156   :  { %7248 = vtanh.f32 %v987_v34  ;;  %v5837_v37 = vmul.f32 -1.442695, %v987_v34  ;;  %v230_v34 = vadd.f32 %v7818_v46, %v7707_v12 }
0x1158   :  { %7250 = vpow2.f32 %v5837_v37 }
0x1160   :  { %v7249_v36 = vpop.eup %7248 }
0x1161   :  { %997 = vrot.lane.b32.xlu0 %v7249_v36, %s7589_s17 }
0x1162   :  { %v7251_v38 = vpop.eup %7250 }
0x1163   :  { %v991_v39 = vadd.f32 1.0, %v7251_v38 }
0x1165   :  { %7252 = vrcp.f32 %v991_v39 }
0x116f   :  { %v7253_v40 = vpop.eup %7252 }
0x1170   :  { %v995_v43 = vmul.f32 %v7253_v40, %v900_v27 }
0x11d3   :  { %v998_v41 = vpop.permute.xlu0 %997 }
0x11d4   :  { %v1000_v42 = vmul.f32 %v7253_v40, %v998_v41 }
0x11d6   :  { %1002 = vrot.lane.b32.xlu1 %v1000_v42, %s7590_s18 }
0x1248   :  { %v1003_v54 = vpop.permute.xlu1 %1002 }
0x1249   :  { %v1005_v45 = vadd.f32 %v1003_v54, %v995_v43 }
0x124b   :  { %7254 = vtanh.f32 %v1005_v45 }
0x1255   :  { %v7255_v55 = vpop.eup %7254 }
0x1256   :  { %1008 = vrot.lane.b32.xlu0 %v7255_v55, %s7589_s17 }
0x12c8   :  { %v1009_v56 = vpop.permute.xlu0 %1008 }
0x12c9   :  { %v1011_v57 = vmul.f32 %v7253_v40, %v1009_v56 }
0x12cb   :  { %1013 = vrot.lane.b32.xlu1 %v1011_v57, %s7590_s18 }
0x133d   :  { %v1014_v58 = vpop.permute.xlu1 %1013 }
0x133e   :  { %1017 = vst.msk [vmem:[#allocation3 + $0x30] sm:$0xff] %vm284_vm3, %v1014_v58  ;;  %6368 = vmatmul.mubr.msk.f32.vlgmr.msra.gmra.mrb[10].mxu1 %vm284_vm3, %v1014_v58 }
0x133f   :  { %6941 = vmatpush3.bf16.msra.mxu1 %v7666_v4  ;;  %6389 = vmatprep.mubr.msk.f32.mxu1 %vm7587_vm2, %v7588_v8 }
0x1340   :  { %6942 = vmatprep.subr.bf16.mxu1 %v7586_v0 }
0x1343   :  { %6944 = vmatpush3.bf16.msra.mxu1 %v7687_v10 }
0x1344   :  { %6951 = vmatprep.subr.bf16.mxu1 %v7586_v0 }
0x1411   :  { %v1088_v60 = vpop.f32.mrb[10].mxu1 }
0x1412   :  { %v1092_v61 = vadd.f32 %v1088_v60, %v220_v59  ;;  %v6369_v62 = vpop.f32.mrb[11].mxu1  ;;  %v235_v60 = vadd.f32 %v7707_v12, %v7824_v49 }
0x1414   :  { %7256 = vtanh.f32 %v1092_v61  ;;  %v5839_v1 = vmul.f32 -1.442695, %v1092_v61 }
0x1416   :  { %7258 = vpow2.f32 %v5839_v1 }
0x141e   :  { %v7257_v63 = vpop.eup %7256 }
0x141f   :  { %1102 = vrot.lane.b32.xlu0 %v7257_v63, %s7589_s17 }
0x1420   :  { %v7259_v2 = vpop.eup %7258 }
0x1421   :  { %v1096_v3 = vadd.f32 1.0, %v7259_v2 }
0x1423   :  { %7260 = vrcp.f32 %v1096_v3 }
0x142d   :  { %v7261_v5 = vpop.eup %7260 }
0x142e   :  { %v1100_v9 = vmul.f32 %v7261_v5, %v1005_v45 }
0x1491   :  { %v1103_v6 = vpop.permute.xlu0 %1102 }
0x1492   :  { %v1105_v7 = vmul.f32 %v7261_v5, %v1103_v6 }
0x1494   :  { %1107 = vrot.lane.b32.xlu1 %v1105_v7, %s7590_s18 }
0x1506   :  { %v1108_v11 = vpop.permute.xlu1 %1107 }
0x1507   :  { %v1110_v44 = vadd.f32 %v1108_v11, %v1100_v9 }
0x1509   :  { %7262 = vtanh.f32 %v1110_v44 }
0x1513   :  { %v7263_v13 = vpop.eup %7262 }
0x1514   :  { %1113 = vrot.lane.b32.xlu0 %v7263_v13, %s7589_s17 }
0x1586   :  { %v1114_v14 = vpop.permute.xlu0 %1113 }
0x1587   :  { %v1116_v15 = vmul.f32 %v7261_v5, %v1114_v14 }
0x1589   :  { %1118 = vrot.lane.b32.xlu1 %v1116_v15, %s7590_s18 }
0x15fb   :  { %v1119_v16 = vpop.permute.xlu1 %1118 }
0x15fc   :  { %1122 = vst.msk [vmem:[#allocation3 + $0x38] sm:$0xff] %vm284_vm3, %v1119_v16  ;;  %6379 = vmatmul.mubr.msk.f32.vlgmr.msra.gmra.mrb[20].mxu0 %vm284_vm3, %v1119_v16 }
0x15fd   :  { %6947 = vmatpush3.bf16.msra.mxu0 %v7666_v4  ;;  %6400 = vmatprep.mubr.msk.f32.mxu0 %vm7587_vm2, %v7588_v8 }
0x15fe   :  { %6948 = vmatprep.subr.bf16.mxu0 %v7586_v0 }
0x1601   :  { %6950 = vmatpush3.bf16.msra.mxu0 %v7687_v10 }
0x1602   :  { %6957 = vmatprep.subr.bf16.mxu0 %v7586_v0 }
0x16cf   :  { %v1193_v18 = vpop.f32.mrb[20].mxu0 }
0x16d0   :  { %v1197_v19 = vadd.f32 %v1193_v18, %v225_v17  ;;  %v6380_v20 = vpop.f32.mrb[21].mxu0  ;;  %v240_v17 = vadd.f32 %v7822_v48, %v7707_v12 }
0x16d2   :  { %7264 = vtanh.f32 %v1197_v19  ;;  %v5841_v22 = vmul.f32 -1.442695, %v1197_v19 }
0x16d4   :  { %7266 = vpow2.f32 %v5841_v22 }
0x16dc   :  { %v7265_v21 = vpop.eup %7264 }
0x16dd   :  { %1207 = vrot.lane.b32.xlu0 %v7265_v21, %s7589_s17 }
0x16de   :  { %v7267_v23 = vpop.eup %7266 }
0x16df   :  { %v1201_v24 = vadd.f32 1.0, %v7267_v23 }
0x16e1   :  { %7268 = vrcp.f32 %v1201_v24 }
0x16eb   :  { %v7269_v25 = vpop.eup %7268 }
0x16ec   :  { %v1205_v28 = vmul.f32 %v7269_v25, %v1110_v44 }
0x174f   :  { %v1208_v26 = vpop.permute.xlu0 %1207 }
0x1750   :  { %v1210_v27 = vmul.f32 %v7269_v25, %v1208_v26 }
0x1752   :  { %1212 = vrot.lane.b32.xlu1 %v1210_v27, %s7590_s18 }
0x17c4   :  { %v1213_v29 = vpop.permute.xlu1 %1212 }
0x17c5   :  { %v1215_v47 = vadd.f32 %v1213_v29, %v1205_v28 }
0x17c7   :  { %7270 = vtanh.f32 %v1215_v47 }
0x17d1   :  { %v7271_v30 = vpop.eup %7270 }
0x17d2   :  { %1218 = vrot.lane.b32.xlu0 %v7271_v30, %s7589_s17 }
0x1844   :  { %v1219_v31 = vpop.permute.xlu0 %1218 }
0x1845   :  { %v1221_v32 = vmul.f32 %v7269_v25, %v1219_v31 }
0x1847   :  { %1223 = vrot.lane.b32.xlu1 %v1221_v32, %s7590_s18 }
0x18b9   :  { %v1224_v33 = vpop.permute.xlu1 %1223 }
0x18ba   :  { %1227 = vst.msk [vmem:[#allocation3 + $0x40] sm:$0xff] %vm284_vm3, %v1224_v33  ;;  %6390 = vmatmul.mubr.msk.f32.vlgmr.msra.gmra.mrb[12].mxu1 %vm284_vm3, %v1224_v33  ;;  %v245_v33 = vadd.f32 %v7707_v12, %v7828_v51 }
0x18bb   :  { %6953 = vmatpush3.bf16.msra.mxu1 %v7666_v4  ;;  %6411 = vmatprep.mubr.msk.f32.mxu1 %vm7587_vm2, %v7588_v8 }
0x18bc   :  { %6954 = vmatprep.subr.bf16.mxu1 %v7586_v0 }
0x18bf   :  { %6956 = vmatpush3.bf16.msra.mxu1 %v7687_v10 }
0x18c0   :  { %6963 = vmatprep.subr.bf16.mxu1 %v7586_v0 }
0x198d   :  { %v1298_v35 = vpop.f32.mrb[12].mxu1 }
0x198e   :  { %v1302_v36 = vadd.f32 %v1298_v35, %v230_v34  ;;  %v6391_v37 = vpop.f32.mrb[13].mxu1 }
0x1990   :  { %7272 = vtanh.f32 %v1302_v36  ;;  %v5843_v39 = vmul.f32 -1.442695, %v1302_v36 }
0x1992   :  { %7274 = vpow2.f32 %v5843_v39 }
0x199a   :  { %v7273_v38 = vpop.eup %7272 }
0x199b   :  { %1312 = vrot.lane.b32.xlu0 %v7273_v38, %s7589_s17 }
0x199c   :  { %v7275_v40 = vpop.eup %7274 }
0x199d   :  { %v1306_v41 = vadd.f32 1.0, %v7275_v40 }
0x199f   :  { %7276 = vrcp.f32 %v1306_v41 }
0x19a9   :  { %v7277_v42 = vpop.eup %7276 }
0x19aa   :  { %v1310_v45 = vmul.f32 %v7277_v42, %v1215_v47 }
0x1a0d   :  { %v1313_v43 = vpop.permute.xlu0 %1312 }
0x1a0e   :  { %v1315_v54 = vmul.f32 %v7277_v42, %v1313_v43 }
0x1a10   :  { %1317 = vrot.lane.b32.xlu1 %v1315_v54, %s7590_s18 }
0x1a82   :  { %v1318_v55 = vpop.permute.xlu1 %1317 }
0x1a83   :  { %v1320_v46 = vadd.f32 %v1318_v55, %v1310_v45 }
0x1a85   :  { %7278 = vtanh.f32 %v1320_v46 }
0x1a8f   :  { %v7279_v56 = vpop.eup %7278 }
0x1a90   :  { %1323 = vrot.lane.b32.xlu0 %v7279_v56, %s7589_s17 }
0x1b02   :  { %v1324_v57 = vpop.permute.xlu0 %1323 }
0x1b03   :  { %v1326_v58 = vmul.f32 %v7277_v42, %v1324_v57 }
0x1b05   :  { %1328 = vrot.lane.b32.xlu1 %v1326_v58, %s7590_s18  ;;  %v250_v58 = vadd.f32 %v7826_v50, %v7707_v12  ;;  %v1979_v50 = vld [vmem:[%s8643_s4] sm:$0xff] }
0x1b77   :  { %v1329_v59 = vpop.permute.xlu1 %1328 }
0x1b78   :  { %1332 = vst.msk [vmem:[#allocation3 + $0x48] sm:$0xff] %vm284_vm3, %v1329_v59  ;;  %6401 = vmatmul.mubr.msk.f32.vlgmr.msra.gmra.mrb[22].mxu0 %vm284_vm3, %v1329_v59 }
0x1b79   :  { %6959 = vmatpush3.bf16.msra.mxu0 %v7666_v4  ;;  %6422 = vmatprep.mubr.msk.f32.mxu0 %vm7587_vm2, %v7588_v8 }
0x1b7a   :  { %6960 = vmatprep.subr.bf16.mxu0 %v7586_v0 }
0x1b7d   :  { %6962 = vmatpush3.bf16.msra.mxu0 %v7687_v10 }
0x1b7e   :  { %6969 = vmatprep.subr.bf16.mxu0 %v7586_v0 }
0x1c4b   :  { %v1403_v61 = vpop.f32.mrb[22].mxu0 }
0x1c4c   :  { %v1407_v62 = vadd.f32 %v1403_v61, %v235_v60  ;;  %v6402_v63 = vpop.f32.mrb[23].mxu0 }
0x1c4e   :  { %7280 = vtanh.f32 %v1407_v62  ;;  %v5845_v2 = vmul.f32 -1.442695, %v1407_v62 }
0x1c50   :  { %7282 = vpow2.f32 %v5845_v2 }
0x1c58   :  { %v7281_v1 = vpop.eup %7280 }
0x1c59   :  { %1417 = vrot.lane.b32.xlu0 %v7281_v1, %s7589_s17 }
0x1c5a   :  { %v7283_v3 = vpop.eup %7282 }
0x1c5b   :  { %v1411_v5 = vadd.f32 1.0, %v7283_v3 }
0x1c5d   :  { %7284 = vrcp.f32 %v1411_v5 }
0x1c67   :  { %v7285_v6 = vpop.eup %7284 }
0x1c68   :  { %v1415_v11 = vmul.f32 %v7285_v6, %v1320_v46 }
0x1ccb   :  { %v1418_v7 = vpop.permute.xlu0 %1417 }
0x1ccc   :  { %v1420_v9 = vmul.f32 %v7285_v6, %v1418_v7  ;;  %v1980_v7 = vld [vmem:[%s8643_s4 + $0x8] sm:$0xff] }
0x1cce   :  { %1422 = vrot.lane.b32.xlu1 %v1420_v9, %s7590_s18  ;;  %v6981_v9 = vpack.c.bf16 %v1980_v7, %v1979_v50 }
0x1d40   :  { %v1423_v44 = vpop.permute.xlu1 %1422 }
0x1d41   :  { %v1425_v49 = vadd.f32 %v1423_v44, %v1415_v11 }
0x1d43   :  { %7286 = vtanh.f32 %v1425_v49 }
0x1d4d   :  { %v7287_v13 = vpop.eup %7286 }
0x1d4e   :  { %1428 = vrot.lane.b32.xlu0 %v7287_v13, %s7589_s17  ;;  %v1981_v13 = vld [vmem:[%s8643_s4 + $0x10] sm:$0xff] }
0x1dc0   :  { %v1429_v14 = vpop.permute.xlu0 %1428 }
0x1dc1   :  { %v1431_v15 = vmul.f32 %v7285_v6, %v1429_v14  ;;  %v1982_v14 = vld [vmem:[%s8643_s4 + $0x18] sm:$0xff] }
0x1dc3   :  { %1433 = vrot.lane.b32.xlu1 %v1431_v15, %s7590_s18  ;;  %v6985_v15 = vpack.c.bf16 %v1982_v14, %v1981_v13  ;;  %v8090_v14 = vld [vmem:[%s8645_s6] ss:$0 sm:$0xff] }
0x1e35   :  { %v1434_v16 = vpop.permute.xlu1 %1433 }
0x1e36   :  { %1437 = vst.msk [vmem:[#allocation3 + $0x50] sm:$0xff] %vm284_vm3, %v1434_v16  ;;  %6412 = vmatmul.mubr.msk.f32.vlgmr.msra.gmra.mrb[14].mxu1 %vm284_vm3, %v1434_v16 }
0x1e37   :  { %6965 = vmatpush3.bf16.msra.mxu1 %v7666_v4  ;;  %6433 = vmatprep.mubr.msk.f32.mxu1 %vm7587_vm2, %v7588_v8 }
0x1e38   :  { %6966 = vmatprep.subr.bf16.mxu1 %v7586_v0 }
0x1e3b   :  { %6968 = vmatpush3.bf16.msra.mxu1 %v7687_v10 }
0x1e3c   :  { %6975 = vmatprep.subr.bf16.mxu1 %v7586_v0 }
0x1f09   :  { %v1508_v18 = vpop.f32.mrb[14].mxu1 }
0x1f0a   :  { %v1512_v19 = vadd.f32 %v1508_v18, %v240_v17  ;;  %v6413_v20 = vpop.f32.mrb[15].mxu1  ;;  %v1963_v17 = vld [vmem:[#allocation3] sm:$0xff]  ;;  %v1964_v18 = vld [vmem:[#allocation3 + $0x8] sm:$0xff] }
0x1f0b   :  { %v1966_v20 = vld [vmem:[#allocation3 + $0x18] sm:$0xff] }
0x1f0c   :  { %7288 = vtanh.f32 %v1512_v19  ;;  %v5847_v22 = vmul.f32 -1.442695, %v1512_v19  ;;  %v1965_v19 = vld [vmem:[#allocation3 + $0x10] sm:$0xff] }
0x1f0e   :  { %7290 = vpow2.f32 %v5847_v22  ;;  %v1968_v22 = vld [vmem:[#allocation3 + $0x28] sm:$0xff] }
0x1f16   :  { %v7289_v21 = vpop.eup %7288 }
0x1f17   :  { %1522 = vrot.lane.b32.xlu0 %v7289_v21, %s7589_s17  ;;  %v1967_v21 = vld [vmem:[#allocation3 + $0x20] sm:$0xff] }
0x1f18   :  { %v7291_v23 = vpop.eup %7290 }
0x1f19   :  { %v1516_v24 = vadd.f32 1.0, %v7291_v23  ;;  %v1969_v23 = vld [vmem:[#allocation3 + $0x30] sm:$0xff] }
0x1f1b   :  { %7292 = vrcp.f32 %v1516_v24  ;;  %v1970_v24 = vld [vmem:[#allocation3 + $0x38] sm:$0xff] }
0x1f25   :  { %v7293_v25 = vpop.eup %7292 }
0x1f26   :  { %v1520_v28 = vmul.f32 %v7293_v25, %v1425_v49 }
0x1f89   :  { %v1523_v26 = vpop.permute.xlu0 %1522 }
0x1f8a   :  { %v1525_v27 = vmul.f32 %v7293_v25, %v1523_v26  ;;  %v1972_v26 = vld [vmem:[#allocation3 + $0x48] sm:$0xff] }
0x1f8c   :  { %1527 = vrot.lane.b32.xlu1 %v1525_v27, %s7590_s18  ;;  %v1973_v27 = vld [vmem:[#allocation3 + $0x50] sm:$0xff] }
0x1ffe   :  { %v1528_v29 = vpop.permute.xlu1 %1527 }
0x1fff   :  { %v1530_v48 = vadd.f32 %v1528_v29, %v1520_v28 }
0x2001   :  { %7294 = vtanh.f32 %v1530_v48 }
0x200b   :  { %v7295_v47 = vpop.eup %7294 }
0x200c   :  { %1533 = vrot.lane.b32.xlu0 %v7295_v47, %s7589_s17  ;;  %v8007_v47 = vld [vmem:[%s8642_s3] ss:$0 sm:$0xff] }
0x207e   :  { %v1534_v30 = vpop.permute.xlu0 %1533 }
0x207f   :  { %v1536_v31 = vmul.f32 %v7293_v25, %v1534_v30  ;;  %v1971_v25 = vld [vmem:[#allocation3 + $0x40] sm:$0xff]  ;;  %v255_v30 = vadd.f32 %v8007_v47, %v7832_v53 }
0x2081   :  { %1538 = vrot.lane.b32.xlu1 %v1536_v31, %s7590_s18 }
0x20f3   :  { %v1539_v32 = vpop.permute.xlu1 %1538 }
0x20f4   :  { %1542 = vst.msk [vmem:[#allocation3 + $0x58] sm:$0xff] %vm284_vm3, %v1539_v32  ;;  %6423 = vmatmul.mubr.msk.f32.vlgmr.msra.gmra.mrb[24].mxu0 %vm284_vm3, %v1539_v32 }
0x20f5   :  { %6971 = vmatpush3.bf16.msra.mxu0 %v7666_v4  ;;  %6444 = vmatprep.mubr.msk.f32.mxu0 %vm7587_vm2, %v7588_v8 }
0x20f6   :  { %6972 = vmatprep.subr.bf16.mxu0 %v7586_v0 }
0x20f9   :  { %6974 = vmatpush3.bf16.msra.mxu0 %v7687_v10 }
0x20fa   :  { %6982 = vmatprep.subr.bf16.mxu0 %v6981_v9 }
0x20fb   :  { %v1974_v28 = vld [vmem:[#allocation3 + $0x58] sm:$0xff] }
0x21c7   :  { %v1613_v34 = vpop.f32.mrb[24].mxu0 }
0x21c8   :  { %v1617_v35 = vadd.f32 %v1613_v34, %v245_v33  ;;  %v6424_v36 = vpop.f32.mrb[25].mxu0 }
0x21ca   :  { %7296 = vtanh.f32 %v1617_v35  ;;  %v5849_v38 = vmul.f32 -1.442695, %v1617_v35 }
0x21cc   :  { %7298 = vpow2.f32 %v5849_v38 }
0x21d4   :  { %v7297_v37 = vpop.eup %7296 }
0x21d5   :  { %1627 = vrot.lane.b32.xlu0 %v7297_v37, %s7589_s17 }
0x21d6   :  { %v7299_v39 = vpop.eup %7298 }
0x21d7   :  { %v1621_v40 = vadd.f32 1.0, %v7299_v39 }
0x21d9   :  { %7300 = vrcp.f32 %v1621_v40 }
0x21e3   :  { %v7301_v41 = vpop.eup %7300 }
0x21e4   :  { %v1625_v54 = vmul.f32 %v7301_v41, %v1530_v48 }
0x2247   :  { %v1628_v42 = vpop.permute.xlu0 %1627 }
0x2248   :  { %v1630_v43 = vmul.f32 %v7301_v41, %v1628_v42 }
0x224a   :  { %1632 = vrot.lane.b32.xlu1 %v1630_v43, %s7590_s18 }
0x22bc   :  { %v1633_v45 = vpop.permute.xlu1 %1632 }
0x22bd   :  { %v1635_v51 = vadd.f32 %v1633_v45, %v1625_v54 }
0x22bf   :  { %7302 = vtanh.f32 %v1635_v51 }
0x22c9   :  { %v7303_v55 = vpop.eup %7302 }
0x22ca   :  { %1638 = vrot.lane.b32.xlu0 %v7303_v55, %s7589_s17 }
0x233c   :  { %v1639_v46 = vpop.permute.xlu0 %1638 }
0x233d   :  { %v1641_v56 = vmul.f32 %v7301_v41, %v1639_v46 }
0x233f   :  { %1643 = vrot.lane.b32.xlu1 %v1641_v56, %s7590_s18 }
0x23b1   :  { %v1644_v57 = vpop.permute.xlu1 %1643 }
0x23b2   :  { %1647 = vst.msk [vmem:[#allocation3 + $0x60] sm:$0xff] %vm284_vm3, %v1644_v57  ;;  %6434 = vmatmul.mubr.msk.f32.vlgmr.msra.gmra.mrb[16].mxu1 %vm284_vm3, %v1644_v57 }
0x23b3   :  { %6977 = vmatpush3.bf16.msra.mxu1 %v7666_v4  ;;  %6455 = vmatprep.mubr.msk.f32.mxu1 %vm7587_vm2, %v7588_v8 }
0x23b4   :  { %6978 = vmatprep.subr.bf16.mxu1 %v7586_v0 }
0x23b7   :  { %6980 = vmatpush3.bf16.msra.mxu1 %v7687_v10 }
0x23b8   :  { %6989 = vmatprep.subr.bf16.mxu1 %v7586_v0 }
0x23b9   :  { %v1975_v29 = vld [vmem:[#allocation3 + $0x60] sm:$0xff] }
0x2485   :  { %v1718_v59 = vpop.f32.mrb[16].mxu1 }
0x2486   :  { %v1722_v60 = vadd.f32 %v1718_v59, %v250_v58  ;;  %v6435_v61 = vpop.f32.mrb[17].mxu1 }
0x2488   :  { %7304 = vtanh.f32 %v1722_v60  ;;  %v5851_v4 = vmul.f32 -1.442695, %v1722_v60 }
0x248a   :  { %7306 = vpow2.f32 %v5851_v4 }
0x2492   :  { %v7305_v62 = vpop.eup %7304 }
0x2493   :  { %1732 = vrot.lane.b32.xlu0 %v7305_v62, %s7589_s17 }
0x2494   :  { %v7307_v63 = vpop.eup %7306 }
0x2495   :  { %v1726_v1 = vadd.f32 1.0, %v7307_v63 }
0x2497   :  { %7308 = vrcp.f32 %v1726_v1  ;;  %v2199_v1 = vld [vmem:[%s8644_s5] sm:$0xff] }
0x24a1   :  { %v7309_v2 = vpop.eup %7308 }
0x24a2   :  { %v1730_v5 = vmul.f32 %v7309_v2, %v1635_v51 }
0x2505   :  { %v1733_v3 = vpop.permute.xlu0 %1732 }
0x2506   :  { %v1735_v10 = vmul.f32 %v7309_v2, %v1733_v3 }
0x2508   :  { %1737 = vrot.lane.b32.xlu1 %v1735_v10, %s7590_s18  ;;  %v2201_v10 = vld [vmem:[%s8644_s5 + $0x10] sm:$0xff] }
0x257a   :  { %v1738_v6 = vpop.permute.xlu1 %1737 }
0x257b   :  { %v7970_v12 = vadd.f32 %v1738_v6, %v1730_v5  ;;  %v2202_v5 = vld [vmem:[%s8644_s5 + $0x18] sm:$0xff] }
0x257c   :  { %v8062_v6 = vpack.c.bf16 %v2202_v5, %v2201_v10 }
0x257d   :  { %7310 = vtanh.f32 %v7970_v12 }
0x2587   :  { %v7311_v11 = vpop.eup %7310 }
0x2588   :  { %1743 = vrot.lane.b32.xlu0 %v7311_v11, %s7589_s17  ;;  %v260_v11 = vadd.f32 %v8007_v47, %v7830_v52 }
0x25fa   :  { %v1744_v44 = vpop.permute.xlu0 %1743 }
0x25fb   :  { %v1746_v49 = vmul.f32 %v7309_v2, %v1744_v44  ;;  %v2200_v2 = vld [vmem:[%s8644_s5 + $0x8] sm:$0xff] }
0x25fc   :  { %v8052_v3 = vpack.c.bf16 %v2200_v2, %v2199_v1 }
0x25fd   :  { %1748 = vrot.lane.b32.xlu1 %v1746_v49, %s7590_s18 }
0x266f   :  { %v1749_v16 = vpop.permute.xlu1 %1748 }
0x2670   :  { %1752 = vst.msk [vmem:[#allocation3 + $0x68] sm:$0xff] %vm284_vm3, %v1749_v16  ;;  %6445 = vmatmul.mubr.msk.f32.vlgmr.msra.gmra.mrb[26].mxu0 %vm284_vm3, %v1749_v16 }
0x2671   :  { %6984 = vmatpush3.bf16.msra.mxu0 %v6981_v9  ;;  %6466 = vmatprep.mubr.msk.f32.mxu0 %vm284_vm3, %v1963_v17 }
0x2672   :  { %6986 = vmatprep.subr.bf16.mxu0 %v6985_v15 }
0x2675   :  { %6988 = vmatpush3.bf16.msra.mxu0 %v6985_v15 }
0x2676   :  { %7013 = vmatprep.subr.bf16.mxu0 %v7586_v0 }
0x2677   :  { %v1976_v48 = vld [vmem:[#allocation3 + $0x68] sm:$0xff] }
0x2678   :  { %6467 = vmatmul.mubr.msk.f32.vlgmr.msra.gmra.mrb[28].mxu0 %vm284_vm3, %v1964_v18 }
0x2679   :  { %6469 = vmatprep.mubr.msk.f32.mxu0 %vm284_vm3, %v1965_v19  ;;  %7015 = vmatpush3.bf16.msra.mxu0 %v8052_v3 }
0x267a   :  { %7016 = vmatprep.subr.bf16.mxu0 %v7586_v0 }
0x267c   :  { %6470 = vmatmul.mubr.msk.f32.gmra.mrb[30].mxu0 %vm284_vm3, %v1966_v20 }
0x267d   :  { %6472 = vmatprep.mubr.msk.f32.mxu0 %vm284_vm3, %v1967_v21  ;;  %7018 = vmatpush3.bf16.msra.mxu0 %v8062_v6 }
0x267e   :  { %7025 = vmatprep.subr.bf16.mxu0 %v7586_v0 }
0x2680   :  { %6473 = vmatmul.mubr.msk.f32.gmra.mrb[32].mxu0 %vm284_vm3, %v1968_v22 }
0x2681   :  { %6475 = vmatprep.mubr.msk.f32.mxu0 %vm284_vm3, %v1969_v23 }
0x2684   :  { %6476 = vmatmul.mubr.msk.f32.gmra.mrb[34].mxu0 %vm284_vm3, %v1970_v24 }
0x2685   :  { %6478 = vmatprep.mubr.msk.f32.mxu0 %vm284_vm3, %v1971_v25 }
0x2688   :  { %6479 = vmatmul.mubr.msk.f32.gmra.mrb[36].mxu0 %vm284_vm3, %v1972_v26 }
0x2689   :  { %6481 = vmatprep.mubr.msk.f32.mxu0 %vm284_vm3, %v1973_v27 }
0x268c   :  { %6482 = vmatmul.mubr.msk.f32.gmra.mrb[38].mxu0 %vm284_vm3, %v1974_v28 }
0x268d   :  { %6484 = vmatprep.mubr.msk.f32.mxu0 %vm284_vm3, %v1975_v29 }
0x2690   :  { %6485 = vmatmul.mubr.msk.f32.gmra.mrb[40].mxu0 %vm284_vm3, %v1976_v48 }
0x2743   :  { %v1823_v31 = vpop.f32.mrb[26].mxu0 }
0x2744   :  { %v1827_v32 = vadd.f32 %v1823_v31, %v255_v30  ;;  %v6446_v33 = vpop.f32.mrb[27].mxu0 }
0x2746   :  { %7312 = vtanh.f32 %v1827_v32  ;;  %v5853_v46 = vmul.f32 -1.442695, %v1827_v32 }
0x2748   :  { %7314 = vpow2.f32 %v5853_v46 }
0x274b   :  { %v8011_v34 = vpop.f32.mrb[28].mxu0 }
0x274c   :  { %v8013_v35 = vpop.f32.mrb[29].mxu0  ;;  %v2110_v30 = vadd.f32 %v8011_v34, %v8090_v14 }
0x274d   :  { %v2105_v15 = vadd.f32 %v8090_v14, %v8013_v35 }
0x274f   :  { %v8015_v36 = vpop.f32.mrb[30].mxu0 }
0x2750   :  { %v7313_v37 = vpop.eup %7312  ;;  %v8017_v38 = vpop.f32.mrb[31].mxu0 }
0x2751   :  { %1837 = vrot.lane.b32.xlu0 %v7313_v37, %s7589_s17  ;;  %v2115_v10 = vadd.f32 %v8090_v14, %v8017_v38 }
0x2752   :  { %v7315_v56 = vpop.eup %7314 }
0x2753   :  { %v8020_v39 = vpop.f32.mrb[32].mxu0  ;;  %v1831_v57 = vadd.f32 1.0, %v7315_v56 }
0x2754   :  { %v8022_v40 = vpop.f32.mrb[33].mxu0 }
0x2755   :  { %7316 = vrcp.f32 %v1831_v57 }
0x2757   :  { %v8024_v53 = vpop.f32.mrb[34].mxu0 }
0x2758   :  { %v8026_v41 = vpop.f32.mrb[35].mxu0 }
0x275b   :  { %v8028_v42 = vpop.f32.mrb[36].mxu0 }
0x275c   :  { %v8030_v43 = vpop.f32.mrb[37].mxu0 }
0x275f   :  { %v8032_v54 = vpop.f32.mrb[38].mxu0  ;;  %v7317_v58 = vpop.eup %7316 }
0x2760   :  { %v8034_v45 = vpop.f32.mrb[39].mxu0  ;;  %v1835_v61 = vmul.f32 %v7317_v58, %v7970_v12 }
0x2763   :  { %v8036_v51 = vpop.f32.mrb[40].mxu0 }
0x2764   :  { %v8038_v55 = vpop.f32.mrb[41].mxu0 }
0x27c3   :  { %v1838_v59 = vpop.permute.xlu0 %1837 }
0x27c4   :  { %v1840_v60 = vmul.f32 %v7317_v58, %v1838_v59 }
0x27c6   :  { %1842 = vrot.lane.b32.xlu1 %v1840_v60, %s7590_s18 }
0x2838   :  { %v1843_v62 = vpop.permute.xlu1 %1842 }
0x2839   :  { %v8042_v4 = vadd.f32 %v1843_v62, %v1835_v61 }
0x283b   :  { %7318 = vtanh.f32 %v8042_v4 }
0x2845   :  { %v7319_v63 = vpop.eup %7318 }
0x2846   :  { %1848 = vrot.lane.b32.xlu0 %v7319_v63, %s7589_s17 }
0x28b8   :  { %v1849_v12 = vpop.permute.xlu0 %1848 }
0x28b9   :  { %v1851_v50 = vmul.f32 %v7317_v58, %v1849_v12 }
0x28bb   :  { %1853 = vrot.lane.b32.xlu1 %v1851_v50, %s7590_s18 }
0x292d   :  { %v1854_v7 = vpop.permute.xlu1 %1853 }
0x292e   :  { %1857 = vst.msk [vmem:[#allocation3 + $0x70] sm:$0xff] %vm284_vm3, %v1854_v7  ;;  %6456 = vmatmul.mubr.msk.f32.vlgmr.msra.gmra.mrb[18].mxu1 %vm284_vm3, %v1854_v7 }
0x292f   :  { %6991 = vmatpush3.bf16.msra.mxu1 %v8052_v3  ;;  %6498 = vmatprep.mubr.msk.f32.mxu1 %vm7587_vm2, %v7588_v8 }
0x2930   :  { %6992 = vmatprep.subr.bf16.mxu1 %v7586_v0 }
0x2933   :  { %6994 = vmatpush3.bf16.msra.mxu1 %v8062_v6 }
0x2934   :  { %6995 = vmatprep.subr.bf16.mxu1 %v7586_v0 }
0x2935   :  { %v1977_v9 = vld [vmem:[#allocation3 + $0x70] sm:$0xff] }
0x2936   :  { %6499 = vmatmul.mubr.f32.vlgmr.msra.gmra.mrb[20].mxu1 %v7588_v8  ;;  %6487 = vmatprep.mubr.msk.f32.mxu0 %vm284_vm3, %v1977_v9 }
0x2937   :  { %6997 = vmatpush3.bf16.msra.mxu1 %v8052_v3  ;;  %6509 = vmatprep.mubr.msk.f32.mxu1 %vm7587_vm2, %v7588_v8 }
0x2938   :  { %6998 = vmatprep.subr.bf16.mxu1 %v7586_v0 }
0x293b   :  { %7000 = vmatpush3.bf16.msra.mxu1 %v8062_v6 }
0x293c   :  { %7001 = vmatprep.subr.bf16.mxu1 %v7586_v0 }
0x2a01   :  { %v1928_v44 = vpop.f32.mrb[18].mxu1 }
0x2a02   :  { %v8085_v49 = vadd.f32 %v1928_v44, %v260_v11  ;;  %v6457_v13 = vpop.f32.mrb[19].mxu1 }
0x2a09   :  { %v2270_v16 = vpop.f32.mrb[20].mxu1 }
0x2a0a   :  { %v2274_v17 = vadd.f32 %v2270_v16, %v2105_v15  ;;  %v6500_v18 = vpop.f32.mrb[21].mxu1 }
0x2a0c   :  { %7320 = vtanh.f32 %v2274_v17  ;;  %v5873_v52 = vmul.f32 -1.442695, %v2274_v17 }
0x2a0e   :  { %7322 = vpow2.f32 %v5873_v52 }
0x2a16   :  { %v7321_v19 = vpop.eup %7320 }
0x2a17   :  { %2284 = vrot.lane.b32.xlu0 %v7321_v19, %s7589_s17 }
0x2a18   :  { %v7323_v20 = vpop.eup %7322 }
0x2a19   :  { %v2278_v21 = vadd.f32 1.0, %v7323_v20  ;;  %v5855_v20 = vmul.f32 -1.442695, %v8085_v49 }
0x2a1b   :  { %7324 = vrcp.f32 %v2278_v21 }
0x2a25   :  { %v7325_v22 = vpop.eup %7324 }
0x2a26   :  { %v2282_v25 = vmul.f32 0.0, %v7325_v22 }
0x2a89   :  { %v2285_v23 = vpop.permute.xlu0 %2284 }
0x2a8a   :  { %v2287_v24 = vmul.f32 %v7325_v22, %v2285_v23 }
0x2a8c   :  { %2289 = vrot.lane.b32.xlu1 %v2287_v24, %s7590_s18 }
0x2afe   :  { %v2290_v26 = vpop.permute.xlu1 %2289 }
0x2aff   :  { %v2292_v27 = vadd.f32 %v2290_v26, %v2282_v25 }
0x2b01   :  { %7326 = vtanh.f32 %v2292_v27 }
0x2b0b   :  { %v7327_v28 = vpop.eup %7326 }
0x2b0c   :  { %2295 = vrot.lane.b32.xlu0 %v7327_v28, %s7589_s17 }
0x2b7e   :  { %v2296_v29 = vpop.permute.xlu0 %2295 }
0x2b7f   :  { %v2298_v48 = vmul.f32 %v7325_v22, %v2296_v29 }
0x2b81   :  { %2300 = vrot.lane.b32.xlu1 %v2298_v48, %s7590_s18 }
0x2bf3   :  { %v2301_v47 = vpop.permute.xlu1 %2300 }
0x2bf4   :  { %2303 = vst.msk [vmem:[#allocation4] sm:$0xff] %vm284_vm3, %v2301_v47  ;;  %6510 = vmatmul.mubr.msk.f32.vlgmr.msra.gmra.mrb[22].mxu1 %vm284_vm3, %v2301_v47 }
0x2bf5   :  { %7003 = vmatpush3.bf16.msra.mxu1 %v8052_v3  ;;  %6520 = vmatprep.mubr.msk.f32.mxu1 %vm7587_vm2, %v7588_v8 }
0x2bf6   :  { %7004 = vmatprep.subr.bf16.mxu1 %v7586_v0 }
0x2bf9   :  { %7006 = vmatpush3.bf16.msra.mxu1 %v8062_v6 }
0x2bfa   :  { %7007 = vmatprep.subr.bf16.mxu1 %v7586_v0 }
0x2cc7   :  { %v2373_v31 = vpop.f32.mrb[22].mxu1 }
0x2cc8   :  { %v2377_v32 = vadd.f32 %v2373_v31, %v2110_v30  ;;  %v6511_v33 = vpop.f32.mrb[23].mxu1 }
0x2cca   :  { %7328 = vtanh.f32 %v2377_v32  ;;  %v5875_v37 = vmul.f32 -1.442695, %v2377_v32  ;;  %v2120_v32 = vadd.f32 %v8015_v36, %v8090_v14 }
0x2ccc   :  { %7330 = vpow2.f32 %v5875_v37 }
0x2cd4   :  { %v7329_v35 = vpop.eup %7328 }
0x2cd5   :  { %2387 = vrot.lane.b32.xlu0 %v7329_v35, %s7589_s17 }
0x2cd6   :  { %v7331_v46 = vpop.eup %7330 }
0x2cd7   :  { %v2381_v56 = vadd.f32 1.0, %v7331_v46 }
0x2cd9   :  { %7332 = vrcp.f32 %v2381_v56 }
0x2ce3   :  { %v7333_v57 = vpop.eup %7332 }
0x2ce4   :  { %v2385_v60 = vmul.f32 %v7333_v57, %v2292_v27 }
0x2d47   :  { %v2388_v58 = vpop.permute.xlu0 %2387 }
0x2d48   :  { %v2390_v59 = vmul.f32 %v7333_v57, %v2388_v58 }
0x2d4a   :  { %2392 = vrot.lane.b32.xlu1 %v2390_v59, %s7590_s18 }
0x2dbc   :  { %v2393_v61 = vpop.permute.xlu1 %2392 }
0x2dbd   :  { %v2395_v34 = vadd.f32 %v2393_v61, %v2385_v60 }
0x2dbf   :  { %7334 = vtanh.f32 %v2395_v34 }
0x2dc9   :  { %v7335_v62 = vpop.eup %7334 }
0x2dca   :  { %2398 = vrot.lane.b32.xlu0 %v7335_v62, %s7589_s17 }
0x2e3c   :  { %v2399_v63 = vpop.permute.xlu0 %2398 }
0x2e3d   :  { %v2401_v1 = vmul.f32 %v7333_v57, %v2399_v63 }
0x2e3f   :  { %2403 = vrot.lane.b32.xlu1 %v2401_v1, %s7590_s18 }
0x2eb1   :  { %v2404_v2 = vpop.permute.xlu1 %2403 }
0x2eb2   :  { %2407 = vst.msk [vmem:[#allocation4 + $0x8] sm:$0xff] %vm284_vm3, %v2404_v2  ;;  %6521 = vmatmul.mubr.msk.f32.vlgmr.msra.gmra.mrb[24].mxu1 %vm284_vm3, %v2404_v2 }
0x2eb3   :  { %7009 = vmatpush3.bf16.msra.mxu1 %v8052_v3  ;;  %6531 = vmatprep.mubr.msk.f32.mxu1 %vm7587_vm2, %v7588_v8 }
0x2eb4   :  { %7010 = vmatprep.subr.bf16.mxu1 %v7586_v0 }
0x2eb7   :  { %7012 = vmatpush3.bf16.msra.mxu1 %v8062_v6 }
0x2eb8   :  { %7019 = vmatprep.subr.bf16.mxu1 %v7586_v0 }
0x2f85   :  { %v2477_v5 = vpop.f32.mrb[24].mxu1 }
0x2f86   :  { %v2481_v12 = vadd.f32 %v2477_v5, %v2115_v10  ;;  %v6522_v50 = vpop.f32.mrb[25].mxu1 }
0x2f88   :  { %7336 = vtanh.f32 %v2481_v12  ;;  %v5877_v9 = vmul.f32 -1.442695, %v2481_v12 }
0x2f8a   :  { %7338 = vpow2.f32 %v5877_v9 }
0x2f92   :  { %v7337_v7 = vpop.eup %7336 }
0x2f93   :  { %2491 = vrot.lane.b32.xlu0 %v7337_v7, %s7589_s17  ;;  %v2125_v7 = vadd.f32 %v8090_v14, %v8022_v40 }
0x2f94   :  { %v7339_v11 = vpop.eup %7338 }
0x2f95   :  { %v2485_v44 = vadd.f32 1.0, %v7339_v11 }
0x2f97   :  { %7340 = vrcp.f32 %v2485_v44 }
0x2fa1   :  { %v7341_v13 = vpop.eup %7340 }
0x2fa2   :  { %v2489_v17 = vmul.f32 %v7341_v13, %v2395_v34 }
0x3005   :  { %v2492_v15 = vpop.permute.xlu0 %2491 }
0x3006   :  { %v2494_v16 = vmul.f32 %v7341_v13, %v2492_v15 }
0x3008   :  { %2496 = vrot.lane.b32.xlu1 %v2494_v16, %s7590_s18 }
0x307a   :  { %v2497_v18 = vpop.permute.xlu1 %2496 }
0x307b   :  { %v2499_v38 = vadd.f32 %v2497_v18, %v2489_v17 }
0x307d   :  { %7342 = vtanh.f32 %v2499_v38 }
0x307e   :  { %7344 = vtanh.f32 %v8085_v49 }
0x307f   :  { %7346 = vpow2.f32 %v5855_v20 }
0x3087   :  { %v7343_v19 = vpop.eup %7342 }
0x3088   :  { %2502 = vrot.lane.b32.xlu0 %v7343_v19, %s7589_s17  ;;  %v7345_v52 = vpop.eup %7344 }
0x3089   :  { %v7347_v21 = vpop.eup %7346 }
0x308a   :  { %v1936_v22 = vadd.f32 1.0, %v7347_v21 }
0x308c   :  { %1942 = vrot.lane.b32.xlu0 %v7345_v52, %s7589_s17  ;;  %7348 = vrcp.f32 %v1936_v22 }
0x3096   :  { %v7349_v25 = vpop.eup %7348 }
0x3097   :  { %v1940_v49 = vmul.f32 %v7349_v25, %v8042_v4 }
0x30fa   :  { %v2503_v23 = vpop.permute.xlu0 %2502 }
0x30fb   :  { %v2505_v24 = vmul.f32 %v7341_v13, %v2503_v23 }
0x30fd   :  { %2507 = vrot.lane.b32.xlu1 %v2505_v24, %s7590_s18 }
0x30fe   :  { %v1943_v26 = vpop.permute.xlu0 %1942 }
0x30ff   :  { %v1945_v27 = vmul.f32 %v7349_v25, %v1943_v26 }
0x3101   :  { %1947 = vrot.lane.b32.xlu0 %v1945_v27, %s7590_s18 }
0x316f   :  { %v2508_v28 = vpop.permute.xlu1 %2507 }
0x3170   :  { %2511 = vst.msk [vmem:[#allocation4 + $0x10] sm:$0xff] %vm284_vm3, %v2508_v28  ;;  %6532 = vmatmul.mubr.msk.f32.vlgmr.msra.gmra.mrb[26].mxu1 %vm284_vm3, %v2508_v28 }
0x3171   :  { %7021 = vmatpush3.bf16.msra.mxu1 %v8052_v3  ;;  %6553 = vmatprep.mubr.msk.f32.mxu1 %vm7587_vm2, %v7588_v8 }
0x3172   :  { %7022 = vmatprep.subr.bf16.mxu1 %v7586_v0 }
0x3173   :  { %v1948_v29 = vpop.permute.xlu0 %1947 }
0x3174   :  { %v1950_v48 = vadd.f32 %v1948_v29, %v1940_v49 }
0x3175   :  { %7024 = vmatpush3.bf16.msra.mxu1 %v8062_v6 }
0x3176   :  { %7350 = vtanh.f32 %v1950_v48  ;;  %7031 = vmatprep.subr.bf16.mxu1 %v7586_v0 }
0x3180   :  { %v7351_v47 = vpop.eup %7350 }
0x3181   :  { %1953 = vrot.lane.b32.xlu0 %v7351_v47, %s7589_s17 }
0x31f3   :  { %v1954_v30 = vpop.permute.xlu0 %1953 }
0x31f4   :  { %v1956_v31 = vmul.f32 %v7349_v25, %v1954_v30  ;;  %v2130_v25 = vadd.f32 %v8020_v39, %v8090_v14 }
0x31f6   :  { %1958 = vrot.lane.b32.xlu0 %v1956_v31, %s7590_s18 }
0x3243   :  { %v2581_v4 = vpop.f32.mrb[26].mxu1 }
0x3244   :  { %v2585_v33 = vadd.f32 %v2581_v4, %v2120_v32  ;;  %v6533_v35 = vpop.f32.mrb[27].mxu1 }
0x3246   :  { %7352 = vtanh.f32 %v2585_v33  ;;  %v5879_v57 = vmul.f32 -1.442695, %v2585_v33 }
0x3248   :  { %7354 = vpow2.f32 %v5879_v57  ;;  %v2135_v57 = vadd.f32 %v8090_v14, %v8026_v41 }
0x3250   :  { %v7353_v37 = vpop.eup %7352 }
0x3251   :  { %2595 = vrot.lane.b32.xlu1 %v7353_v37, %s7589_s17 }
0x3252   :  { %v7355_v58 = vpop.eup %7354 }
0x3253   :  { %v2589_v36 = vadd.f32 1.0, %v7355_v58 }
0x3255   :  { %7356 = vrcp.f32 %v2589_v36 }
0x325f   :  { %v7357_v59 = vpop.eup %7356 }
0x3260   :  { %v2593_v34 = vmul.f32 %v7357_v59, %v2499_v38 }
0x3268   :  { %v1959_v46 = vpop.permute.xlu0 %1958 }
0x3269   :  { %1962 = vst.msk [vmem:[#allocation3 + $0x78] sm:$0xff] %vm284_vm3, %v1959_v46 }
0x3270   :  { %v1978_v56 = vld [vmem:[#allocation3 + $0x78] sm:$0xff] }
0x3271   :  { %6488 = vmatmul.mubr.msk.f32.gmra.mrb[42].mxu0 %vm284_vm3, %v1978_v56 }
0x3272   :  { %6542 = vmatprep.mubr.msk.f32.mxu0 %vm7587_vm2, %v7588_v8 }
0x32c3   :  { %v2596_v60 = vpop.permute.xlu1 %2595 }
0x32c4   :  { %v2598_v61 = vmul.f32 %v7357_v59, %v2596_v60 }
0x32c6   :  { %2600 = vrot.lane.b32.xlu1 %v2598_v61, %s7590_s18 }
0x3338   :  { %v2601_v62 = vpop.permute.xlu1 %2600 }
0x3339   :  { %v2603_v63 = vadd.f32 %v2601_v62, %v2593_v34 }
0x333b   :  { %7358 = vtanh.f32 %v2603_v63 }
0x3344   :  { %v8149_v1 = vpop.f32.mrb[42].mxu0 }
0x3345   :  { %v7359_v2 = vpop.eup %7358  ;;  %v8151_v10 = vpop.f32.mrb[43].mxu0 }
0x3346   :  { %2606 = vrot.lane.b32.xlu1 %v7359_v2, %s7589_s17 }
0x33b8   :  { %v2607_v5 = vpop.permute.xlu1 %2606 }
0x33b9   :  { %v2609_v12 = vmul.f32 %v7357_v59, %v2607_v5 }
0x33bb   :  { %2611 = vrot.lane.b32.xlu1 %v2609_v12, %s7590_s18 }
0x342d   :  { %v2612_v50 = vpop.permute.xlu1 %2611 }
0x342e   :  { %2615 = vst.msk [vmem:[#allocation4 + $0x18] sm:$0xff] %vm284_vm3, %v2612_v50  ;;  %6543 = vmatmul.mubr.msk.f32.vlgmr.msra.gmra.mrb[44].mxu0 %vm284_vm3, %v2612_v50 }
0x342f   :  { %7027 = vmatpush3.bf16.msra.mxu0 %v8052_v3  ;;  %6564 = vmatprep.mubr.msk.f32.mxu0 %vm7587_vm2, %v7588_v8 }
0x3430   :  { %7028 = vmatprep.subr.bf16.mxu0 %v7586_v0 }
0x3433   :  { %7030 = vmatpush3.bf16.msra.mxu0 %v8062_v6 }
0x3434   :  { %7037 = vmatprep.subr.bf16.mxu0 %v7586_v0 }
0x3501   :  { %v2685_v9 = vpop.f32.mrb[44].mxu0 }
0x3502   :  { %v2689_v11 = vadd.f32 %v2685_v9, %v2125_v7  ;;  %v6544_v44 = vpop.f32.mrb[45].mxu0 }
0x3504   :  { %7360 = vtanh.f32 %v2689_v11  ;;  %v5881_v15 = vmul.f32 -1.442695, %v2689_v11 }
0x3506   :  { %7362 = vpow2.f32 %v5881_v15 }
0x350e   :  { %v7361_v13 = vpop.eup %7360 }
0x350f   :  { %2699 = vrot.lane.b32.xlu0 %v7361_v13, %s7589_s17  ;;  %v2140_v13 = vadd.f32 %v8024_v53, %v8090_v14 }
0x3510   :  { %v7363_v16 = vpop.eup %7362 }
0x3511   :  { %v2693_v17 = vadd.f32 1.0, %v7363_v16 }
0x3513   :  { %7364 = vrcp.f32 %v2693_v17 }
0x351d   :  { %v7365_v18 = vpop.eup %7364 }
0x351e   :  { %v2697_v52 = vmul.f32 %v7365_v18, %v2603_v63 }
0x3581   :  { %v2700_v38 = vpop.permute.xlu0 %2699 }
0x3582   :  { %v2702_v19 = vmul.f32 %v7365_v18, %v2700_v38 }
0x3584   :  { %2704 = vrot.lane.b32.xlu1 %v2702_v19, %s7590_s18 }
0x35f6   :  { %v2705_v20 = vpop.permute.xlu1 %2704 }
0x35f7   :  { %v2707_v40 = vadd.f32 %v2705_v20, %v2697_v52 }
0x35f9   :  { %7366 = vtanh.f32 %v2707_v40 }
0x3603   :  { %v7367_v21 = vpop.eup %7366 }
0x3604   :  { %2710 = vrot.lane.b32.xlu0 %v7367_v21, %s7589_s17 }
0x3676   :  { %v2711_v22 = vpop.permute.xlu0 %2710 }
0x3677   :  { %v2713_v23 = vmul.f32 %v7365_v18, %v2711_v22 }
0x3679   :  { %2715 = vrot.lane.b32.xlu1 %v2713_v23, %s7590_s18 }
0x36eb   :  { %v2716_v24 = vpop.permute.xlu1 %2715 }
0x36ec   :  { %2719 = vst.msk [vmem:[#allocation4 + $0x20] sm:$0xff] %vm284_vm3, %v2716_v24  ;;  %6554 = vmatmul.mubr.msk.f32.vlgmr.msra.gmra.mrb[28].mxu1 %vm284_vm3, %v2716_v24 }
0x36ed   :  { %7033 = vmatpush3.bf16.msra.mxu1 %v8052_v3  ;;  %6575 = vmatprep.mubr.msk.f32.mxu1 %vm7587_vm2, %v7588_v8 }
0x36ee   :  { %7034 = vmatprep.subr.bf16.mxu1 %v7586_v0 }
0x36f1   :  { %7036 = vmatpush3.bf16.msra.mxu1 %v8062_v6 }
0x36f2   :  { %7043 = vmatprep.subr.bf16.mxu1 %v7586_v0 }
0x37bf   :  { %v2789_v26 = vpop.f32.mrb[28].mxu1 }
0x37c0   :  { %v2793_v27 = vadd.f32 %v2789_v26, %v2130_v25  ;;  %v6555_v28 = vpop.f32.mrb[29].mxu1 }
0x37c1   :  { %v2145_v28 = vadd.f32 %v8090_v14, %v8030_v43 }
0x37c2   :  { %7368 = vtanh.f32 %v2793_v27  ;;  %v5883_v29 = vmul.f32 -1.442695, %v2793_v27 }
0x37c4   :  { %7370 = vpow2.f32 %v5883_v29 }
0x37cc   :  { %v7369_v49 = vpop.eup %7368 }
0x37cd   :  { %2803 = vrot.lane.b32.xlu0 %v7369_v49, %s7589_s17 }
0x37ce   :  { %v7371_v48 = vpop.eup %7370 }
0x37cf   :  { %v2797_v47 = vadd.f32 1.0, %v7371_v48 }
0x37d1   :  { %7372 = vrcp.f32 %v2797_v47 }
0x37db   :  { %v7373_v30 = vpop.eup %7372 }
0x37dc   :  { %v2801_v4 = vmul.f32 %v7373_v30, %v2707_v40 }
0x383f   :  { %v2804_v31 = vpop.permute.xlu0 %2803 }
0x3840   :  { %v2806_v32 = vmul.f32 %v7373_v30, %v2804_v31 }
0x3842   :  { %2808 = vrot.lane.b32.xlu1 %v2806_v32, %s7590_s18 }
0x38b4   :  { %v2809_v33 = vpop.permute.xlu1 %2808 }
0x38b5   :  { %v2811_v39 = vadd.f32 %v2809_v33, %v2801_v4 }
0x38b7   :  { %7374 = vtanh.f32 %v2811_v39 }
0x38c1   :  { %v7375_v35 = vpop.eup %7374 }
0x38c2   :  { %2814 = vrot.lane.b32.xlu0 %v7375_v35, %s7589_s17 }
0x3934   :  { %v2815_v37 = vpop.permute.xlu0 %2814 }
0x3935   :  { %v2817_v46 = vmul.f32 %v7373_v30, %v2815_v37 }
0x3937   :  { %2819 = vrot.lane.b32.xlu1 %v2817_v46, %s7590_s18 }
0x39a9   :  { %v2820_v56 = vpop.permute.xlu1 %2819 }
0x39aa   :  { %2823 = vst.msk [vmem:[#allocation4 + $0x28] sm:$0xff] %vm284_vm3, %v2820_v56  ;;  %6565 = vmatmul.mubr.msk.f32.vlgmr.msra.gmra.mrb[46].mxu0 %vm284_vm3, %v2820_v56 }
0x39ab   :  { %7039 = vmatpush3.bf16.msra.mxu0 %v8052_v3  ;;  %6586 = vmatprep.mubr.msk.f32.mxu0 %vm7587_vm2, %v7588_v8 }
0x39ac   :  { %7040 = vmatprep.subr.bf16.mxu0 %v7586_v0 }
0x39af   :  { %7042 = vmatpush3.bf16.msra.mxu0 %v8062_v6 }
0x39b0   :  { %7049 = vmatprep.subr.bf16.mxu0 %v7586_v0 }
0x3a7d   :  { %v2893_v58 = vpop.f32.mrb[46].mxu0 }
0x3a7e   :  { %v2897_v36 = vadd.f32 %v2893_v58, %v2135_v57  ;;  %v6566_v59 = vpop.f32.mrb[47].mxu0 }
0x3a80   :  { %7376 = vtanh.f32 %v2897_v36  ;;  %v5885_v61 = vmul.f32 -1.442695, %v2897_v36  ;;  %v2150_v36 = vadd.f32 %v8028_v42, %v8090_v14 }
0x3a82   :  { %7378 = vpow2.f32 %v5885_v61 }
0x3a8a   :  { %v7377_v60 = vpop.eup %7376 }
0x3a8b   :  { %2907 = vrot.lane.b32.xlu0 %v7377_v60, %s7589_s17 }
0x3a8c   :  { %v7379_v34 = vpop.eup %7378 }
0x3a8d   :  { %v2901_v62 = vadd.f32 1.0, %v7379_v34 }
0x3a8f   :  { %7380 = vrcp.f32 %v2901_v62 }
0x3a99   :  { %v7381_v63 = vpop.eup %7380 }
0x3a9a   :  { %v2905_v12 = vmul.f32 %v7381_v63, %v2811_v39 }
0x3afd   :  { %v2908_v2 = vpop.permute.xlu0 %2907 }
0x3afe   :  { %v2910_v5 = vmul.f32 %v7381_v63, %v2908_v2 }
0x3b00   :  { %2912 = vrot.lane.b32.xlu1 %v2910_v5, %s7590_s18 }
0x3b72   :  { %v2913_v50 = vpop.permute.xlu1 %2912 }
0x3b73   :  { %v2915_v41 = vadd.f32 %v2913_v50, %v2905_v12 }
0x3b75   :  { %7382 = vtanh.f32 %v2915_v41 }
0x3b7f   :  { %v7383_v7 = vpop.eup %7382 }
0x3b80   :  { %2918 = vrot.lane.b32.xlu0 %v7383_v7, %s7589_s17 }
0x3bf2   :  { %v2919_v9 = vpop.permute.xlu0 %2918 }
0x3bf3   :  { %v2921_v11 = vmul.f32 %v7381_v63, %v2919_v9 }
0x3bf5   :  { %2923 = vrot.lane.b32.xlu1 %v2921_v11, %s7590_s18 }
0x3c67   :  { %v2924_v44 = vpop.permute.xlu1 %2923 }
0x3c68   :  { %2927 = vst.msk [vmem:[#allocation4 + $0x30] sm:$0xff] %vm284_vm3, %v2924_v44  ;;  %6576 = vmatmul.mubr.msk.f32.vlgmr.msra.gmra.mrb[30].mxu1 %vm284_vm3, %v2924_v44 }
0x3c69   :  { %7045 = vmatpush3.bf16.msra.mxu1 %v8052_v3  ;;  %6597 = vmatprep.mubr.msk.f32.mxu1 %vm7587_vm2, %v7588_v8 }
0x3c6a   :  { %7046 = vmatprep.subr.bf16.mxu1 %v7586_v0 }
0x3c6d   :  { %7048 = vmatpush3.bf16.msra.mxu1 %v8062_v6 }
0x3c6e   :  { %7055 = vmatprep.subr.bf16.mxu1 %v7586_v0 }
0x3d3b   :  { %v2997_v15 = vpop.f32.mrb[30].mxu1 }
0x3d3c   :  { %v3001_v16 = vadd.f32 %v2997_v15, %v2140_v13  ;;  %v6577_v17 = vpop.f32.mrb[31].mxu1  ;;  %v2155_v15 = vadd.f32 %v8090_v14, %v8034_v45 }
0x3d3e   :  { %7384 = vtanh.f32 %v3001_v16  ;;  %v5887_v38 = vmul.f32 -1.442695, %v3001_v16 }
0x3d40   :  { %7386 = vpow2.f32 %v5887_v38 }
0x3d48   :  { %v7385_v18 = vpop.eup %7384 }
0x3d49   :  { %3011 = vrot.lane.b32.xlu0 %v7385_v18, %s7589_s17 }
0x3d4a   :  { %v7387_v19 = vpop.eup %7386 }
0x3d4b   :  { %v3005_v52 = vadd.f32 1.0, %v7387_v19 }
0x3d4d   :  { %7388 = vrcp.f32 %v3005_v52 }
0x3d57   :  { %v7389_v20 = vpop.eup %7388 }
0x3d58   :  { %v3009_v22 = vmul.f32 %v7389_v20, %v2915_v41 }
0x3dbb   :  { %v3012_v40 = vpop.permute.xlu0 %3011 }
0x3dbc   :  { %v3014_v21 = vmul.f32 %v7389_v20, %v3012_v40 }
0x3dbe   :  { %3016 = vrot.lane.b32.xlu1 %v3014_v21, %s7590_s18 }
0x3e30   :  { %v3017_v23 = vpop.permute.xlu1 %3016 }
0x3e31   :  { %v3019_v53 = vadd.f32 %v3017_v23, %v3009_v22 }
0x3e33   :  { %7390 = vtanh.f32 %v3019_v53 }
0x3e3d   :  { %v7391_v24 = vpop.eup %7390 }
0x3e3e   :  { %3022 = vrot.lane.b32.xlu0 %v7391_v24, %s7589_s17 }
0x3eb0   :  { %v3023_v25 = vpop.permute.xlu0 %3022 }
0x3eb1   :  { %v3025_v26 = vmul.f32 %v7389_v20, %v3023_v25 }
0x3eb3   :  { %3027 = vrot.lane.b32.xlu1 %v3025_v26, %s7590_s18 }
0x3f25   :  { %v3028_v27 = vpop.permute.xlu1 %3027 }
0x3f26   :  { %3031 = vst.msk [vmem:[#allocation4 + $0x38] sm:$0xff] %vm284_vm3, %v3028_v27  ;;  %6587 = vmatmul.mubr.msk.f32.vlgmr.msra.gmra.mrb[48].mxu0 %vm284_vm3, %v3028_v27 }
0x3f27   :  { %7051 = vmatpush3.bf16.msra.mxu0 %v8052_v3  ;;  %6608 = vmatprep.mubr.msk.f32.mxu0 %vm7587_vm2, %v7588_v8 }
0x3f28   :  { %7052 = vmatprep.subr.bf16.mxu0 %v7586_v0 }
0x3f2b   :  { %7054 = vmatpush3.bf16.msra.mxu0 %v8062_v6 }
0x3f2c   :  { %7061 = vmatprep.subr.bf16.mxu0 %v7586_v0 }
0x3ff9   :  { %v3101_v49 = vpop.f32.mrb[48].mxu0 }
0x3ffa   :  { %v3105_v29 = vadd.f32 %v3101_v49, %v2145_v28  ;;  %v6588_v48 = vpop.f32.mrb[49].mxu0  ;;  %v2160_v28 = vadd.f32 %v8032_v54, %v8090_v14 }
0x3ffc   :  { %7392 = vtanh.f32 %v3105_v29  ;;  %v5889_v30 = vmul.f32 -1.442695, %v3105_v29 }
0x3ffe   :  { %7394 = vpow2.f32 %v5889_v30 }
0x4006   :  { %v7393_v47 = vpop.eup %7392 }
0x4007   :  { %3115 = vrot.lane.b32.xlu0 %v7393_v47, %s7589_s17 }
0x4008   :  { %v7395_v31 = vpop.eup %7394 }
0x4009   :  { %v3109_v32 = vadd.f32 1.0, %v7395_v31 }
0x400b   :  { %7396 = vrcp.f32 %v3109_v32 }
0x4015   :  { %v7397_v4 = vpop.eup %7396 }
0x4016   :  { %v3113_v35 = vmul.f32 %v7397_v4, %v3019_v53 }
0x4079   :  { %v3116_v33 = vpop.permute.xlu0 %3115 }
0x407a   :  { %v3118_v39 = vmul.f32 %v7397_v4, %v3116_v33 }
0x407c   :  { %3120 = vrot.lane.b32.xlu1 %v3118_v39, %s7590_s18 }
0x40ee   :  { %v3121_v37 = vpop.permute.xlu1 %3120 }
0x40ef   :  { %v3123_v43 = vadd.f32 %v3121_v37, %v3113_v35 }
0x40f1   :  { %7398 = vtanh.f32 %v3123_v43 }
0x40fb   :  { %v7399_v46 = vpop.eup %7398 }
0x40fc   :  { %3126 = vrot.lane.b32.xlu0 %v7399_v46, %s7589_s17 }
0x416e   :  { %v3127_v56 = vpop.permute.xlu0 %3126 }
0x416f   :  { %v3129_v57 = vmul.f32 %v7397_v4, %v3127_v56 }
0x4171   :  { %3131 = vrot.lane.b32.xlu1 %v3129_v57, %s7590_s18 }
0x41e3   :  { %v3132_v58 = vpop.permute.xlu1 %3131 }
0x41e4   :  { %3135 = vst.msk [vmem:[#allocation4 + $0x40] sm:$0xff] %vm284_vm3, %v3132_v58  ;;  %6598 = vmatmul.mubr.msk.f32.vlgmr.msra.gmra.mrb[32].mxu1 %vm284_vm3, %v3132_v58  ;;  %v2165_v58 = vadd.f32 %v8090_v14, %v8038_v55 }
0x41e5   :  { %7057 = vmatpush3.bf16.msra.mxu1 %v8052_v3  ;;  %6619 = vmatprep.mubr.msk.f32.mxu1 %vm7587_vm2, %v7588_v8 }
0x41e6   :  { %7058 = vmatprep.subr.bf16.mxu1 %v7586_v0 }
0x41e9   :  { %7060 = vmatpush3.bf16.msra.mxu1 %v8062_v6 }
0x41ea   :  { %7067 = vmatprep.subr.bf16.mxu1 %v7586_v0 }
0x42b7   :  { %v3205_v59 = vpop.f32.mrb[32].mxu1 }
0x42b8   :  { %v3209_v60 = vadd.f32 %v3205_v59, %v2150_v36  ;;  %v6599_v61 = vpop.f32.mrb[33].mxu1 }
0x42ba   :  { %7400 = vtanh.f32 %v3209_v60  ;;  %v5891_v62 = vmul.f32 -1.442695, %v3209_v60 }
0x42bc   :  { %7402 = vpow2.f32 %v5891_v62 }
0x42c4   :  { %v7401_v34 = vpop.eup %7400 }
0x42c5   :  { %3219 = vrot.lane.b32.xlu0 %v7401_v34, %s7589_s17 }
0x42c6   :  { %v7403_v63 = vpop.eup %7402 }
0x42c7   :  { %v3213_v2 = vadd.f32 1.0, %v7403_v63 }
0x42c9   :  { %7404 = vrcp.f32 %v3213_v2 }
0x42d3   :  { %v7405_v5 = vpop.eup %7404 }
0x42d4   :  { %v3217_v41 = vmul.f32 %v7405_v5, %v3123_v43 }
0x4337   :  { %v3220_v12 = vpop.permute.xlu0 %3219 }
0x4338   :  { %v3222_v50 = vmul.f32 %v7405_v5, %v3220_v12 }
0x433a   :  { %3224 = vrot.lane.b32.xlu1 %v3222_v50, %s7590_s18 }
0x43ac   :  { %v3225_v7 = vpop.permute.xlu1 %3224 }
0x43ad   :  { %v3227_v42 = vadd.f32 %v3225_v7, %v3217_v41 }
0x43af   :  { %7406 = vtanh.f32 %v3227_v42 }
0x43b9   :  { %v7407_v9 = vpop.eup %7406 }
0x43ba   :  { %3230 = vrot.lane.b32.xlu0 %v7407_v9, %s7589_s17 }
0x442c   :  { %v3231_v11 = vpop.permute.xlu0 %3230 }
0x442d   :  { %v3233_v44 = vmul.f32 %v7405_v5, %v3231_v11 }
0x442f   :  { %3235 = vrot.lane.b32.xlu1 %v3233_v44, %s7590_s18  ;;  %v2170_v44 = vadd.f32 %v8036_v51, %v8090_v14  ;;  %v3880_v14 = vld [vmem:[%s8646_s7] sm:$0xff] }
0x44a1   :  { %v3236_v13 = vpop.permute.xlu1 %3235 }
0x44a2   :  { %3239 = vst.msk [vmem:[#allocation4 + $0x48] sm:$0xff] %vm284_vm3, %v3236_v13  ;;  %6609 = vmatmul.mubr.msk.f32.vlgmr.msra.gmra.mrb[50].mxu0 %vm284_vm3, %v3236_v13 }
0x44a3   :  { %7063 = vmatpush3.bf16.msra.mxu0 %v8052_v3  ;;  %6630 = vmatprep.mubr.msk.f32.mxu0 %vm7587_vm2, %v7588_v8 }
0x44a4   :  { %7064 = vmatprep.subr.bf16.mxu0 %v7586_v0 }
0x44a7   :  { %7066 = vmatpush3.bf16.msra.mxu0 %v8062_v6 }
0x44a8   :  { %7073 = vmatprep.subr.bf16.mxu0 %v7586_v0 }
0x4575   :  { %v3309_v16 = vpop.f32.mrb[50].mxu0 }
0x4576   :  { %v3313_v17 = vadd.f32 %v3309_v16, %v2155_v15  ;;  %v6610_v18 = vpop.f32.mrb[51].mxu0 }
0x4578   :  { %7408 = vtanh.f32 %v3313_v17  ;;  %v5893_v19 = vmul.f32 -1.442695, %v3313_v17 }
0x457a   :  { %7410 = vpow2.f32 %v5893_v19 }
0x4582   :  { %v7409_v38 = vpop.eup %7408 }
0x4583   :  { %3323 = vrot.lane.b32.xlu0 %v7409_v38, %s7589_s17 }
0x4584   :  { %v7411_v52 = vpop.eup %7410 }
0x4585   :  { %v3317_v20 = vadd.f32 1.0, %v7411_v52 }
0x4587   :  { %7412 = vrcp.f32 %v3317_v20 }
0x4591   :  { %v7413_v40 = vpop.eup %7412 }
0x4592   :  { %v3321_v23 = vmul.f32 %v7413_v40, %v3227_v42 }
0x45f5   :  { %v3324_v21 = vpop.permute.xlu0 %3323 }
0x45f6   :  { %v3326_v22 = vmul.f32 %v7413_v40, %v3324_v21  ;;  %v3881_v21 = vld [vmem:[%s8646_s7 + $0x8] sm:$0xff] }
0x45f8   :  { %3328 = vrot.lane.b32.xlu1 %v3326_v22, %s7590_s18  ;;  %v7085_v22 = vpack.c.bf16 %v3881_v21, %v3880_v14 }
0x466a   :  { %v3329_v53 = vpop.permute.xlu1 %3328 }
0x466b   :  { %v3331_v45 = vadd.f32 %v3329_v53, %v3321_v23 }
0x466d   :  { %7414 = vtanh.f32 %v3331_v45 }
0x4677   :  { %v7415_v24 = vpop.eup %7414 }
0x4678   :  { %3334 = vrot.lane.b32.xlu0 %v7415_v24, %s7589_s17  ;;  %v3882_v24 = vld [vmem:[%s8646_s7 + $0x10] sm:$0xff] }
0x46ea   :  { %v3335_v25 = vpop.permute.xlu0 %3334 }
0x46eb   :  { %v3337_v26 = vmul.f32 %v7413_v40, %v3335_v25  ;;  %v3883_v25 = vld [vmem:[%s8646_s7 + $0x18] sm:$0xff] }
0x46ed   :  { %3339 = vrot.lane.b32.xlu1 %v3337_v26, %s7590_s18  ;;  %v7089_v26 = vpack.c.bf16 %v3883_v25, %v3882_v24  ;;  %v8412_v25 = vld [vmem:[%s8648_s9] ss:$0 sm:$0xff] }
0x475f   :  { %v3340_v27 = vpop.permute.xlu1 %3339 }
0x4760   :  { %3343 = vst.msk [vmem:[#allocation4 + $0x50] sm:$0xff] %vm284_vm3, %v3340_v27  ;;  %6620 = vmatmul.mubr.msk.f32.vlgmr.msra.gmra.mrb[34].mxu1 %vm284_vm3, %v3340_v27 }
0x4761   :  { %7069 = vmatpush3.bf16.msra.mxu1 %v8052_v3  ;;  %6641 = vmatprep.mubr.msk.f32.mxu1 %vm7587_vm2, %v7588_v8 }
0x4762   :  { %7070 = vmatprep.subr.bf16.mxu1 %v7586_v0 }
0x4765   :  { %7072 = vmatpush3.bf16.msra.mxu1 %v8062_v6 }
0x4766   :  { %7079 = vmatprep.subr.bf16.mxu1 %v7586_v0 }
0x4833   :  { %v3413_v49 = vpop.f32.mrb[34].mxu1 }
0x4834   :  { %v3417_v29 = vadd.f32 %v3413_v49, %v2160_v28  ;;  %v6621_v48 = vpop.f32.mrb[35].mxu1  ;;  %v3864_v28 = vld [vmem:[#allocation4] sm:$0xff]  ;;  %v3865_v49 = vld [vmem:[#allocation4 + $0x8] sm:$0xff] }
0x4835   :  { %v3867_v48 = vld [vmem:[#allocation4 + $0x18] sm:$0xff] }
0x4836   :  { %7416 = vtanh.f32 %v3417_v29  ;;  %v5895_v30 = vmul.f32 -1.442695, %v3417_v29  ;;  %v3866_v29 = vld [vmem:[#allocation4 + $0x10] sm:$0xff] }
0x4838   :  { %7418 = vpow2.f32 %v5895_v30  ;;  %v3869_v30 = vld [vmem:[#allocation4 + $0x28] sm:$0xff] }
0x4840   :  { %v7417_v47 = vpop.eup %7416 }
0x4841   :  { %3427 = vrot.lane.b32.xlu0 %v7417_v47, %s7589_s17  ;;  %v3868_v47 = vld [vmem:[#allocation4 + $0x20] sm:$0xff] }
0x4842   :  { %v7419_v31 = vpop.eup %7418 }
0x4843   :  { %v3421_v32 = vadd.f32 1.0, %v7419_v31  ;;  %v3870_v31 = vld [vmem:[#allocation4 + $0x30] sm:$0xff] }
0x4845   :  { %7420 = vrcp.f32 %v3421_v32  ;;  %v3871_v32 = vld [vmem:[#allocation4 + $0x38] sm:$0xff] }
0x484f   :  { %v7421_v4 = vpop.eup %7420 }
0x4850   :  { %v3425_v35 = vmul.f32 %v7421_v4, %v3331_v45 }
0x48b3   :  { %v3428_v33 = vpop.permute.xlu0 %3427 }
0x48b4   :  { %v3430_v39 = vmul.f32 %v7421_v4, %v3428_v33  ;;  %v3873_v33 = vld [vmem:[#allocation4 + $0x48] sm:$0xff] }
0x48b6   :  { %3432 = vrot.lane.b32.xlu1 %v3430_v39, %s7590_s18  ;;  %v3874_v39 = vld [vmem:[#allocation4 + $0x50] sm:$0xff] }
0x4928   :  { %v3433_v37 = vpop.permute.xlu1 %3432 }
0x4929   :  { %v3435_v54 = vadd.f32 %v3433_v37, %v3425_v35 }
0x492b   :  { %7422 = vtanh.f32 %v3435_v54 }
0x4935   :  { %v7423_v43 = vpop.eup %7422 }
0x4936   :  { %3438 = vrot.lane.b32.xlu0 %v7423_v43, %s7589_s17  ;;  %v8329_v43 = vld [vmem:[%s8645_s6] ss:$0 sm:$0xff] }
0x49a8   :  { %v3439_v46 = vpop.permute.xlu0 %3438 }
0x49a9   :  { %v3441_v56 = vmul.f32 %v7421_v4, %v3439_v46  ;;  %v3872_v4 = vld [vmem:[#allocation4 + $0x40] sm:$0xff]  ;;  %v2175_v46 = vadd.f32 %v8329_v43, %v8151_v10 }
0x49ab   :  { %3443 = vrot.lane.b32.xlu1 %v3441_v56, %s7590_s18 }
0x4a1d   :  { %v3444_v57 = vpop.permute.xlu1 %3443 }
0x4a1e   :  { %3447 = vst.msk [vmem:[#allocation4 + $0x58] sm:$0xff] %vm284_vm3, %v3444_v57  ;;  %6631 = vmatmul.mubr.msk.f32.vlgmr.msra.gmra.mrb[52].mxu0 %vm284_vm3, %v3444_v57 }
0x4a1f   :  { %7075 = vmatpush3.bf16.msra.mxu0 %v8052_v3  ;;  %6652 = vmatprep.mubr.msk.f32.mxu0 %vm7587_vm2, %v7588_v8 }
0x4a20   :  { %7076 = vmatprep.subr.bf16.mxu0 %v7586_v0 }
0x4a23   :  { %7078 = vmatpush3.bf16.msra.mxu0 %v8062_v6 }
0x4a24   :  { %7086 = vmatprep.subr.bf16.mxu0 %v7085_v22 }
0x4a25   :  { %v3875_v35 = vld [vmem:[#allocation4 + $0x58] sm:$0xff] }
0x4af1   :  { %v3517_v36 = vpop.f32.mrb[52].mxu0 }
0x4af2   :  { %v3521_v59 = vadd.f32 %v3517_v36, %v2165_v58  ;;  %v6632_v60 = vpop.f32.mrb[53].mxu0 }
0x4af4   :  { %7424 = vtanh.f32 %v3521_v59  ;;  %v5897_v34 = vmul.f32 -1.442695, %v3521_v59 }
0x4af6   :  { %7426 = vpow2.f32 %v5897_v34 }
0x4afe   :  { %v7425_v61 = vpop.eup %7424 }
0x4aff   :  { %3531 = vrot.lane.b32.xlu0 %v7425_v61, %s7589_s17 }
0x4b00   :  { %v7427_v62 = vpop.eup %7426 }
0x4b01   :  { %v3525_v63 = vadd.f32 1.0, %v7427_v62 }
0x4b03   :  { %7428 = vrcp.f32 %v3525_v63 }
0x4b0d   :  { %v7429_v2 = vpop.eup %7428 }
0x4b0e   :  { %v3529_v50 = vmul.f32 %v7429_v2, %v3435_v54 }
0x4b71   :  { %v3532_v5 = vpop.permute.xlu0 %3531 }
0x4b72   :  { %v3534_v12 = vmul.f32 %v7429_v2, %v3532_v5 }
0x4b74   :  { %3536 = vrot.lane.b32.xlu1 %v3534_v12, %s7590_s18 }
0x4be6   :  { %v3537_v41 = vpop.permute.xlu1 %3536 }
0x4be7   :  { %v3539_v55 = vadd.f32 %v3537_v41, %v3529_v50 }
0x4be9   :  { %7430 = vtanh.f32 %v3539_v55 }
0x4bf3   :  { %v7431_v7 = vpop.eup %7430 }
0x4bf4   :  { %3542 = vrot.lane.b32.xlu0 %v7431_v7, %s7589_s17 }
0x4c66   :  { %v3543_v42 = vpop.permute.xlu0 %3542 }
0x4c67   :  { %v3545_v9 = vmul.f32 %v7429_v2, %v3543_v42 }
0x4c69   :  { %3547 = vrot.lane.b32.xlu1 %v3545_v9, %s7590_s18 }
0x4cdb   :  { %v3548_v11 = vpop.permute.xlu1 %3547 }
0x4cdc   :  { %3551 = vst.msk [vmem:[#allocation4 + $0x60] sm:$0xff] %vm284_vm3, %v3548_v11  ;;  %6642 = vmatmul.mubr.msk.f32.vlgmr.msra.gmra.mrb[36].mxu1 %vm284_vm3, %v3548_v11 }
0x4cdd   :  { %7081 = vmatpush3.bf16.msra.mxu1 %v8052_v3  ;;  %6663 = vmatprep.mubr.msk.f32.mxu1 %vm7587_vm2, %v7588_v8 }
0x4cde   :  { %7082 = vmatprep.subr.bf16.mxu1 %v7586_v0 }
0x4ce1   :  { %7084 = vmatpush3.bf16.msra.mxu1 %v8062_v6 }
0x4ce2   :  { %7093 = vmatprep.subr.bf16.mxu1 %v7586_v0 }
0x4ce3   :  { %v3876_v37 = vld [vmem:[#allocation4 + $0x60] sm:$0xff] }
0x4daf   :  { %v3621_v13 = vpop.f32.mrb[36].mxu1 }
0x4db0   :  { %v3625_v15 = vadd.f32 %v3621_v13, %v2170_v44  ;;  %v6643_v16 = vpop.f32.mrb[37].mxu1 }
0x4db2   :  { %7432 = vtanh.f32 %v3625_v15  ;;  %v5899_v3 = vmul.f32 -1.442695, %v3625_v15 }
0x4db4   :  { %7434 = vpow2.f32 %v5899_v3 }
0x4dbc   :  { %v7433_v17 = vpop.eup %7432 }
0x4dbd   :  { %3635 = vrot.lane.b32.xlu0 %v7433_v17, %s7589_s17 }
0x4dbe   :  { %v7435_v18 = vpop.eup %7434 }
0x4dbf   :  { %v3629_v38 = vadd.f32 1.0, %v7435_v18 }
0x4dc1   :  { %7436 = vrcp.f32 %v3629_v38  ;;  %v4100_v38 = vld [vmem:[%s8647_s8] sm:$0xff] }
0x4dcb   :  { %v7437_v19 = vpop.eup %7436 }
0x4dcc   :  { %v3633_v20 = vmul.f32 %v7437_v19, %v3539_v55 }
0x4e2f   :  { %v3636_v52 = vpop.permute.xlu0 %3635 }
0x4e30   :  { %v3638_v6 = vmul.f32 %v7437_v19, %v3636_v52 }
0x4e32   :  { %3640 = vrot.lane.b32.xlu1 %v3638_v6, %s7590_s18  ;;  %v4102_v6 = vld [vmem:[%s8647_s8 + $0x10] sm:$0xff] }
0x4ea4   :  { %v3641_v40 = vpop.permute.xlu1 %3640 }
0x4ea5   :  { %v8292_v51 = vadd.f32 %v3641_v40, %v3633_v20  ;;  %v4103_v20 = vld [vmem:[%s8647_s8 + $0x18] sm:$0xff] }
0x4ea6   :  { %v8384_v40 = vpack.c.bf16 %v4103_v20, %v4102_v6 }
0x4ea7   :  { %7438 = vtanh.f32 %v8292_v51 }
0x4eb1   :  { %v7439_v23 = vpop.eup %7438 }
0x4eb2   :  { %3646 = vrot.lane.b32.xlu0 %v7439_v23, %s7589_s17  ;;  %v2180_v23 = vadd.f32 %v8329_v43, %v8149_v1 }
0x4f24   :  { %v3647_v53 = vpop.permute.xlu0 %3646 }
0x4f25   :  { %v3649_v45 = vmul.f32 %v7437_v19, %v3647_v53  ;;  %v4101_v19 = vld [vmem:[%s8647_s8 + $0x8] sm:$0xff] }
0x4f26   :  { %v8374_v52 = vpack.c.bf16 %v4101_v19, %v4100_v38 }
0x4f27   :  { %3651 = vrot.lane.b32.xlu1 %v3649_v45, %s7590_s18 }
0x4f99   :  { %v3652_v27 = vpop.permute.xlu1 %3651 }
0x4f9a   :  { %3655 = vst.msk [vmem:[#allocation4 + $0x68] sm:$0xff] %vm284_vm3, %v3652_v27  ;;  %6653 = vmatmul.mubr.msk.f32.vlgmr.msra.gmra.mrb[54].mxu0 %vm284_vm3, %v3652_v27 }
0x4f9b   :  { %7088 = vmatpush3.bf16.msra.mxu0 %v7085_v22  ;;  %6674 = vmatprep.mubr.msk.f32.mxu0 %vm284_vm3, %v3864_v28 }
0x4f9c   :  { %7090 = vmatprep.subr.bf16.mxu0 %v7089_v26 }
0x4f9f   :  { %7092 = vmatpush3.bf16.msra.mxu0 %v7089_v26 }
0x4fa0   :  { %7117 = vmatprep.subr.bf16.mxu0 %v7586_v0 }
0x4fa1   :  { %v3877_v54 = vld [vmem:[#allocation4 + $0x68] sm:$0xff] }
0x4fa2   :  { %6675 = vmatmul.mubr.msk.f32.vlgmr.msra.gmra.mrb[56].mxu0 %vm284_vm3, %v3865_v49 }
0x4fa3   :  { %6677 = vmatprep.mubr.msk.f32.mxu0 %vm284_vm3, %v3866_v29  ;;  %7119 = vmatpush3.bf16.msra.mxu0 %v8374_v52 }
0x4fa4   :  { %7120 = vmatprep.subr.bf16.mxu0 %v7586_v0 }
0x4fa6   :  { %6678 = vmatmul.mubr.msk.f32.gmra.mrb[58].mxu0 %vm284_vm3, %v3867_v48 }
0x4fa7   :  { %6680 = vmatprep.mubr.msk.f32.mxu0 %vm284_vm3, %v3868_v47  ;;  %7122 = vmatpush3.bf16.msra.mxu0 %v8384_v40 }
0x4fa8   :  { %7129 = vmatprep.subr.bf16.mxu0 %v7586_v0 }
0x4faa   :  { %6681 = vmatmul.mubr.msk.f32.gmra.mrb[60].mxu0 %vm284_vm3, %v3869_v30 }
0x4fab   :  { %6683 = vmatprep.mubr.msk.f32.mxu0 %vm284_vm3, %v3870_v31 }
0x4fae   :  { %6684 = vmatmul.mubr.msk.f32.gmra.mrb[62].mxu0 %vm284_vm3, %v3871_v32 }
0x4faf   :  { %6686 = vmatprep.mubr.msk.f32.mxu0 %vm284_vm3, %v3872_v4 }
0x4fb2   :  { %6687 = vmatmul.mubr.msk.f32.gmra.mrb[64].mxu0 %vm284_vm3, %v3873_v33 }
0x4fb3   :  { %6689 = vmatprep.mubr.msk.f32.mxu0 %vm284_vm3, %v3874_v39 }
0x4fb6   :  { %6690 = vmatmul.mubr.msk.f32.gmra.mrb[66].mxu0 %vm284_vm3, %v3875_v35 }
0x4fb7   :  { %6692 = vmatprep.mubr.msk.f32.mxu0 %vm284_vm3, %v3876_v37 }
0x4fba   :  { %6693 = vmatmul.mubr.msk.f32.gmra.mrb[68].mxu0 %vm284_vm3, %v3877_v54 }
0x506d   :  { %v3725_v56 = vpop.f32.mrb[54].mxu0 }
0x506e   :  { %v3729_v57 = vadd.f32 %v3725_v56, %v2175_v46  ;;  %v6654_v58 = vpop.f32.mrb[55].mxu0 }
0x5070   :  { %7440 = vtanh.f32 %v3729_v57  ;;  %v5901_v42 = vmul.f32 -1.442695, %v3729_v57 }
0x5072   :  { %7442 = vpow2.f32 %v5901_v42 }
0x5075   :  { %v8333_v36 = vpop.f32.mrb[56].mxu0 }
0x5076   :  { %v8335_v59 = vpop.f32.mrb[57].mxu0  ;;  %v4011_v46 = vadd.f32 %v8333_v36, %v8412_v25 }
0x5077   :  { %v4006_v26 = vadd.f32 %v8412_v25, %v8335_v59 }
0x5079   :  { %v8337_v60 = vpop.f32.mrb[58].mxu0 }
0x507a   :  { %v7441_v61 = vpop.eup %7440  ;;  %v8339_v34 = vpop.f32.mrb[59].mxu0 }
0x507b   :  { %3739 = vrot.lane.b32.xlu0 %v7441_v61, %s7589_s17  ;;  %v4016_v6 = vadd.f32 %v8412_v25, %v8339_v34 }
0x507c   :  { %v7443_v9 = vpop.eup %7442 }
0x507d   :  { %v8342_v62 = vpop.f32.mrb[60].mxu0  ;;  %v3733_v11 = vadd.f32 1.0, %v7443_v9 }
0x507e   :  { %v8344_v63 = vpop.f32.mrb[61].mxu0 }
0x507f   :  { %7444 = vrcp.f32 %v3733_v11 }
0x5081   :  { %v8346_v10 = vpop.f32.mrb[62].mxu0 }
0x5082   :  { %v8348_v2 = vpop.f32.mrb[63].mxu0 }
0x5085   :  { %v8350_v5 = vpop.f32.mrb[64].mxu0 }
0x5086   :  { %v8352_v12 = vpop.f32.mrb[65].mxu0 }
0x5089   :  { %v8354_v50 = vpop.f32.mrb[66].mxu0  ;;  %v7445_v44 = vpop.eup %7444 }
0x508a   :  { %v8356_v41 = vpop.f32.mrb[67].mxu0  ;;  %v3737_v16 = vmul.f32 %v7445_v44, %v8292_v51 }
0x508d   :  { %v8358_v55 = vpop.f32.mrb[68].mxu0 }
0x508e   :  { %v8360_v7 = vpop.f32.mrb[69].mxu0 }
0x50ed   :  { %v3740_v13 = vpop.permute.xlu0 %3739 }
0x50ee   :  { %v3742_v15 = vmul.f32 %v7445_v44, %v3740_v13 }
0x50f0   :  { %3744 = vrot.lane.b32.xlu1 %v3742_v15, %s7590_s18 }
0x5162   :  { %v3745_v17 = vpop.permute.xlu1 %3744 }
0x5163   :  { %v8364_v3 = vadd.f32 %v3745_v17, %v3737_v16 }
0x5165   :  { %7446 = vtanh.f32 %v8364_v3 }
0x516f   :  { %v7447_v18 = vpop.eup %7446 }
0x5170   :  { %3750 = vrot.lane.b32.xlu0 %v7447_v18, %s7589_s17 }
0x51e2   :  { %v3751_v51 = vpop.permute.xlu0 %3750 }
0x51e3   :  { %v3753_v14 = vmul.f32 %v7445_v44, %v3751_v51 }
0x51e5   :  { %3755 = vrot.lane.b32.xlu1 %v3753_v14, %s7590_s18 }
0x5257   :  { %v3756_v21 = vpop.permute.xlu1 %3755 }
0x5258   :  { %3759 = vst.msk [vmem:[#allocation4 + $0x70] sm:$0xff] %vm284_vm3, %v3756_v21  ;;  %6664 = vmatmul.mubr.msk.f32.vlgmr.msra.gmra.mrb[38].mxu1 %vm284_vm3, %v3756_v21 }
0x5259   :  { %7095 = vmatpush3.bf16.msra.mxu1 %v8374_v52  ;;  %6706 = vmatprep.mubr.msk.f32.mxu1 %vm7587_vm2, %v7588_v8 }
0x525a   :  { %7096 = vmatprep.subr.bf16.mxu1 %v7586_v0 }
0x525d   :  { %7098 = vmatpush3.bf16.msra.mxu1 %v8384_v40 }
0x525e   :  { %7099 = vmatprep.subr.bf16.mxu1 %v7586_v0 }
0x525f   :  { %v3878_v22 = vld [vmem:[#allocation4 + $0x70] sm:$0xff] }
0x5260   :  { %6707 = vmatmul.mubr.f32.vlgmr.msra.gmra.mrb[40].mxu1 %v7588_v8  ;;  %6695 = vmatprep.mubr.msk.f32.mxu0 %vm284_vm3, %v3878_v22 }
0x5261   :  { %7101 = vmatpush3.bf16.msra.mxu1 %v8374_v52  ;;  %6717 = vmatprep.mubr.msk.f32.mxu1 %vm7587_vm2, %v7588_v8 }
0x5262   :  { %7102 = vmatprep.subr.bf16.mxu1 %v7586_v0 }
0x5265   :  { %7104 = vmatpush3.bf16.msra.mxu1 %v8384_v40 }
0x5266   :  { %7105 = vmatprep.subr.bf16.mxu1 %v7586_v0 }
0x532b   :  { %v3829_v53 = vpop.f32.mrb[38].mxu1 }
0x532c   :  { %v8407_v45 = vadd.f32 %v3829_v53, %v2180_v23  ;;  %v6665_v24 = vpop.f32.mrb[39].mxu1 }
0x5333   :  { %v4171_v27 = vpop.f32.mrb[40].mxu1 }
0x5334   :  { %v4175_v28 = vadd.f32 %v4171_v27, %v4006_v26  ;;  %v6708_v49 = vpop.f32.mrb[41].mxu1 }
0x5336   :  { %7448 = vtanh.f32 %v4175_v28  ;;  %v5921_v1 = vmul.f32 -1.442695, %v4175_v28 }
0x5338   :  { %7450 = vpow2.f32 %v5921_v1 }
0x5340   :  { %v7449_v29 = vpop.eup %7448 }
0x5341   :  { %4185 = vrot.lane.b32.xlu0 %v7449_v29, %s7589_s17 }
0x5342   :  { %v7451_v48 = vpop.eup %7450 }
0x5343   :  { %v4179_v47 = vadd.f32 1.0, %v7451_v48  ;;  %v5903_v48 = vmul.f32 -1.442695, %v8407_v45 }
0x5345   :  { %7452 = vrcp.f32 %v4179_v47 }
0x534f   :  { %v7453_v30 = vpop.eup %7452 }
0x5350   :  { %v4183_v4 = vmul.f32 0.0, %v7453_v30 }
0x53b3   :  { %v4186_v31 = vpop.permute.xlu0 %4185 }
0x53b4   :  { %v4188_v32 = vmul.f32 %v7453_v30, %v4186_v31 }
0x53b6   :  { %4190 = vrot.lane.b32.xlu1 %v4188_v32, %s7590_s18 }
0x5428   :  { %v4191_v33 = vpop.permute.xlu1 %4190 }
0x5429   :  { %v4193_v39 = vadd.f32 %v4191_v33, %v4183_v4 }
0x542b   :  { %7454 = vtanh.f32 %v4193_v39 }
0x5435   :  { %v7455_v35 = vpop.eup %7454 }
0x5436   :  { %4196 = vrot.lane.b32.xlu0 %v7455_v35, %s7589_s17 }
0x54a8   :  { %v4197_v37 = vpop.permute.xlu0 %4196 }
0x54a9   :  { %v4199_v54 = vmul.f32 %v7453_v30, %v4197_v37 }
0x54ab   :  { %4202 = vrot.lane.b32.xlu1 %v4199_v54, %s7590_s18 }
0x551d   :  { %v4203_v43 = vpop.permute.xlu1 %4202 }
0x551e   :  { %6718 = vmatmul.mubr.msk.f32.vlgmr.msra.gmra.mrb[42].mxu1 %vm284_vm3, %v4203_v43 }
0x551f   :  { %7107 = vmatpush3.bf16.msra.mxu1 %v8374_v52  ;;  %6728 = vmatprep.mubr.msk.f32.mxu1 %vm7587_vm2, %v7588_v8 }
0x5520   :  { %7108 = vmatprep.subr.bf16.mxu1 %v7586_v0 }
0x5523   :  { %7110 = vmatpush3.bf16.msra.mxu1 %v8384_v40 }
0x5524   :  { %7111 = vmatprep.subr.bf16.mxu1 %v7586_v0 }
0x55f1   :  { %v4272_v56 = vpop.f32.mrb[42].mxu1 }
0x55f2   :  { %v4276_v57 = vadd.f32 %v4272_v56, %v4011_v46  ;;  %v6719_v58 = vpop.f32.mrb[43].mxu1 }
0x55f4   :  { %7456 = vtanh.f32 %v4276_v57  ;;  %v5923_v61 = vmul.f32 -1.442695, %v4276_v57  ;;  %v4021_v57 = vadd.f32 %v8337_v60, %v8412_v25 }
0x55f6   :  { %7458 = vpow2.f32 %v5923_v61 }
0x55fe   :  { %v7457_v59 = vpop.eup %7456 }
0x55ff   :  { %4286 = vrot.lane.b32.xlu0 %v7457_v59, %s7589_s17 }
0x5600   :  { %v7459_v42 = vpop.eup %7458 }
0x5601   :  { %v4280_v9 = vadd.f32 1.0, %v7459_v42 }
0x5603   :  { %7460 = vrcp.f32 %v4280_v9 }
0x560d   :  { %v7461_v11 = vpop.eup %7460 }
0x560e   :  { %v4284_v15 = vmul.f32 %v7461_v11, %v4193_v39 }
0x5671   :  { %v4287_v44 = vpop.permute.xlu0 %4286 }
0x5672   :  { %v4289_v13 = vmul.f32 %v7461_v11, %v4287_v44 }
0x5674   :  { %4291 = vrot.lane.b32.xlu1 %v4289_v13, %s7590_s18 }
0x56e6   :  { %v4292_v16 = vpop.permute.xlu1 %4291 }
0x56e7   :  { %v4294_v36 = vadd.f32 %v4292_v16, %v4284_v15 }
0x56e9   :  { %7462 = vtanh.f32 %v4294_v36 }
0x56f3   :  { %v7463_v17 = vpop.eup %7462 }
0x56f4   :  { %4297 = vrot.lane.b32.xlu0 %v7463_v17, %s7589_s17 }
0x5766   :  { %v4298_v18 = vpop.permute.xlu0 %4297 }
0x5767   :  { %v4300_v38 = vmul.f32 %v7461_v11, %v4298_v18 }
0x5769   :  { %4303 = vrot.lane.b32.xlu1 %v4300_v38, %s7590_s18 }
0x57db   :  { %v4304_v19 = vpop.permute.xlu1 %4303 }
0x57dc   :  { %6729 = vmatmul.mubr.msk.f32.vlgmr.msra.gmra.mrb[44].mxu1 %vm284_vm3, %v4304_v19 }
0x57dd   :  { %7113 = vmatpush3.bf16.msra.mxu1 %v8374_v52  ;;  %6739 = vmatprep.mubr.msk.f32.mxu1 %vm7587_vm2, %v7588_v8 }
0x57de   :  { %7114 = vmatprep.subr.bf16.mxu1 %v7586_v0 }
0x57e1   :  { %7116 = vmatpush3.bf16.msra.mxu1 %v8384_v40 }
0x57e2   :  { %7123 = vmatprep.subr.bf16.mxu1 %v7586_v0 }
0x58af   :  { %v4373_v20 = vpop.f32.mrb[44].mxu1 }
0x58b0   :  { %v4377_v51 = vadd.f32 %v4373_v20, %v4016_v6  ;;  %v6730_v14 = vpop.f32.mrb[45].mxu1 }
0x58b2   :  { %7464 = vtanh.f32 %v4377_v51  ;;  %v5925_v22 = vmul.f32 -1.442695, %v4377_v51 }
0x58b4   :  { %7466 = vpow2.f32 %v5925_v22 }
0x58bc   :  { %v7465_v21 = vpop.eup %7464 }
0x58bd   :  { %4387 = vrot.lane.b32.xlu0 %v7465_v21, %s7589_s17  ;;  %v4026_v21 = vadd.f32 %v8412_v25, %v8344_v63 }
0x58be   :  { %v7467_v23 = vpop.eup %7466 }
0x58bf   :  { %v4381_v53 = vadd.f32 1.0, %v7467_v23 }
0x58c1   :  { %7468 = vrcp.f32 %v4381_v53 }
0x58cb   :  { %v7469_v24 = vpop.eup %7468 }
0x58cc   :  { %v4385_v28 = vmul.f32 %v7469_v24, %v4294_v36 }
0x592f   :  { %v4388_v26 = vpop.permute.xlu0 %4387 }
0x5930   :  { %v4390_v27 = vmul.f32 %v7469_v24, %v4388_v26 }
0x5932   :  { %4392 = vrot.lane.b32.xlu1 %v4390_v27, %s7590_s18 }
0x59a4   :  { %v4393_v49 = vpop.permute.xlu1 %4392 }
0x59a5   :  { %v4395_v34 = vadd.f32 %v4393_v49, %v4385_v28 }
0x59a7   :  { %7470 = vtanh.f32 %v4395_v34 }
0x59a8   :  { %7472 = vtanh.f32 %v8407_v45 }
0x59a9   :  { %7474 = vpow2.f32 %v5903_v48 }
0x59b1   :  { %v7471_v29 = vpop.eup %7470 }
0x59b2   :  { %4398 = vrot.lane.b32.xlu0 %v7471_v29, %s7589_s17  ;;  %v7473_v1 = vpop.eup %7472 }
0x59b3   :  { %v7475_v47 = vpop.eup %7474 }
0x59b4   :  { %v3837_v30 = vadd.f32 1.0, %v7475_v47 }
0x59b6   :  { %3843 = vrot.lane.b32.xlu0 %v7473_v1, %s7589_s17  ;;  %7476 = vrcp.f32 %v3837_v30 }
0x59c0   :  { %v7477_v4 = vpop.eup %7476 }
0x59c1   :  { %v3841_v45 = vmul.f32 %v7477_v4, %v8364_v3 }
0x5a24   :  { %v4399_v31 = vpop.permute.xlu0 %4398 }
0x5a25   :  { %v4401_v32 = vmul.f32 %v7469_v24, %v4399_v31 }
0x5a27   :  { %4404 = vrot.lane.b32.xlu1 %v4401_v32, %s7590_s18 }
0x5a28   :  { %v3844_v33 = vpop.permute.xlu0 %3843 }
0x5a29   :  { %v3846_v39 = vmul.f32 %v7477_v4, %v3844_v33 }
0x5a2b   :  { %3848 = vrot.lane.b32.xlu0 %v3846_v39, %s7590_s18 }
0x5a99   :  { %v4405_v35 = vpop.permute.xlu1 %4404 }
0x5a9a   :  { %6740 = vmatmul.mubr.msk.f32.vlgmr.msra.gmra.mrb[46].mxu1 %vm284_vm3, %v4405_v35 }
0x5a9b   :  { %7125 = vmatpush3.bf16.msra.mxu1 %v8374_v52  ;;  %6761 = vmatprep.mubr.msk.f32.mxu1 %vm7587_vm2, %v7588_v8 }
0x5a9c   :  { %7126 = vmatprep.subr.bf16.mxu1 %v7586_v0 }
0x5a9d   :  { %v3849_v37 = vpop.permute.xlu0 %3848 }
0x5a9e   :  { %v3851_v54 = vadd.f32 %v3849_v37, %v3841_v45 }
0x5a9f   :  { %7128 = vmatpush3.bf16.msra.mxu1 %v8384_v40 }
0x5aa0   :  { %7478 = vtanh.f32 %v3851_v54  ;;  %7135 = vmatprep.subr.bf16.mxu1 %v7586_v0 }
0x5aaa   :  { %v7479_v43 = vpop.eup %7478 }
0x5aab   :  { %3854 = vrot.lane.b32.xlu0 %v7479_v43, %s7589_s17 }
0x5b1d   :  { %v3855_v46 = vpop.permute.xlu0 %3854 }
0x5b1e   :  { %v3857_v56 = vmul.f32 %v7477_v4, %v3855_v46  ;;  %v4031_v4 = vadd.f32 %v8342_v62, %v8412_v25 }
0x5b20   :  { %3859 = vrot.lane.b32.xlu0 %v3857_v56, %s7590_s18 }
0x5b6d   :  { %v4474_v3 = vpop.f32.mrb[46].mxu1 }
0x5b6e   :  { %v4478_v58 = vadd.f32 %v4474_v3, %v4021_v57  ;;  %v6741_v59 = vpop.f32.mrb[47].mxu1 }
0x5b70   :  { %7480 = vtanh.f32 %v4478_v58  ;;  %v5927_v11 = vmul.f32 -1.442695, %v4478_v58 }
0x5b72   :  { %7482 = vpow2.f32 %v5927_v11  ;;  %v4036_v11 = vadd.f32 %v8412_v25, %v8348_v2 }
0x5b7a   :  { %v7481_v61 = vpop.eup %7480 }
0x5b7b   :  { %4488 = vrot.lane.b32.xlu1 %v7481_v61, %s7589_s17 }
0x5b7c   :  { %v7483_v44 = vpop.eup %7482 }
0x5b7d   :  { %v4482_v60 = vadd.f32 1.0, %v7483_v44 }
0x5b7f   :  { %7484 = vrcp.f32 %v4482_v60 }
0x5b89   :  { %v7485_v13 = vpop.eup %7484 }
0x5b8a   :  { %v4486_v36 = vmul.f32 %v7485_v13, %v4395_v34 }
0x5b92   :  { %v3860_v42 = vpop.permute.xlu0 %3859 }
0x5b93   :  { %3863 = vst.msk [vmem:[#allocation4 + $0x78] sm:$0xff] %vm284_vm3, %v3860_v42 }
0x5b9a   :  { %v3879_v9 = vld [vmem:[#allocation4 + $0x78] sm:$0xff] }
0x5b9b   :  { %6696 = vmatmul.mubr.msk.f32.gmra.mrb[70].mxu0 %vm284_vm3, %v3879_v9 }
0x5b9c   :  { %6750 = vmatprep.mubr.msk.f32.mxu0 %vm7587_vm2, %v7588_v8 }
0x5bed   :  { %v4489_v15 = vpop.permute.xlu1 %4488 }
0x5bee   :  { %v4491_v16 = vmul.f32 %v7485_v13, %v4489_v15 }
0x5bf0   :  { %4493 = vrot.lane.b32.xlu1 %v4491_v16, %s7590_s18 }
0x5c62   :  { %v4494_v17 = vpop.permute.xlu1 %4493 }
0x5c63   :  { %v4496_v18 = vadd.f32 %v4494_v17, %v4486_v36 }
0x5c65   :  { %7486 = vtanh.f32 %v4496_v18 }
0x5c6e   :  { %v8468_v38 = vpop.f32.mrb[70].mxu0 }
0x5c6f   :  { %v7487_v19 = vpop.eup %7486  ;;  %v8470_v6 = vpop.f32.mrb[71].mxu0 }
0x5c70   :  { %4499 = vrot.lane.b32.xlu1 %v7487_v19, %s7589_s17 }
0x5ce2   :  { %v4500_v20 = vpop.permute.xlu1 %4499 }
0x5ce3   :  { %v4502_v51 = vmul.f32 %v7485_v13, %v4500_v20 }
0x5ce5   :  { %4505 = vrot.lane.b32.xlu1 %v4502_v51, %s7590_s18 }
0x5d57   :  { %v4506_v14 = vpop.permute.xlu1 %4505 }
0x5d58   :  { %6751 = vmatmul.mubr.msk.f32.vlgmr.msra.gmra.mrb[72].mxu0 %vm284_vm3, %v4506_v14 }
0x5d59   :  { %7131 = vmatpush3.bf16.msra.mxu0 %v8374_v52  ;;  %6772 = vmatprep.mubr.msk.f32.mxu0 %vm7587_vm2, %v7588_v8 }
0x5d5a   :  { %7132 = vmatprep.subr.bf16.mxu0 %v7586_v0 }
0x5d5d   :  { %7134 = vmatpush3.bf16.msra.mxu0 %v8384_v40 }
0x5d5e   :  { %7141 = vmatprep.subr.bf16.mxu0 %v7586_v0 }
0x5e2b   :  { %v4575_v22 = vpop.f32.mrb[72].mxu0 }
0x5e2c   :  { %v4579_v23 = vadd.f32 %v4575_v22, %v4026_v21  ;;  %v6752_v53 = vpop.f32.mrb[73].mxu0 }
0x5e2e   :  { %7488 = vtanh.f32 %v4579_v23  ;;  %v5929_v26 = vmul.f32 -1.442695, %v4579_v23 }
0x5e30   :  { %7490 = vpow2.f32 %v5929_v26 }
0x5e38   :  { %v7489_v24 = vpop.eup %7488 }
0x5e39   :  { %4589 = vrot.lane.b32.xlu0 %v7489_v24, %s7589_s17  ;;  %v4041_v24 = vadd.f32 %v8346_v10, %v8412_v25 }
0x5e3a   :  { %v7491_v27 = vpop.eup %7490 }
0x5e3b   :  { %v4583_v28 = vadd.f32 1.0, %v7491_v27 }
0x5e3d   :  { %7492 = vrcp.f32 %v4583_v28 }
0x5e47   :  { %v7493_v49 = vpop.eup %7492 }
0x5e48   :  { %v4587_v1 = vmul.f32 %v7493_v49, %v4496_v18 }
0x5eab   :  { %v4590_v34 = vpop.permute.xlu0 %4589 }
0x5eac   :  { %v4592_v29 = vmul.f32 %v7493_v49, %v4590_v34 }
0x5eae   :  { %4594 = vrot.lane.b32.xlu1 %v4592_v29, %s7590_s18 }
0x5f20   :  { %v4595_v48 = vpop.permute.xlu1 %4594 }
0x5f21   :  { %v4597_v63 = vadd.f32 %v4595_v48, %v4587_v1 }
0x5f23   :  { %7494 = vtanh.f32 %v4597_v63 }
0x5f2d   :  { %v7495_v47 = vpop.eup %7494 }
0x5f2e   :  { %4600 = vrot.lane.b32.xlu0 %v7495_v47, %s7589_s17 }
0x5fa0   :  { %v4601_v30 = vpop.permute.xlu0 %4600 }
0x5fa1   :  { %v4603_v31 = vmul.f32 %v7493_v49, %v4601_v30 }
0x5fa3   :  { %4606 = vrot.lane.b32.xlu1 %v4603_v31, %s7590_s18 }
0x6015   :  { %v4607_v32 = vpop.permute.xlu1 %4606 }
0x6016   :  { %6762 = vmatmul.mubr.msk.f32.vlgmr.msra.gmra.mrb[48].mxu1 %vm284_vm3, %v4607_v32 }
0x6017   :  { %7137 = vmatpush3.bf16.msra.mxu1 %v8374_v52  ;;  %6783 = vmatprep.mubr.msk.f32.mxu1 %vm7587_vm2, %v7588_v8 }
0x6018   :  { %7138 = vmatprep.subr.bf16.mxu1 %v7586_v0 }
0x601b   :  { %7140 = vmatpush3.bf16.msra.mxu1 %v8384_v40 }
0x601c   :  { %7147 = vmatprep.subr.bf16.mxu1 %v7586_v0 }
0x60e9   :  { %v4676_v33 = vpop.f32.mrb[48].mxu1 }
0x60ea   :  { %v4680_v39 = vadd.f32 %v4676_v33, %v4031_v4  ;;  %v6763_v35 = vpop.f32.mrb[49].mxu1 }
0x60eb   :  { %v4046_v35 = vadd.f32 %v8412_v25, %v8352_v12 }
0x60ec   :  { %7496 = vtanh.f32 %v4680_v39  ;;  %v5931_v37 = vmul.f32 -1.442695, %v4680_v39 }
0x60ee   :  { %7498 = vpow2.f32 %v5931_v37 }
0x60f6   :  { %v7497_v45 = vpop.eup %7496 }
0x60f7   :  { %4690 = vrot.lane.b32.xlu0 %v7497_v45, %s7589_s17 }
0x60f8   :  { %v7499_v54 = vpop.eup %7498 }
0x60f9   :  { %v4684_v43 = vadd.f32 1.0, %v7499_v54 }
0x60fb   :  { %7500 = vrcp.f32 %v4684_v43 }
0x6105   :  { %v7501_v46 = vpop.eup %7500 }
0x6106   :  { %v4688_v3 = vmul.f32 %v7501_v46, %v4597_v63 }
0x6169   :  { %v4691_v56 = vpop.permute.xlu0 %4690 }
0x616a   :  { %v4693_v57 = vmul.f32 %v7501_v46, %v4691_v56 }
0x616c   :  { %4695 = vrot.lane.b32.xlu1 %v4693_v57, %s7590_s18 }
0x61de   :  { %v4696_v58 = vpop.permute.xlu1 %4695 }
0x61df   :  { %v4698_v62 = vadd.f32 %v4696_v58, %v4688_v3 }
0x61e1   :  { %7502 = vtanh.f32 %v4698_v62 }
0x61eb   :  { %v7503_v59 = vpop.eup %7502 }
0x61ec   :  { %4701 = vrot.lane.b32.xlu0 %v7503_v59, %s7589_s17 }
0x625e   :  { %v4702_v61 = vpop.permute.xlu0 %4701 }
0x625f   :  { %v4704_v42 = vmul.f32 %v7501_v46, %v4702_v61 }
0x6261   :  { %4707 = vrot.lane.b32.xlu1 %v4704_v42, %s7590_s18 }
0x62d3   :  { %v4708_v9 = vpop.permute.xlu1 %4707 }
0x62d4   :  { %6773 = vmatmul.mubr.msk.f32.vlgmr.msra.gmra.mrb[74].mxu0 %vm284_vm3, %v4708_v9 }
0x62d5   :  { %7143 = vmatpush3.bf16.msra.mxu0 %v8374_v52  ;;  %6794 = vmatprep.mubr.msk.f32.mxu0 %vm7587_vm2, %v7588_v8 }
0x62d6   :  { %7144 = vmatprep.subr.bf16.mxu0 %v7586_v0 }
0x62d9   :  { %7146 = vmatpush3.bf16.msra.mxu0 %v8384_v40 }
0x62da   :  { %7153 = vmatprep.subr.bf16.mxu0 %v7586_v0 }
0x63a7   :  { %v4777_v44 = vpop.f32.mrb[74].mxu0 }
0x63a8   :  { %v4781_v60 = vadd.f32 %v4777_v44, %v4036_v11  ;;  %v6774_v13 = vpop.f32.mrb[75].mxu0 }
0x63aa   :  { %7504 = vtanh.f32 %v4781_v60  ;;  %v5933_v16 = vmul.f32 -1.442695, %v4781_v60  ;;  %v4051_v60 = vadd.f32 %v8350_v5, %v8412_v25 }
0x63ac   :  { %7506 = vpow2.f32 %v5933_v16 }
0x63b4   :  { %v7505_v15 = vpop.eup %7504 }
0x63b5   :  { %4791 = vrot.lane.b32.xlu0 %v7505_v15, %s7589_s17 }
0x63b6   :  { %v7507_v36 = vpop.eup %7506 }
0x63b7   :  { %v4785_v17 = vadd.f32 1.0, %v7507_v36 }
0x63b9   :  { %7508 = vrcp.f32 %v4785_v17 }
0x63c3   :  { %v7509_v18 = vpop.eup %7508 }
0x63c4   :  { %v4789_v51 = vmul.f32 %v7509_v18, %v4698_v62 }
0x6427   :  { %v4792_v19 = vpop.permute.xlu0 %4791 }
0x6428   :  { %v4794_v20 = vmul.f32 %v7509_v18, %v4792_v19 }
0x642a   :  { %4796 = vrot.lane.b32.xlu1 %v4794_v20, %s7590_s18 }
0x649c   :  { %v4797_v14 = vpop.permute.xlu1 %4796 }
0x649d   :  { %v4799_v2 = vadd.f32 %v4797_v14, %v4789_v51 }
0x649f   :  { %7510 = vtanh.f32 %v4799_v2 }
0x64a9   :  { %v7511_v21 = vpop.eup %7510 }
0x64aa   :  { %4802 = vrot.lane.b32.xlu0 %v7511_v21, %s7589_s17 }
0x651c   :  { %v4803_v22 = vpop.permute.xlu0 %4802 }
0x651d   :  { %v4805_v23 = vmul.f32 %v7509_v18, %v4803_v22 }
0x651f   :  { %4808 = vrot.lane.b32.xlu1 %v4805_v23, %s7590_s18 }
0x6591   :  { %v4809_v53 = vpop.permute.xlu1 %4808 }
0x6592   :  { %6784 = vmatmul.mubr.msk.f32.vlgmr.msra.gmra.mrb[50].mxu1 %vm284_vm3, %v4809_v53 }
0x6593   :  { %7149 = vmatpush3.bf16.msra.mxu1 %v8374_v52  ;;  %6805 = vmatprep.mubr.msk.f32.mxu1 %vm7587_vm2, %v7588_v8 }
0x6594   :  { %7150 = vmatprep.subr.bf16.mxu1 %v7586_v0 }
0x6597   :  { %7152 = vmatpush3.bf16.msra.mxu1 %v8384_v40 }
0x6598   :  { %7159 = vmatprep.subr.bf16.mxu1 %v7586_v0 }
0x6665   :  { %v4878_v26 = vpop.f32.mrb[50].mxu1 }
0x6666   :  { %v4882_v27 = vadd.f32 %v4878_v26, %v4041_v24  ;;  %v6785_v28 = vpop.f32.mrb[51].mxu1  ;;  %v4056_v26 = vadd.f32 %v8412_v25, %v8356_v41 }
0x6668   :  { %7512 = vtanh.f32 %v4882_v27  ;;  %v5935_v34 = vmul.f32 -1.442695, %v4882_v27 }
0x666a   :  { %7514 = vpow2.f32 %v5935_v34 }
0x6672   :  { %v7513_v49 = vpop.eup %7512 }
0x6673   :  { %4892 = vrot.lane.b32.xlu0 %v7513_v49, %s7589_s17 }
0x6674   :  { %v7515_v29 = vpop.eup %7514 }
0x6675   :  { %v4886_v1 = vadd.f32 1.0, %v7515_v29 }
0x6677   :  { %7516 = vrcp.f32 %v4886_v1 }
0x6681   :  { %v7517_v48 = vpop.eup %7516 }
0x6682   :  { %v4890_v30 = vmul.f32 %v7517_v48, %v4799_v2 }
0x66e5   :  { %v4893_v63 = vpop.permute.xlu0 %4892 }
0x66e6   :  { %v4895_v47 = vmul.f32 %v7517_v48, %v4893_v63 }
0x66e8   :  { %4897 = vrot.lane.b32.xlu1 %v4895_v47, %s7590_s18 }
0x675a   :  { %v4898_v31 = vpop.permute.xlu1 %4897 }
0x675b   :  { %v4900_v10 = vadd.f32 %v4898_v31, %v4890_v30 }
0x675d   :  { %7518 = vtanh.f32 %v4900_v10 }
0x6767   :  { %v7519_v32 = vpop.eup %7518 }
0x6768   :  { %4903 = vrot.lane.b32.xlu0 %v7519_v32, %s7589_s17 }
0x67da   :  { %v4904_v4 = vpop.permute.xlu0 %4903 }
0x67db   :  { %v4906_v33 = vmul.f32 %v7517_v48, %v4904_v4 }
0x67dd   :  { %4909 = vrot.lane.b32.xlu1 %v4906_v33, %s7590_s18 }
0x684f   :  { %v4910_v39 = vpop.permute.xlu1 %4909 }
0x6850   :  { %6795 = vmatmul.mubr.msk.f32.vlgmr.msra.gmra.mrb[76].mxu0 %vm284_vm3, %v4910_v39 }
0x6851   :  { %7155 = vmatpush3.bf16.msra.mxu0 %v8374_v52  ;;  %6816 = vmatprep.mubr.msk.f32.mxu0 %vm7587_vm2, %v7588_v8 }
0x6852   :  { %7156 = vmatprep.subr.bf16.mxu0 %v7586_v0 }
0x6855   :  { %7158 = vmatpush3.bf16.msra.mxu0 %v8384_v40 }
0x6856   :  { %7165 = vmatprep.subr.bf16.mxu0 %v7586_v0 }
0x6923   :  { %v4979_v45 = vpop.f32.mrb[76].mxu0 }
0x6924   :  { %v4983_v37 = vadd.f32 %v4979_v45, %v4046_v35  ;;  %v6796_v54 = vpop.f32.mrb[77].mxu0  ;;  %v4061_v35 = vadd.f32 %v8354_v50, %v8412_v25 }
0x6926   :  { %7520 = vtanh.f32 %v4983_v37  ;;  %v5937_v46 = vmul.f32 -1.442695, %v4983_v37 }
0x6928   :  { %7522 = vpow2.f32 %v5937_v46 }
0x6930   :  { %v7521_v43 = vpop.eup %7520 }
0x6931   :  { %4993 = vrot.lane.b32.xlu0 %v7521_v43, %s7589_s17 }
0x6932   :  { %v7523_v56 = vpop.eup %7522 }
0x6933   :  { %v4987_v57 = vadd.f32 1.0, %v7523_v56 }
0x6935   :  { %7524 = vrcp.f32 %v4987_v57 }
0x693f   :  { %v7525_v3 = vpop.eup %7524 }
0x6940   :  { %v4991_v59 = vmul.f32 %v7525_v3, %v4900_v10 }
0x69a3   :  { %v4994_v58 = vpop.permute.xlu0 %4993 }
0x69a4   :  { %v4996_v62 = vmul.f32 %v7525_v3, %v4994_v58 }
0x69a6   :  { %4998 = vrot.lane.b32.xlu1 %v4996_v62, %s7590_s18 }
0x6a18   :  { %v4999_v61 = vpop.permute.xlu1 %4998 }
0x6a19   :  { %v5001_v12 = vadd.f32 %v4999_v61, %v4991_v59 }
0x6a1b   :  { %7526 = vtanh.f32 %v5001_v12 }
0x6a25   :  { %v7527_v42 = vpop.eup %7526 }
0x6a26   :  { %5004 = vrot.lane.b32.xlu0 %v7527_v42, %s7589_s17 }
0x6a98   :  { %v5005_v9 = vpop.permute.xlu0 %5004 }
0x6a99   :  { %v5007_v11 = vmul.f32 %v7525_v3, %v5005_v9 }
0x6a9b   :  { %5010 = vrot.lane.b32.xlu1 %v5007_v11, %s7590_s18 }
0x6b0d   :  { %v5011_v44 = vpop.permute.xlu1 %5010 }
0x6b0e   :  { %6806 = vmatmul.mubr.msk.f32.vlgmr.msra.gmra.mrb[52].mxu1 %vm284_vm3, %v5011_v44  ;;  %v4066_v44 = vadd.f32 %v8412_v25, %v8360_v7 }
0x6b0f   :  { %7161 = vmatpush3.bf16.msra.mxu1 %v8374_v52  ;;  %6827 = vmatprep.mubr.msk.f32.mxu1 %vm7587_vm2, %v7588_v8 }
0x6b10   :  { %7162 = vmatprep.subr.bf16.mxu1 %v7586_v0 }
0x6b13   :  { %7164 = vmatpush3.bf16.msra.mxu1 %v8384_v40 }
0x6b14   :  { %7171 = vmatprep.subr.bf16.mxu1 %v7586_v0 }
0x6be1   :  { %v5080_v13 = vpop.f32.mrb[52].mxu1 }
0x6be2   :  { %v5084_v15 = vadd.f32 %v5080_v13, %v4051_v60  ;;  %v6807_v16 = vpop.f32.mrb[53].mxu1 }
0x6be4   :  { %7528 = vtanh.f32 %v5084_v15  ;;  %v5939_v17 = vmul.f32 -1.442695, %v5084_v15 }
0x6be6   :  { %7530 = vpow2.f32 %v5939_v17 }
0x6bee   :  { %v7529_v36 = vpop.eup %7528 }
0x6bef   :  { %5094 = vrot.lane.b32.xlu0 %v7529_v36, %s7589_s17 }
0x6bf0   :  { %v7531_v18 = vpop.eup %7530 }
0x6bf1   :  { %v5088_v19 = vadd.f32 1.0, %v7531_v18 }
0x6bf3   :  { %7532 = vrcp.f32 %v5088_v19 }
0x6bfd   :  { %v7533_v20 = vpop.eup %7532 }
0x6bfe   :  { %v5092_v2 = vmul.f32 %v7533_v20, %v5001_v12 }
0x6c61   :  { %v5095_v51 = vpop.permute.xlu0 %5094 }
0x6c62   :  { %v5097_v14 = vmul.f32 %v7533_v20, %v5095_v51 }
0x6c64   :  { %5099 = vrot.lane.b32.xlu1 %v5097_v14, %s7590_s18 }
0x6cd6   :  { %v5100_v21 = vpop.permute.xlu1 %5099 }
0x6cd7   :  { %v5102_v5 = vadd.f32 %v5100_v21, %v5092_v2 }
0x6cd9   :  { %7534 = vtanh.f32 %v5102_v5 }
0x6ce3   :  { %v7535_v22 = vpop.eup %7534 }
0x6ce4   :  { %5105 = vrot.lane.b32.xlu0 %v7535_v22, %s7589_s17 }
0x6d56   :  { %v5106_v23 = vpop.permute.xlu0 %5105 }
0x6d57   :  { %v5108_v53 = vmul.f32 %v7533_v20, %v5106_v23 }
0x6d59   :  { %5111 = vrot.lane.b32.xlu1 %v5108_v53, %s7590_s18  ;;  %v4071_v53 = vadd.f32 %v8358_v55, %v8412_v25 }
0x6dcb   :  { %v5112_v24 = vpop.permute.xlu1 %5111 }
0x6dcc   :  { %6817 = vmatmul.mubr.msk.f32.vlgmr.msra.gmra.mrb[78].mxu0 %vm284_vm3, %v5112_v24 }
0x6dcd   :  { %7167 = vmatpush3.bf16.msra.mxu0 %v8374_v52  ;;  %6838 = vmatprep.mubr.msk.f32.mxu0 %vm7587_vm2, %v7588_v8 }
0x6dce   :  { %7168 = vmatprep.subr.bf16.mxu0 %v7586_v0 }
0x6dd1   :  { %7170 = vmatpush3.bf16.msra.mxu0 %v8384_v40 }
0x6dd2   :  { %7177 = vmatprep.subr.bf16.mxu0 %v7586_v0 }
0x6e9f   :  { %v5181_v27 = vpop.f32.mrb[78].mxu0 }
0x6ea0   :  { %v5185_v28 = vadd.f32 %v5181_v27, %v4056_v26  ;;  %v6818_v49 = vpop.f32.mrb[79].mxu0 }
0x6ea2   :  { %7536 = vtanh.f32 %v5185_v28  ;;  %v5941_v29 = vmul.f32 -1.442695, %v5185_v28 }
0x6ea4   :  { %7538 = vpow2.f32 %v5941_v29 }
0x6eac   :  { %v7537_v34 = vpop.eup %7536 }
0x6ead   :  { %5195 = vrot.lane.b32.xlu0 %v7537_v34, %s7589_s17 }
0x6eae   :  { %v7539_v1 = vpop.eup %7538 }
0x6eaf   :  { %v5189_v48 = vadd.f32 1.0, %v7539_v1 }
0x6eb1   :  { %7540 = vrcp.f32 %v5189_v48 }
0x6ebb   :  { %v7541_v63 = vpop.eup %7540 }
0x6ebc   :  { %v5193_v31 = vmul.f32 %v7541_v63, %v5102_v5 }
0x6f1f   :  { %v5196_v47 = vpop.permute.xlu0 %5195 }
0x6f20   :  { %v5198_v30 = vmul.f32 %v7541_v63, %v5196_v47 }
0x6f22   :  { %5200 = vrot.lane.b32.xlu1 %v5198_v30, %s7590_s18 }
0x6f94   :  { %v5201_v10 = vpop.permute.xlu1 %5200 }
0x6f95   :  { %v5203_v41 = vadd.f32 %v5201_v10, %v5193_v31 }
0x6f97   :  { %7542 = vtanh.f32 %v5203_v41 }
0x6fa1   :  { %v7543_v32 = vpop.eup %7542 }
0x6fa2   :  { %5206 = vrot.lane.b32.xlu0 %v7543_v32, %s7589_s17 }
0x7014   :  { %v5207_v4 = vpop.permute.xlu0 %5206 }
0x7015   :  { %v5209_v33 = vmul.f32 %v7541_v63, %v5207_v4 }
0x7017   :  { %5212 = vrot.lane.b32.xlu1 %v5209_v33, %s7590_s18 }
0x7089   :  { %v5213_v39 = vpop.permute.xlu1 %5212 }
0x708a   :  { %6828 = vmatmul.mubr.msk.f32.vlgmr.msra.gmra.mrb[54].mxu1 %vm284_vm3, %v5213_v39 }
0x708b   :  { %7173 = vmatpush3.bf16.msra.mxu1 %v8374_v52  ;;  %6849 = vmatprep.mubr.msk.f32.mxu1 %vm7587_vm2, %v7588_v8 }
0x708c   :  { %7174 = vmatprep.subr.bf16.mxu1 %v7586_v0 }
0x708f   :  { %7176 = vmatpush3.bf16.msra.mxu1 %v8384_v40 }
0x7090   :  { %7183 = vmatprep.subr.bf16.mxu1 %v7586_v0 }
0x715d   :  { %v5282_v45 = vpop.f32.mrb[54].mxu1 }
0x715e   :  { %v5286_v37 = vadd.f32 %v5282_v45, %v4061_v35  ;;  %v6829_v54 = vpop.f32.mrb[55].mxu1 }
0x7160   :  { %7544 = vtanh.f32 %v5286_v37  ;;  %v5943_v46 = vmul.f32 -1.442695, %v5286_v37 }
0x7162   :  { %7546 = vpow2.f32 %v5943_v46 }
0x716a   :  { %v7545_v43 = vpop.eup %7544 }
0x716b   :  { %5296 = vrot.lane.b32.xlu0 %v7545_v43, %s7589_s17 }
0x716c   :  { %v7547_v56 = vpop.eup %7546 }
0x716d   :  { %v5290_v57 = vadd.f32 1.0, %v7547_v56 }
0x716f   :  { %7548 = vrcp.f32 %v5290_v57 }
0x7179   :  { %v7549_v3 = vpop.eup %7548 }
0x717a   :  { %v5294_v59 = vmul.f32 %v7549_v3, %v5203_v41  ;;  %v4076_v41 = vadd.f32 %v8412_v25, %v8470_v6 }
0x71dd   :  { %v5297_v58 = vpop.permute.xlu0 %5296 }
0x71de   :  { %v5299_v62 = vmul.f32 %v7549_v3, %v5297_v58 }
0x71e0   :  { %5301 = vrot.lane.b32.xlu1 %v5299_v62, %s7590_s18 }
0x7252   :  { %v5302_v61 = vpop.permute.xlu1 %5301 }
0x7253   :  { %v5304_v50 = vadd.f32 %v5302_v61, %v5294_v59  ;;  %v4081_v59 = vadd.f32 %v8468_v38, %v8412_v25  ;;  %v5715_v38 = vld [vmem:[%s8649_s10] sm:$0xff] }
0x7255   :  { %7550 = vtanh.f32 %v5304_v50 }
0x725f   :  { %v7551_v12 = vpop.eup %7550 }
0x7260   :  { %5307 = vrot.lane.b32.xlu0 %v7551_v12, %s7589_s17 }
0x72d2   :  { %v5308_v42 = vpop.permute.xlu0 %5307 }
0x72d3   :  { %v5310_v9 = vmul.f32 %v7549_v3, %v5308_v42 }
0x72d5   :  { %5313 = vrot.lane.b32.xlu1 %v5310_v9, %s7590_s18 }
0x7347   :  { %v5314_v11 = vpop.permute.xlu1 %5313 }
0x7348   :  { %6839 = vmatmul.mubr.msk.f32.vlgmr.msra.gmra.mrb[80].mxu0 %vm284_vm3, %v5314_v11 }
0x7349   :  { %7179 = vmatpush3.bf16.msra.mxu0 %v8374_v52  ;;  %6860 = vmatprep.mubr.msk.f32.mxu0 %vm7587_vm2, %v7588_v8 }
0x734a   :  { %7180 = vmatprep.subr.bf16.mxu0 %v7586_v0 }
0x734d   :  { %7182 = vmatpush3.bf16.msra.mxu0 %v8384_v40 }
0x734e   :  { %7189 = vmatprep.subr.bf16.mxu0 %v7586_v0 }
0x741b   :  { %v5383_v60 = vpop.f32.mrb[80].mxu0 }
0x741c   :  { %v5387_v13 = vadd.f32 %v5383_v60, %v4066_v44  ;;  %v6840_v15 = vpop.f32.mrb[81].mxu0 }
0x741e   :  { %7552 = vtanh.f32 %v5387_v13  ;;  %v5945_v36 = vmul.f32 -1.442695, %v5387_v13 }
0x7420   :  { %7554 = vpow2.f32 %v5945_v36 }
0x7428   :  { %v7553_v16 = vpop.eup %7552 }
0x7429   :  { %5397 = vrot.lane.b32.xlu0 %v7553_v16, %s7589_s17 }
0x742a   :  { %v7555_v17 = vpop.eup %7554 }
0x742b   :  { %v5391_v18 = vadd.f32 1.0, %v7555_v17  ;;  %v5716_v17 = vld [vmem:[%s8649_s10 + $0x8] sm:$0xff] }
0x742d   :  { %7556 = vrcp.f32 %v5391_v18  ;;  %v5717_v18 = vld [vmem:[%s8649_s10 + $0x10] sm:$0xff] }
0x7437   :  { %v7557_v19 = vpop.eup %7556 }
0x7438   :  { %v5395_v14 = vmul.f32 %v7557_v19, %v5304_v50 }
0x749b   :  { %v5398_v20 = vpop.permute.xlu0 %5397 }
0x749c   :  { %v5400_v51 = vmul.f32 %v7557_v19, %v5398_v20  ;;  %v5718_v20 = vld [vmem:[%s8649_s10 + $0x18] sm:$0xff] }
0x749e   :  { %5402 = vrot.lane.b32.xlu1 %v5400_v51, %s7590_s18  ;;  %v7193_v51 = vpack.c.bf16 %v5718_v20, %v5717_v18 }
0x7510   :  { %v5403_v2 = vpop.permute.xlu1 %5402 }
0x7511   :  { %v5405_v7 = vadd.f32 %v5403_v2, %v5395_v14 }
0x7513   :  { %7558 = vtanh.f32 %v5405_v7 }
0x751d   :  { %v7559_v21 = vpop.eup %7558 }
0x751e   :  { %5408 = vrot.lane.b32.xlu0 %v7559_v21, %s7589_s17 }
0x7590   :  { %v5409_v5 = vpop.permute.xlu0 %5408 }
0x7591   :  { %v5411_v22 = vmul.f32 %v7557_v19, %v5409_v5  ;;  %v7190_v19 = vpack.c.bf16 %v5716_v17, %v5715_v38  ;;  %v5952_v5 = vld [vmem:[%s8650_s11] ss:$0 sm:$0xff] }
0x7593   :  { %5414 = vrot.lane.b32.xlu1 %v5411_v22, %s7590_s18 }
0x7605   :  { %v5415_v23 = vpop.permute.xlu1 %5414 }
0x7606   :  { %6850 = vmatmul.mubr.msk.f32.vlgmr.msra.gmra.mrb[56].mxu1 %vm284_vm3, %v5415_v23 }
0x7607   :  { %7185 = vmatpush3.bf16.msra.mxu1 %v8374_v52  ;;  %6871 = vmatprep.mubr.msk.f32.mxu1 %vm7587_vm2, %v7588_v8 }
0x7608   :  { %7186 = vmatprep.subr.bf16.mxu1 %v7586_v0 }
0x760b   :  { %7188 = vmatpush3.bf16.msra.mxu1 %v8384_v40 }
0x76d9   :  { %v5484_v24 = vpop.f32.mrb[56].mxu1 }
0x76da   :  { %v5488_v26 = vadd.f32 %v5484_v24, %v4071_v53  ;;  %v6851_v27 = vpop.f32.mrb[57].mxu1 }
0x76dc   :  { %7560 = vtanh.f32 %v5488_v26  ;;  %v5947_v49 = vmul.f32 -1.442695, %v5488_v26 }
0x76de   :  { %7562 = vpow2.f32 %v5947_v49 }
0x76e6   :  { %v7561_v28 = vpop.eup %7560 }
0x76e7   :  { %5498 = vrot.lane.b32.xlu0 %v7561_v28, %s7589_s17 }
0x76e8   :  { %v7563_v52 = vpop.eup %7562 }
0x76e9   :  { %v5492_v34 = vadd.f32 1.0, %v7563_v52 }
0x76eb   :  { %7564 = vrcp.f32 %v5492_v34 }
0x76f5   :  { %v7565_v29 = vpop.eup %7564 }
0x76f6   :  { %v5496_v40 = vmul.f32 %v7565_v29, %v5405_v7 }
0x7759   :  { %v5499_v1 = vpop.permute.xlu0 %5498 }
0x775a   :  { %v5501_v48 = vmul.f32 %v7565_v29, %v5499_v1 }
0x775c   :  { %5503 = vrot.lane.b32.xlu1 %v5501_v48, %s7590_s18 }
0x77ce   :  { %v5504_v63 = vpop.permute.xlu1 %5503 }
0x77cf   :  { %v5506_v55 = vadd.f32 %v5504_v63, %v5496_v40 }
0x77d1   :  { %7566 = vtanh.f32 %v5506_v55 }
0x77db   :  { %v7567_v47 = vpop.eup %7566 }
0x77dc   :  { %5509 = vrot.lane.b32.xlu0 %v7567_v47, %s7589_s17 }
0x784e   :  { %v5510_v30 = vpop.permute.xlu0 %5509 }
0x784f   :  { %v5512_v31 = vmul.f32 %v7565_v29, %v5510_v30 }
0x7851   :  { %5515 = vrot.lane.b32.xlu1 %v5512_v31, %s7590_s18 }
0x78c3   :  { %v5516_v10 = vpop.permute.xlu1 %5515 }
0x78c4   :  { %6861 = vmatmul.mubr.msk.f32.vlgmr.msra.gmra.mrb[82].mxu0 %vm284_vm3, %v5516_v10 }
0x78c5   :  { %6882 = vmatprep.mubr.msk.f32.mxu0 %vm7587_vm2, %v7588_v8  ;;  %7191 = vmatpush3.bf16.msra.mxu0 %v7190_v19 }
0x78c6   :  { %7192 = vmatprep.subr.bf16.mxu0 %v7586_v0 }
0x78c9   :  { %7194 = vmatpush3.bf16.msra.mxu0 %v7193_v51 }
0x7997   :  { %v5585_v32 = vpop.f32.mrb[82].mxu0 }
0x7998   :  { %v5589_v4 = vadd.f32 %v5585_v32, %v4076_v41  ;;  %v6862_v33 = vpop.f32.mrb[83].mxu0 }
0x799a   :  { %7568 = vtanh.f32 %v5589_v4  ;;  %v5949_v35 = vmul.f32 -1.442695, %v5589_v4 }
0x799c   :  { %7570 = vpow2.f32 %v5949_v35 }
0x79a4   :  { %v7569_v39 = vpop.eup %7568 }
0x79a5   :  { %5599 = vrot.lane.b32.xlu0 %v7569_v39, %s7589_s17 }
0x79a6   :  { %v7571_v45 = vpop.eup %7570 }
0x79a7   :  { %v5593_v37 = vadd.f32 1.0, %v7571_v45 }
0x79a9   :  { %7572 = vrcp.f32 %v5593_v37 }
0x79b3   :  { %v7573_v54 = vpop.eup %7572 }
0x79b4   :  { %v5597_v8 = vmul.f32 %v7573_v54, %v5506_v55 }
0x7a17   :  { %v5600_v43 = vpop.permute.xlu0 %5599 }
0x7a18   :  { %v5602_v46 = vmul.f32 %v7573_v54, %v5600_v43 }
0x7a1a   :  { %5604 = vrot.lane.b32.xlu1 %v5602_v46, %s7590_s18 }
0x7a8c   :  { %v5605_v56 = vpop.permute.xlu1 %5604 }
0x7a8d   :  { %v5607_v6 = vadd.f32 %v5605_v56, %v5597_v8 }
0x7a8f   :  { %7574 = vtanh.f32 %v5607_v6 }
0x7a99   :  { %v7575_v57 = vpop.eup %7574 }
0x7a9a   :  { %5610 = vrot.lane.b32.xlu0 %v7575_v57, %s7589_s17 }
0x7b0c   :  { %v5611_v3 = vpop.permute.xlu0 %5610 }
0x7b0d   :  { %v5613_v58 = vmul.f32 %v7573_v54, %v5611_v3 }
0x7b0f   :  { %5616 = vrot.lane.b32.xlu1 %v5613_v58, %s7590_s18 }
0x7b81   :  { %v5617_v62 = vpop.permute.xlu1 %5616 }
0x7b82   :  { %6872 = vmatmul.mubr.msk.f32.vlgmr.msra.gmra.mrb[58].mxu1 %vm284_vm3, %v5617_v62 }
0x7c55   :  { %v5686_v61 = vpop.f32.mrb[58].mxu1 }
0x7c56   :  { %v5690_v50 = vadd.f32 %v5686_v61, %v4081_v59  ;;  %v6873_v12 = vpop.f32.mrb[59].mxu1 }
0x7c58   :  { %7576 = vtanh.f32 %v5690_v50  ;;  %v5951_v9 = vmul.f32 -1.442695, %v5690_v50 }
0x7c5a   :  { %7578 = vpow2.f32 %v5951_v9 }
0x7c62   :  { %v7577_v42 = vpop.eup %7576 }
0x7c63   :  { %5700 = vrot.lane.b32.xlu0 %v7577_v42, %s7589_s17 }
0x7c64   :  { %v7579_v11 = vpop.eup %7578 }
0x7c65   :  { %v5694_v44 = vadd.f32 1.0, %v7579_v11 }
0x7c67   :  { %7580 = vrcp.f32 %v5694_v44 }
0x7c71   :  { %v7581_v60 = vpop.eup %7580 }
0x7c72   :  { %v5698_v16 = vmul.f32 %v7581_v60, %v5607_v6 }
0x7cd5   :  { %v5701_v13 = vpop.permute.xlu0 %5700 }
0x7cd6   :  { %v5703_v15 = vmul.f32 %v7581_v60, %v5701_v13 }
0x7cd8   :  { %5705 = vrot.lane.b32.xlu1 %v5703_v15, %s7590_s18 }
0x7d4a   :  { %v5706_v36 = vpop.permute.xlu1 %5705 }
0x7d4b   :  { %v5708_v25 = vadd.f32 %v5706_v36, %v5698_v16 }
0x7d4d   :  { %7582 = vtanh.f32 %v5708_v25 }
0x7d57   :  { %v7583_v14 = vpop.eup %7582 }
0x7d58   :  { %5711 = vrot.lane.b32.xlu0 %v7583_v14, %s7589_s17 }
0x7dca   :  { %v5712_v2 = vpop.permute.xlu0 %5711 }
0x7dcb   :  { %v5714_v7 = vmul.f32 %v7581_v60, %v5712_v2 }
0x7dcd   :  { %5727 = vrot.lane.b32.xlu1 %v5714_v7, %s7590_s18 }
0x7e3f   :  { %v5728_v21 = vpop.permute.xlu1 %5727 }
0x7e40   :  { %6883 = vmatmul.mubr.msk.f32.vlgmr.msra.gmra.mrb[84].mxu0 %vm284_vm3, %v5728_v21 }
0x7f13   :  { %v5797_v22 = vpop.f32.mrb[84].mxu0 }
0x7f14   :  { %v5798_v23 = vadd.f32 %v5952_v5, %v5797_v22  ;;  %v6884_v53 = vpop.f32.mrb[85].mxu0 }
0x7f16   :  { %5802 = vst.msk [vmem:[%s8651_s12] sm:$0xff] %vm5801_vm4, %v5798_v23 }

</bundles_post_ra>
